<compile_context>
chip_gen: v7x
topology: tpu7x:2x2x1
jax: 0.10.0
libtpu: 0.0.40
codegen_flags: <defaults>
</compile_context>

<pallas_src>
import functools

import jax
import jax.numpy as jnp
from jax.experimental import pallas as pl
from jax.experimental.pallas import tpu as pltpu


_VMEM_LIMIT = 48 * 1024 * 1024  # safe on v5e/v6e (128 MiB) and v7x (64 MiB)


def _row_tile(m, target=512):
    """Pick a row-tile size: full array if small, else a multiple of 8."""
    if m <= target:
        return m
    for t in range(target, 7, -8):
        if m % t == 0:
            return t
    return target  # ragged edge blocks are fine: all ops below are row-wise


# --------------------- fused LayerNorm (WithBias) + 1x1 conv (matmul) ---------------------
def _ln_matmul_kernel(x_ref, w_ref, b_ref, wm_ref, o_ref):
    x = x_ref[...].astype(jnp.float32)                       # (tm, C)
    mu = jnp.mean(x, axis=-1, keepdims=True)
    var = jnp.mean((x - mu) ** 2, axis=-1, keepdims=True)    # biased var (PyTorch)
    y = (x - mu) * jax.lax.rsqrt(var + 1e-5)                 # rsqrt -> EUP slot
    y = y * w_ref[...] + b_ref[...]                          # (1, C) broadcasts
    o_ref[...] = jnp.dot(
        y, wm_ref[...].astype(jnp.float32), preferred_element_type=jnp.float32
    ).astype(o_ref.dtype)


def layernorm_matmul(x2d, ln_w, ln_b, w):
    M, C = x2d.shape
    N = w.shape[1]
    tm = _row_tile(M)
    return pl.pallas_call(
        _ln_matmul_kernel,
        grid=(pl.cdiv(M, tm),),
        in_specs=[
            pl.BlockSpec((tm, C), lambda i: (i, 0)),
            pl.BlockSpec((1, C), lambda i: (0, 0)),
            pl.BlockSpec((1, C), lambda i: (0, 0)),
            pl.BlockSpec((C, N), lambda i: (0, 0)),
        ],
        out_specs=pl.BlockSpec((tm, N), lambda i: (i, 0)),
        out_shape=jax.ShapeDtypeStruct((M, N), x2d.dtype),
        compiler_params=pltpu.CompilerParams(dimension_semantics=("parallel",)),
    )(x2d, ln_w.reshape(1, -1), ln_b.reshape(1, -1), w)


# --------------------- 1x1 conv (matmul) + residual add, fused ---------------------
def _matmul_residual_kernel(x_ref, w_ref, r_ref, o_ref):
    acc = jnp.dot(
        x_ref[...].astype(jnp.float32),
        w_ref[...].astype(jnp.float32),
        preferred_element_type=jnp.float32,
    )
    o_ref[...] = (r_ref[...].astype(jnp.float32) + acc).astype(o_ref.dtype)


def matmul_residual(x2d, w, res2d):
    M, K = x2d.shape
    N = w.shape[1]
    tm = _row_tile(M)
    return pl.pallas_call(
        _matmul_residual_kernel,
        grid=(pl.cdiv(M, tm),),
        in_specs=[
            pl.BlockSpec((tm, K), lambda i: (i, 0)),
            pl.BlockSpec((K, N), lambda i: (0, 0)),
            pl.BlockSpec((tm, N), lambda i: (i, 0)),
        ],
        out_specs=pl.BlockSpec((tm, N), lambda i: (i, 0)),
        out_shape=jax.ShapeDtypeStruct((M, N), x2d.dtype),
        compiler_params=pltpu.CompilerParams(dimension_semantics=("parallel",)),
    )(x2d, w, res2d)


# --------------------- GELU(x1)*x2 gate + w_po matmul + residual, fused ---------------------
def _gate_matmul_residual_kernel(h_ref, w_ref, r_ref, o_ref, *, hidden):
    h = h_ref[...].astype(jnp.float32)                       # (tm, 2*hidden)
    x1 = h[:, :hidden]
    x2 = h[:, hidden:]
    # exact (erf) GELU, matching PyTorch F.gelu default
    g = 0.5 * x1 * (1.0 + jax.lax.erf(x1 * 0.7071067811865476))
    acc = jnp.dot(
        g * x2, w_ref[...].astype(jnp.float32), preferred_element_type=jnp.float32
    )
    o_ref[...] = (r_ref[...].astype(jnp.float32) + acc).astype(o_ref.dtype)


def gate_matmul_residual(h2d, w, res2d):
    M, K2 = h2d.shape
    hidden = K2 // 2
    N = w.shape[1]
    tm = _row_tile(M)
    kernel = functools.partial(_gate_matmul_residual_kernel, hidden=hidden)
    return pl.pallas_call(
        kernel,
        grid=(pl.cdiv(M, tm),),
        in_specs=[
            pl.BlockSpec((tm, K2), lambda i: (i, 0)),
            pl.BlockSpec((hidden, N), lambda i: (0, 0)),
            pl.BlockSpec((tm, N), lambda i: (i, 0)),
        ],
        out_specs=pl.BlockSpec((tm, N), lambda i: (i, 0)),
        out_shape=jax.ShapeDtypeStruct((M, N), h2d.dtype),
        compiler_params=pltpu.CompilerParams(dimension_semantics=("parallel",)),
    )(h2d, w, res2d)


# --------------------- depthwise 3x3 conv (padding=1, stride=1), halo built in VMEM ---------------------
def _dwconv_kernel(x_ref, w_ref, o_ref, xp_ref):
    H, W, C = o_ref.shape[1], o_ref.shape[2], o_ref.shape[3]
    # Build zero halo in VMEM scratch -- no HBM pad pass in the wrapper.
    xp_ref[...] = jnp.zeros_like(xp_ref)
    xp_ref[1:H + 1, 1:W + 1, :] = x_ref[0].astype(jnp.float32)
    xp = xp_ref[...]                                         # (H+2, W+2, C)
    w = w_ref[...].astype(jnp.float32)                       # (3, 3, C)
    acc = jnp.zeros((H, W, C), jnp.float32)
    for dy in range(3):
        for dx in range(3):
            acc = acc + xp[dy:dy + H, dx:dx + W, :] * w[dy, dx, :]
    o_ref[0] = acc.astype(o_ref.dtype)


def dwconv3x3(x_nhwc, w):
    # TODO(synk): for very large H on v7x (64 MiB VMEM), tile H into row strips with a 2-row halo.
    B, H, W, C = x_nhwc.shape
    return pl.pallas_call(
        _dwconv_kernel,
        grid=(B,),
        in_specs=[
            pl.BlockSpec((1, H, W, C), lambda b: (b, 0, 0, 0)),
            pl.BlockSpec((3, 3, C), lambda b: (0, 0, 0)),
        ],
        out_specs=pl.BlockSpec((1, H, W, C), lambda b: (b, 0, 0, 0)),
        out_shape=jax.ShapeDtypeStruct((B, H, W, C), x_nhwc.dtype),
        scratch_shapes=[pltpu.VMEM((H + 2, W + 2, C), jnp.float32)],
        compiler_params=pltpu.CompilerParams(
            dimension_semantics=("parallel",),
            vmem_limit_bytes=_VMEM_LIMIT,
        ),
    )(x_nhwc, w)


# --------------------- channel attention: one batch (all heads) per grid step ---------------------
def _attn_kernel(t_ref, qkv_ref, o_ref, *, num_heads):
    C = o_ref.shape[-1]
    CH = C // num_heads
    qkv = qkv_ref[0].astype(jnp.float32)                     # (HW, 3C), tokens-major
    q = qkv[:, :C]
    k = qkv[:, C:2 * C]
    v = qkv[:, 2 * C:]
    outs = []
    for h in range(num_heads):                               # static, unrolled at trace time
        sl = slice(h * CH, (h + 1) * CH)
        qh = q[:, sl]
        kh = k[:, sl]
        vh = v[:, sl]
        # F.normalize(x, dim=-1): x / max(||x||_2, 1e-12)  (norm over HW axis)
        qn = qh * jax.lax.rsqrt(
            jnp.maximum(jnp.sum(qh * qh, axis=0, keepdims=True), 1e-24))
        kn = kh * jax.lax.rsqrt(
            jnp.maximum(jnp.sum(kh * kh, axis=0, keepdims=True), 1e-24))
        # attn[c, c'] = sum_hw q[hw, c] * k[hw, c']  -- contract HW, no transpose relayout
        attn = jax.lax.dot_general(
            qn, kn, (((0,), (0,)), ((), ())),
            preferred_element_type=jnp.float32) * t_ref[h]
        attn = attn - jnp.max(attn, axis=-1, keepdims=True)
        e = jnp.exp(attn)
        p = e * pl.reciprocal(jnp.sum(e, axis=-1, keepdims=True), approx=True)
        # out[hw, c] = sum_c' v[hw, c'] * p[c, c']
        out_h = jax.lax.dot_general(
            vh, p, (((1,), (1,)), ((), ())), preferred_element_type=jnp.float32)
        outs.append(out_h)
    o_ref[0] = jnp.concatenate(outs, axis=-1).astype(o_ref.dtype)


def attention(qkv3d, temperature, num_heads):
    B, HW, C3 = qkv3d.shape
    C = C3 // 3
    kernel = functools.partial(_attn_kernel, num_heads=num_heads)
    return pl.pallas_call(
        kernel,
        grid=(B,),
        in_specs=[
            pl.BlockSpec(memory_space=pltpu.MemorySpace.SMEM),   # temperature (NH,)
            pl.BlockSpec((1, HW, C3), lambda b: (b, 0, 0)),
        ],
        out_specs=pl.BlockSpec((1, HW, C), lambda b: (b, 0, 0)),
        out_shape=jax.ShapeDtypeStruct((B, HW, C), qkv3d.dtype),
        compiler_params=pltpu.CompilerParams(
            dimension_semantics=("parallel",),
            vmem_limit_bytes=_VMEM_LIMIT,
        ),
    )(temperature, qkv3d)


# --------------------- full TransformerBlock forward ---------------------
def transformer_block_forward(x_nchw, params, num_heads):
    B, C, H, W = x_nchw.shape
    HW = H * W
    # NCHW -> tokens-major (B*HW, C); single layout change at the boundary.
    x = jnp.transpose(x_nchw, (0, 2, 3, 1)).reshape(B * HW, C)

    # ---- attention branch: x = x + proj(attn(dwconv(qkv(norm1(x))))) ----
    qkv = layernorm_matmul(x, params["norm1_w"], params["norm1_b"], params["w_qkv"])
    qkv = dwconv3x3(qkv.reshape(B, H, W, 3 * C), params["w_dw_qkv"])
    attn_out = attention(qkv.reshape(B, HW, 3 * C), params["temperature"], num_heads)
    x = matmul_residual(attn_out.reshape(B * HW, C), params["w_proj"], x)

    # ---- FFN branch: x = x + po(gelu(x1)*x2) with (x1,x2)=dwconv(pi(norm2(x))) ----
    h2 = layernorm_matmul(x, params["norm2_w"], params["norm2_b"], params["w_pi"])
    hidden2 = h2.shape[-1]
    h2 = dwconv3x3(h2.reshape(B, H, W, hidden2), params["w_dw_ffn"])
    x = gate_matmul_residual(h2.reshape(B * HW, hidden2), params["w_po"], x)

    out = x.reshape(B, H, W, C)
    return jnp.transpose(out, (0, 3, 1, 2))        # back to NCHW


# --------------------- deterministic parameter init (per module __init__ shapes) ---------------------
def init_params(key, dim, num_heads, ffn_expansion_factor=2.66):
    hidden = int(dim * ffn_expansion_factor)
    ks = jax.random.split(key, 6)

    def w(k, shape, fan_in):
        bound = 1.0 / (fan_in ** 0.5)
        return jax.random.uniform(k, shape, jnp.float32, -bound, bound)

    params = dict(
        norm1_w=jnp.ones((dim,), jnp.float32),
        norm1_b=jnp.zeros((dim,), jnp.float32),
        norm2_w=jnp.ones((dim,), jnp.float32),
        norm2_b=jnp.zeros((dim,), jnp.float32),
        w_qkv=w(ks[0], (dim, dim * 3), dim),          # 1x1 conv as (Cin, Cout)
        w_dw_qkv=w(ks[1], (3, 3, dim * 3), 9),        # depthwise 3x3, per-channel
        w_proj=w(ks[2], (dim, dim), dim),
        temperature=jnp.ones((num_heads,), jnp.float32),
        w_pi=w(ks[3], (dim, hidden * 2), dim),
        w_dw_ffn=w(ks[4], (3, 3, hidden * 2), 9),
        w_po=w(ks[5], (hidden, dim), hidden),
    )
    return params, hidden


if __name__ == "__main__":
    key = jax.random.PRNGKey(0)
    B, C, H, W = 2, 16, 8, 8
    num_heads = 2

    kx, kp = jax.random.split(key)
    x = jax.random.normal(kx, (B, C, H, W), jnp.float32)   # PyTorch NCHW input
    params, _ = init_params(kp, C, num_heads)

    fwd = jax.jit(functools.partial(transformer_block_forward, num_heads=num_heads))
    y = fwd(x, params)
    jax.block_until_ready(y)
    assert y.shape == (B, C, H, W)
    assert jnp.all(jnp.isfinite(y))
    print("KERNEL_OK")
</pallas_src>

<mosaic_0001>
module attributes {stable_mosaic.version = 11 : i64} {
  func.func @_ln_matmul_kernel(%arg0: i32, %arg1: memref<128x16xf32, #tpu.memory_space<vmem>>, %arg2: memref<1x16xf32, #tpu.memory_space<vmem>>, %arg3: memref<1x16xf32, #tpu.memory_space<vmem>>, %arg4: memref<16x48xf32, #tpu.memory_space<vmem>>, %arg5: memref<128x48xf32, #tpu.memory_space<vmem>>) attributes {dimension_semantics = [#tpu.dimension_semantics<parallel>], iteration_bounds = array<i64: 1>, scalar_prefetch = 0 : i64, scratch_operands = 0 : i64, tpu.core_type = #tpu.core_type<tc>, window_params = [{transform_indices = @transform_0, window_bounds = array<i64: 128, 16>}, {pipeline_mode = #tpu.pipeline_mode<synchronous>, transform_indices = @transform_1, window_bounds = array<i64: 1, 16>}, {pipeline_mode = #tpu.pipeline_mode<synchronous>, transform_indices = @transform_2, window_bounds = array<i64: 1, 16>}, {pipeline_mode = #tpu.pipeline_mode<synchronous>, transform_indices = @transform_3, window_bounds = array<i64: 16, 48>}, {transform_indices = @transform_4, window_bounds = array<i64: 128, 48>}]} {
    %c0 = arith.constant 0 : index
    %c0_0 = arith.constant 0 : index
    %0 = vector.load %arg1[%c0, %c0_0] : memref<128x16xf32, #tpu.memory_space<vmem>>, vector<128x16xf32>
    %cst = arith.constant dense<0.000000e+00> : vector<128xf32>
    %1 = vector.multi_reduction <add>, %0, %cst [1] : vector<128x16xf32> to vector<128xf32>
    %2 = vector.shape_cast %1 : vector<128xf32> to vector<128x1xf32>
    %cst_1 = arith.constant 1.600000e+01 : f32
    %3 = vector.broadcast %cst_1 : f32 to vector<128x1xf32>
    %4 = arith.divf %2, %3 : vector<128x1xf32>
    %5 = vector.broadcast %4 : vector<128x1xf32> to vector<128x16xf32>
    %6 = arith.subf %0, %5 : vector<128x16xf32>
    %7 = arith.mulf %6, %6 : vector<128x16xf32>
    %cst_2 = arith.constant dense<0.000000e+00> : vector<128xf32>
    %8 = vector.multi_reduction <add>, %7, %cst_2 [1] : vector<128x16xf32> to vector<128xf32>
    %9 = vector.shape_cast %8 : vector<128xf32> to vector<128x1xf32>
    %cst_3 = arith.constant 1.600000e+01 : f32
    %10 = vector.broadcast %cst_3 : f32 to vector<128x1xf32>
    %11 = arith.divf %9, %10 : vector<128x1xf32>
    %12 = vector.broadcast %4 : vector<128x1xf32> to vector<128x16xf32>
    %13 = arith.subf %0, %12 : vector<128x16xf32>
    %cst_4 = arith.constant 9.99999974E-6 : f32
    %14 = vector.broadcast %cst_4 : f32 to vector<128x1xf32>
    %15 = arith.addf %11, %14 : vector<128x1xf32>
    %16 = math.rsqrt %15 : vector<128x1xf32>
    %17 = vector.broadcast %16 : vector<128x1xf32> to vector<128x16xf32>
    %18 = arith.mulf %13, %17 : vector<128x16xf32>
    %c0_5 = arith.constant 0 : index
    %c0_6 = arith.constant 0 : index
    %19 = vector.load %arg2[%c0_5, %c0_6] : memref<1x16xf32, #tpu.memory_space<vmem>>, vector<1x16xf32>
    %20 = vector.broadcast %19 : vector<1x16xf32> to vector<128x16xf32>
    %21 = arith.mulf %18, %20 : vector<128x16xf32>
    %c0_7 = arith.constant 0 : index
    %c0_8 = arith.constant 0 : index
    %22 = vector.load %arg3[%c0_7, %c0_8] : memref<1x16xf32, #tpu.memory_space<vmem>>, vector<1x16xf32>
    %23 = vector.broadcast %22 : vector<1x16xf32> to vector<128x16xf32>
    %24 = arith.addf %21, %23 : vector<128x16xf32>
    %c0_9 = arith.constant 0 : index
    %c0_10 = arith.constant 0 : index
    %25 = vector.load %arg4[%c0_9, %c0_10] : memref<16x48xf32, #tpu.memory_space<vmem>>, vector<16x48xf32>
    %cst_11 = arith.constant dense<0.000000e+00> : vector<128x48xf32>
    %26 = tpu.matmul %24, %25, %cst_11 {dimension_numbers = #tpu.dot_dimension_numbers<[1], [0], [0], [1], [0, 0, 1, 1], [], []>} : vector<128x16xf32>, vector<16x48xf32>, vector<128x48xf32> -> vector<128x48xf32>
    %c0_12 = arith.constant 0 : index
    %c0_13 = arith.constant 0 : index
    %27 = vector.load %arg5[%c0_12, %c0_13] : memref<128x48xf32, #tpu.memory_space<vmem>>, vector<128x48xf32>
    tpu.vector_store %arg5[%c0_12, %c0_13], %26 {strides = array<i32>} : memref<128x48xf32, #tpu.memory_space<vmem>>, vector<128x48xf32>,
    return
  }
  func.func @transform_0(%arg0: i32) -> (i32, i32) {
    %c0_i32 = arith.constant 0 : i32
    %c0_i32_0 = arith.constant 0 : i32
    return %arg0, %c0_i32 : i32, i32
  }
  func.func @transform_1(%arg0: i32) -> (i32, i32) {
    %c0_i32 = arith.constant 0 : i32
    %c0_i32_0 = arith.constant 0 : i32
    %c0_i32_1 = arith.constant 0 : i32
    return %c0_i32, %c0_i32_0 : i32, i32
  }
  func.func @transform_2(%arg0: i32) -> (i32, i32) {
    %c0_i32 = arith.constant 0 : i32
    %c0_i32_0 = arith.constant 0 : i32
    %c0_i32_1 = arith.constant 0 : i32
    return %c0_i32, %c0_i32_0 : i32, i32
  }
  func.func @transform_3(%arg0: i32) -> (i32, i32) {
    %c0_i32 = arith.constant 0 : i32
    %c0_i32_0 = arith.constant 0 : i32
    %c0_i32_1 = arith.constant 0 : i32
    return %c0_i32, %c0_i32_0 : i32, i32
  }
  func.func @transform_4(%arg0: i32) -> (i32, i32) {
    %c0_i32 = arith.constant 0 : i32
    %c0_i32_0 = arith.constant 0 : i32
    return %arg0, %c0_i32 : i32, i32
  }
}

module attributes {stable_mosaic.version = 11 : i64} {
  func.func @_dwconv_kernel(%arg0: i32, %arg1: memref<1x8x8x48xf32, #tpu.memory_space<vmem>>, %arg2: memref<3x3x48xf32, #tpu.memory_space<vmem>>, %arg3: memref<1x8x8x48xf32, #tpu.memory_space<vmem>>, %arg4: memref<10x10x48xf32, #tpu.memory_space<vmem>>) attributes {dimension_semantics = [#tpu.dimension_semantics<parallel>], iteration_bounds = array<i64: 2>, scalar_prefetch = 0 : i64, scratch_operands = 1 : i64, tpu.core_type = #tpu.core_type<tc>, window_params = [{transform_indices = @transform_0, window_bounds = array<i64: 1, 8, 8, 48>}, {pipeline_mode = #tpu.pipeline_mode<synchronous>, transform_indices = @transform_1, window_bounds = array<i64: 3, 3, 48>}, {transform_indices = @transform_2, window_bounds = array<i64: 1, 8, 8, 48>}]} {
    %cst = arith.constant 0.000000e+00 : f32
    %0 = vector.broadcast %cst : f32 to vector<10x10x48xf32>
    %c0 = arith.constant 0 : index
    %c0_0 = arith.constant 0 : index
    %c0_1 = arith.constant 0 : index
    %1 = vector.load %arg4[%c0, %c0_0, %c0_1] : memref<10x10x48xf32, #tpu.memory_space<vmem>>, vector<10x10x48xf32>
    tpu.vector_store %arg4[%c0, %c0_0, %c0_1], %0 {strides = array<i32>} : memref<10x10x48xf32, #tpu.memory_space<vmem>>, vector<10x10x48xf32>,
    %c0_2 = arith.constant 0 : index
    %c0_3 = arith.constant 0 : index
    %c0_4 = arith.constant 0 : index
    %c0_5 = arith.constant 0 : index
    %2 = vector.load %arg1[%c0_2, %c0_3, %c0_4, %c0_5] : memref<1x8x8x48xf32, #tpu.memory_space<vmem>>, vector<1x8x8x48xf32>
    %3 = vector.shape_cast %2 : vector<1x8x8x48xf32> to vector<8x8x48xf32>
    %c1 = arith.constant 1 : index
    %c1_6 = arith.constant 1 : index
    %c0_7 = arith.constant 0 : index
    %4 = vector.load %arg4[%c1, %c1_6, %c0_7] : memref<10x10x48xf32, #tpu.memory_space<vmem>>, vector<8x8x48xf32>
    tpu.vector_store %arg4[%c1, %c1_6, %c0_7], %3 {strides = array<i32>} : memref<10x10x48xf32, #tpu.memory_space<vmem>>, vector<8x8x48xf32>,
    %c0_8 = arith.constant 0 : index
    %c0_9 = arith.constant 0 : index
    %c0_10 = arith.constant 0 : index
    %5 = vector.load %arg4[%c0_8, %c0_9, %c0_10] : memref<10x10x48xf32, #tpu.memory_space<vmem>>, vector<10x10x48xf32>
    %c0_11 = arith.constant 0 : index
    %c0_12 = arith.constant 0 : index
    %c0_13 = arith.constant 0 : index
    %6 = vector.load %arg2[%c0_11, %c0_12, %c0_13] : memref<3x3x48xf32, #tpu.memory_space<vmem>>, vector<3x3x48xf32>
    %cst_14 = arith.constant 0.000000e+00 : f32
    %7 = vector.broadcast %cst_14 : f32 to vector<8x8x48xf32>
    %8 = vector.extract_strided_slice %5 {offsets = [0, 0, 0], sizes = [8, 8, 48], strides = [1, 1, 1]} : vector<10x10x48xf32> to vector<8x8x48xf32>
    %9 = vector.extract_strided_slice %6 {offsets = [0, 0, 0], sizes = [1, 1, 48], strides = [1, 1, 1]} : vector<3x3x48xf32> to vector<1x1x48xf32>
    %10 = vector.shape_cast %9 : vector<1x1x48xf32> to vector<48xf32>
    %11 = vector.shape_cast %10 : vector<48xf32> to vector<1x1x48xf32>
    %12 = vector.broadcast %11 : vector<1x1x48xf32> to vector<8x8x48xf32>
    %13 = arith.mulf %8, %12 : vector<8x8x48xf32>
    %14 = arith.addf %7, %13 : vector<8x8x48xf32>
    %15 = vector.extract_strided_slice %5 {offsets = [0, 1, 0], sizes = [8, 8, 48], strides = [1, 1, 1]} : vector<10x10x48xf32> to vector<8x8x48xf32>
    %16 = vector.extract_strided_slice %6 {offsets = [0, 1, 0], sizes = [1, 1, 48], strides = [1, 1, 1]} : vector<3x3x48xf32> to vector<1x1x48xf32>
    %17 = vector.shape_cast %16 : vector<1x1x48xf32> to vector<48xf32>
    %18 = vector.shape_cast %17 : vector<48xf32> to vector<1x1x48xf32>
    %19 = vector.broadcast %18 : vector<1x1x48xf32> to vector<8x8x48xf32>
    %20 = arith.mulf %15, %19 : vector<8x8x48xf32>
    %21 = arith.addf %14, %20 : vector<8x8x48xf32>
    %22 = vector.extract_strided_slice %5 {offsets = [0, 2, 0], sizes = [8, 8, 48], strides = [1, 1, 1]} : vector<10x10x48xf32> to vector<8x8x48xf32>
    %23 = vector.extract_strided_slice %6 {offsets = [0, 2, 0], sizes = [1, 1, 48], strides = [1, 1, 1]} : vector<3x3x48xf32> to vector<1x1x48xf32>
    %24 = vector.shape_cast %23 : vector<1x1x48xf32> to vector<48xf32>
    %25 = vector.shape_cast %24 : vector<48xf32> to vector<1x1x48xf32>
    %26 = vector.broadcast %25 : vector<1x1x48xf32> to vector<8x8x48xf32>
    %27 = arith.mulf %22, %26 : vector<8x8x48xf32>
    %28 = arith.addf %21, %27 : vector<8x8x48xf32>
    %29 = vector.extract_strided_slice %5 {offsets = [1, 0, 0], sizes = [8, 8, 48], strides = [1, 1, 1]} : vector<10x10x48xf32> to vector<8x8x48xf32>
    %30 = vector.extract_strided_slice %6 {offsets = [1, 0, 0], sizes = [1, 1, 48], strides = [1, 1, 1]} : vector<3x3x48xf32> to vector<1x1x48xf32>
    %31 = vector.shape_cast %30 : vector<1x1x48xf32> to vector<48xf32>
    %32 = vector.shape_cast %31 : vector<48xf32> to vector<1x1x48xf32>
    %33 = vector.broadcast %32 : vector<1x1x48xf32> to vector<8x8x48xf32>
    %34 = arith.mulf %29, %33 : vector<8x8x48xf32>
    %35 = arith.addf %28, %34 : vector<8x8x48xf32>
    %36 = vector.extract_strided_slice %5 {offsets = [1, 1, 0], sizes = [8, 8, 48], strides = [1, 1, 1]} : vector<10x10x48xf32> to vector<8x8x48xf32>
    %37 = vector.extract_strided_slice %6 {offsets = [1, 1, 0], sizes = [1, 1, 48], strides = [1, 1, 1]} : vector<3x3x48xf32> to vector<1x1x48xf32>
    %38 = vector.shape_cast %37 : vector<1x1x48xf32> to vector<48xf32>
    %39 = vector.shape_cast %38 : vector<48xf32> to vector<1x1x48xf32>
    %40 = vector.broadcast %39 : vector<1x1x48xf32> to vector<8x8x48xf32>
    %41 = arith.mulf %36, %40 : vector<8x8x48xf32>
    %42 = arith.addf %35, %41 : vector<8x8x48xf32>
    %43 = vector.extract_strided_slice %5 {offsets = [1, 2, 0], sizes = [8, 8, 48], strides = [1, 1, 1]} : vector<10x10x48xf32> to vector<8x8x48xf32>
    %44 = vector.extract_strided_slice %6 {offsets = [1, 2, 0], sizes = [1, 1, 48], strides = [1, 1, 1]} : vector<3x3x48xf32> to vector<1x1x48xf32>
    %45 = vector.shape_cast %44 : vector<1x1x48xf32> to vector<48xf32>
    %46 = vector.shape_cast %45 : vector<48xf32> to vector<1x1x48xf32>
    %47 = vector.broadcast %46 : vector<1x1x48xf32> to vector<8x8x48xf32>
    %48 = arith.mulf %43, %47 : vector<8x8x48xf32>
    %49 = arith.addf %42, %48 : vector<8x8x48xf32>
    %50 = vector.extract_strided_slice %5 {offsets = [2, 0, 0], sizes = [8, 8, 48], strides = [1, 1, 1]} : vector<10x10x48xf32> to vector<8x8x48xf32>
    %51 = vector.extract_strided_slice %6 {offsets = [2, 0, 0], sizes = [1, 1, 48], strides = [1, 1, 1]} : vector<3x3x48xf32> to vector<1x1x48xf32>
    %52 = vector.shape_cast %51 : vector<1x1x48xf32> to vector<48xf32>
    %53 = vector.shape_cast %52 : vector<48xf32> to vector<1x1x48xf32>
    %54 = vector.broadcast %53 : vector<1x1x48xf32> to vector<8x8x48xf32>
    %55 = arith.mulf %50, %54 : vector<8x8x48xf32>
    %56 = arith.addf %49, %55 : vector<8x8x48xf32>
    %57 = vector.extract_strided_slice %5 {offsets = [2, 1, 0], sizes = [8, 8, 48], strides = [1, 1, 1]} : vector<10x10x48xf32> to vector<8x8x48xf32>
    %58 = vector.extract_strided_slice %6 {offsets = [2, 1, 0], sizes = [1, 1, 48], strides = [1, 1, 1]} : vector<3x3x48xf32> to vector<1x1x48xf32>
    %59 = vector.shape_cast %58 : vector<1x1x48xf32> to vector<48xf32>
    %60 = vector.shape_cast %59 : vector<48xf32> to vector<1x1x48xf32>
    %61 = vector.broadcast %60 : vector<1x1x48xf32> to vector<8x8x48xf32>
    %62 = arith.mulf %57, %61 : vector<8x8x48xf32>
    %63 = arith.addf %56, %62 : vector<8x8x48xf32>
    %64 = vector.extract_strided_slice %5 {offsets = [2, 2, 0], sizes = [8, 8, 48], strides = [1, 1, 1]} : vector<10x10x48xf32> to vector<8x8x48xf32>
    %65 = vector.extract_strided_slice %6 {offsets = [2, 2, 0], sizes = [1, 1, 48], strides = [1, 1, 1]} : vector<3x3x48xf32> to vector<1x1x48xf32>
    %66 = vector.shape_cast %65 : vector<1x1x48xf32> to vector<48xf32>
    %67 = vector.shape_cast %66 : vector<48xf32> to vector<1x1x48xf32>
    %68 = vector.broadcast %67 : vector<1x1x48xf32> to vector<8x8x48xf32>
    %69 = arith.mulf %64, %68 : vector<8x8x48xf32>
    %70 = arith.addf %63, %69 : vector<8x8x48xf32>
    %c0_15 = arith.constant 0 : index
    %c0_16 = arith.constant 0 : index
    %c0_17 = arith.constant 0 : index
    %c0_18 = arith.constant 0 : index
    %71 = vector.load %arg3[%c0_15, %c0_16, %c0_17, %c0_18] : memref<1x8x8x48xf32, #tpu.memory_space<vmem>>, vector<1x8x8x48xf32>
    %72 = vector.shape_cast %71 : vector<1x8x8x48xf32> to vector<8x8x48xf32>
    %73 = vector.shape_cast %70 : vector<8x8x48xf32> to vector<1x8x8x48xf32>
    tpu.vector_store %arg3[%c0_15, %c0_16, %c0_17, %c0_18], %73 {strides = array<i32>} : memref<1x8x8x48xf32, #tpu.memory_space<vmem>>, vector<1x8x8x48xf32>,
    return
  }
  func.func @transform_0(%arg0: i32) -> (i32, i32, i32, i32) {
    %c0_i32 = arith.constant 0 : i32
    %c0_i32_0 = arith.constant 0 : i32
    %c0_i32_1 = arith.constant 0 : i32
    %c0_i32_2 = arith.constant 0 : i32
    return %arg0, %c0_i32, %c0_i32_0, %c0_i32_1 : i32, i32, i32, i32
  }
  func.func @transform_1(%arg0: i32) -> (i32, i32, i32) {
    %c0_i32 = arith.constant 0 : i32
    %c0_i32_0 = arith.constant 0 : i32
    %c0_i32_1 = arith.constant 0 : i32
    %c0_i32_2 = arith.constant 0 : i32
    return %c0_i32, %c0_i32_0, %c0_i32_1 : i32, i32, i32
  }
  func.func @transform_2(%arg0: i32) -> (i32, i32, i32, i32) {
    %c0_i32 = arith.constant 0 : i32
    %c0_i32_0 = arith.constant 0 : i32
    %c0_i32_1 = arith.constant 0 : i32
    %c0_i32_2 = arith.constant 0 : i32
    return %arg0, %c0_i32, %c0_i32_0, %c0_i32_1 : i32, i32, i32, i32
  }
}

module attributes {stable_mosaic.version = 11 : i64} {
  func.func @_attn_kernel(%arg0: i32, %arg1: memref<2xf32, #tpu.memory_space<smem>>, %arg2: memref<1x64x48xf32, #tpu.memory_space<vmem>>, %arg3: memref<1x64x16xf32, #tpu.memory_space<vmem>>) attributes {dimension_semantics = [#tpu.dimension_semantics<parallel>], iteration_bounds = array<i64: 2>, scalar_prefetch = 0 : i64, scratch_operands = 0 : i64, tpu.core_type = #tpu.core_type<tc>, window_params = [{transform_indices = @transform_0, window_bounds = array<i64: 2>}, {transform_indices = @transform_1, window_bounds = array<i64: 1, 64, 48>}, {transform_indices = @transform_2, window_bounds = array<i64: 1, 64, 16>}]} {
    %c0 = arith.constant 0 : index
    %c0_0 = arith.constant 0 : index
    %c0_1 = arith.constant 0 : index
    %0 = vector.load %arg2[%c0, %c0_0, %c0_1] : memref<1x64x48xf32, #tpu.memory_space<vmem>>, vector<1x64x48xf32>
    %1 = vector.shape_cast %0 : vector<1x64x48xf32> to vector<64x48xf32>
    %2 = vector.extract_strided_slice %1 {offsets = [0, 0], sizes = [64, 16], strides = [1, 1]} : vector<64x48xf32> to vector<64x16xf32>
    %3 = vector.extract_strided_slice %1 {offsets = [0, 16], sizes = [64, 16], strides = [1, 1]} : vector<64x48xf32> to vector<64x16xf32>
    %4 = vector.extract_strided_slice %1 {offsets = [0, 32], sizes = [64, 16], strides = [1, 1]} : vector<64x48xf32> to vector<64x16xf32>
    %5 = vector.extract_strided_slice %2 {offsets = [0, 0], sizes = [64, 8], strides = [1, 1]} : vector<64x16xf32> to vector<64x8xf32>
    %6 = vector.extract_strided_slice %3 {offsets = [0, 0], sizes = [64, 8], strides = [1, 1]} : vector<64x16xf32> to vector<64x8xf32>
    %7 = vector.extract_strided_slice %4 {offsets = [0, 0], sizes = [64, 8], strides = [1, 1]} : vector<64x16xf32> to vector<64x8xf32>
    %8 = arith.mulf %5, %5 : vector<64x8xf32>
    %cst = arith.constant dense<0.000000e+00> : vector<8xf32>
    %9 = vector.multi_reduction <add>, %8, %cst [0] : vector<64x8xf32> to vector<8xf32>
    %10 = vector.shape_cast %9 : vector<8xf32> to vector<1x8xf32>
    %cst_2 = arith.constant 1.000000e-24 : f32
    %11 = vector.broadcast %cst_2 : f32 to vector<1x8xf32>
    %12 = arith.maximumf %10, %11 : vector<1x8xf32>
    %13 = math.rsqrt %12 : vector<1x8xf32>
    %14 = vector.broadcast %13 : vector<1x8xf32> to vector<64x8xf32>
    %15 = arith.mulf %5, %14 : vector<64x8xf32>
    %16 = arith.mulf %6, %6 : vector<64x8xf32>
    %cst_3 = arith.constant dense<0.000000e+00> : vector<8xf32>
    %17 = vector.multi_reduction <add>, %16, %cst_3 [0] : vector<64x8xf32> to vector<8xf32>
    %18 = vector.shape_cast %17 : vector<8xf32> to vector<1x8xf32>
    %cst_4 = arith.constant 1.000000e-24 : f32
    %19 = vector.broadcast %cst_4 : f32 to vector<1x8xf32>
    %20 = arith.maximumf %18, %19 : vector<1x8xf32>
    %21 = math.rsqrt %20 : vector<1x8xf32>
    %22 = vector.broadcast %21 : vector<1x8xf32> to vector<64x8xf32>
    %23 = arith.mulf %6, %22 : vector<64x8xf32>
    %cst_5 = arith.constant dense<0.000000e+00> : vector<8x8xf32>
    %24 = tpu.matmul %15, %23, %cst_5 {dimension_numbers = #tpu.dot_dimension_numbers<[0], [0], [1], [1], [0, 1, 1, 1], [], []>} : vector<64x8xf32>, vector<64x8xf32>, vector<8x8xf32> -> vector<8x8xf32>
    %c0_6 = arith.constant 0 : index
    %25 = memref.load %arg1[%c0_6] : memref<2xf32, #tpu.memory_space<smem>>
    %26 = vector.broadcast %25 : f32 to vector<8x8xf32>
    %27 = arith.mulf %24, %26 : vector<8x8xf32>
    %cst_7 = arith.constant dense<0xFF800000> : vector<8xf32>
    %28 = vector.multi_reduction <maximumf>, %27, %cst_7 [1] : vector<8x8xf32> to vector<8xf32>
    %29 = vector.shape_cast %28 : vector<8xf32> to vector<8x1xf32>
    %30 = vector.broadcast %29 : vector<8x1xf32> to vector<8x8xf32>
    %31 = arith.subf %27, %30 : vector<8x8xf32>
    %32 = math.exp %31 : vector<8x8xf32>
    %cst_8 = arith.constant dense<0.000000e+00> : vector<8xf32>
    %33 = vector.multi_reduction <add>, %32, %cst_8 [1] : vector<8x8xf32> to vector<8xf32>
    %34 = vector.shape_cast %33 : vector<8xf32> to vector<8x1xf32>
    %35 = tpu.reciprocal %34 {approx = true} : vector<8x1xf32> -> vector<8x1xf32>
    %36 = vector.broadcast %35 : vector<8x1xf32> to vector<8x8xf32>
    %37 = arith.mulf %32, %36 : vector<8x8xf32>
    %cst_9 = arith.constant dense<0.000000e+00> : vector<64x8xf32>
    %38 = tpu.matmul %7, %37, %cst_9 {dimension_numbers = #tpu.dot_dimension_numbers<[1], [1], [0], [0], [0, 0, 1, 0], [], []>} : vector<64x8xf32>, vector<8x8xf32>, vector<64x8xf32> -> vector<64x8xf32>
    %39 = vector.extract_strided_slice %2 {offsets = [0, 8], sizes = [64, 8], strides = [1, 1]} : vector<64x16xf32> to vector<64x8xf32>
    %40 = vector.extract_strided_slice %3 {offsets = [0, 8], sizes = [64, 8], strides = [1, 1]} : vector<64x16xf32> to vector<64x8xf32>
    %41 = vector.extract_strided_slice %4 {offsets = [0, 8], sizes = [64, 8], strides = [1, 1]} : vector<64x16xf32> to vector<64x8xf32>
    %42 = arith.mulf %39, %39 : vector<64x8xf32>
    %cst_10 = arith.constant dense<0.000000e+00> : vector<8xf32>
    %43 = vector.multi_reduction <add>, %42, %cst_10 [0] : vector<64x8xf32> to vector<8xf32>
    %44 = vector.shape_cast %43 : vector<8xf32> to vector<1x8xf32>
    %cst_11 = arith.constant 1.000000e-24 : f32
    %45 = vector.broadcast %cst_11 : f32 to vector<1x8xf32>
    %46 = arith.maximumf %44, %45 : vector<1x8xf32>
    %47 = math.rsqrt %46 : vector<1x8xf32>
    %48 = vector.broadcast %47 : vector<1x8xf32> to vector<64x8xf32>
    %49 = arith.mulf %39, %48 : vector<64x8xf32>
    %50 = arith.mulf %40, %40 : vector<64x8xf32>
    %cst_12 = arith.constant dense<0.000000e+00> : vector<8xf32>
    %51 = vector.multi_reduction <add>, %50, %cst_12 [0] : vector<64x8xf32> to vector<8xf32>
    %52 = vector.shape_cast %51 : vector<8xf32> to vector<1x8xf32>
    %cst_13 = arith.constant 1.000000e-24 : f32
    %53 = vector.broadcast %cst_13 : f32 to vector<1x8xf32>
    %54 = arith.maximumf %52, %53 : vector<1x8xf32>
    %55 = math.rsqrt %54 : vector<1x8xf32>
    %56 = vector.broadcast %55 : vector<1x8xf32> to vector<64x8xf32>
    %57 = arith.mulf %40, %56 : vector<64x8xf32>
    %cst_14 = arith.constant dense<0.000000e+00> : vector<8x8xf32>
    %58 = tpu.matmul %49, %57, %cst_14 {dimension_numbers = #tpu.dot_dimension_numbers<[0], [0], [1], [1], [0, 1, 1, 1], [], []>} : vector<64x8xf32>, vector<64x8xf32>, vector<8x8xf32> -> vector<8x8xf32>
    %c1 = arith.constant 1 : index
    %59 = memref.load %arg1[%c1] : memref<2xf32, #tpu.memory_space<smem>>
    %60 = vector.broadcast %59 : f32 to vector<8x8xf32>
    %61 = arith.mulf %58, %60 : vector<8x8xf32>
    %cst_15 = arith.constant dense<0xFF800000> : vector<8xf32>
    %62 = vector.multi_reduction <maximumf>, %61, %cst_15 [1] : vector<8x8xf32> to vector<8xf32>
    %63 = vector.shape_cast %62 : vector<8xf32> to vector<8x1xf32>
    %64 = vector.broadcast %63 : vector<8x1xf32> to vector<8x8xf32>
    %65 = arith.subf %61, %64 : vector<8x8xf32>
    %66 = math.exp %65 : vector<8x8xf32>
    %cst_16 = arith.constant dense<0.000000e+00> : vector<8xf32>
    %67 = vector.multi_reduction <add>, %66, %cst_16 [1] : vector<8x8xf32> to vector<8xf32>
    %68 = vector.shape_cast %67 : vector<8xf32> to vector<8x1xf32>
    %69 = tpu.reciprocal %68 {approx = true} : vector<8x1xf32> -> vector<8x1xf32>
    %70 = vector.broadcast %69 : vector<8x1xf32> to vector<8x8xf32>
    %71 = arith.mulf %66, %70 : vector<8x8xf32>
    %cst_17 = arith.constant dense<0.000000e+00> : vector<64x8xf32>
    %72 = tpu.matmul %41, %71, %cst_17 {dimension_numbers = #tpu.dot_dimension_numbers<[1], [1], [0], [0], [0, 0, 1, 0], [], []>} : vector<64x8xf32>, vector<8x8xf32>, vector<64x8xf32> -> vector<64x8xf32>
    %73 = tpu.concatenate %38, %72 in 1 : vector<64x8xf32>, vector<64x8xf32> -> vector<64x16xf32>
    %c0_18 = arith.constant 0 : index
    %c0_19 = arith.constant 0 : index
    %c0_20 = arith.constant 0 : index
    %74 = vector.load %arg3[%c0_18, %c0_19, %c0_20] : memref<1x64x16xf32, #tpu.memory_space<vmem>>, vector<1x64x16xf32>
    %75 = vector.shape_cast %74 : vector<1x64x16xf32> to vector<64x16xf32>
    %76 = vector.shape_cast %73 : vector<64x16xf32> to vector<1x64x16xf32>
    tpu.vector_store %arg3[%c0_18, %c0_19, %c0_20], %76 {strides = array<i32>} : memref<1x64x16xf32, #tpu.memory_space<vmem>>, vector<1x64x16xf32>,
    return
  }
  func.func @transform_0(%arg0: i32) -> i32 {
    %c0_i32 = arith.constant 0 : i32
    %c0_i32_0 = arith.constant 0 : i32
    return %c0_i32 : i32
  }
  func.func @transform_1(%arg0: i32) -> (i32, i32, i32) {
    %c0_i32 = arith.constant 0 : i32
    %c0_i32_0 = arith.constant 0 : i32
    %c0_i32_1 = arith.constant 0 : i32
    return %arg0, %c0_i32, %c0_i32_0 : i32, i32, i32
  }
  func.func @transform_2(%arg0: i32) -> (i32, i32, i32) {
    %c0_i32 = arith.constant 0 : i32
    %c0_i32_0 = arith.constant 0 : i32
    %c0_i32_1 = arith.constant 0 : i32
    return %arg0, %c0_i32, %c0_i32_0 : i32, i32, i32
  }
}

module attributes {stable_mosaic.version = 11 : i64} {
  func.func @_matmul_residual_kernel(%arg0: i32, %arg1: memref<128x16xf32, #tpu.memory_space<vmem>>, %arg2: memref<16x16xf32, #tpu.memory_space<vmem>>, %arg3: memref<128x16xf32, #tpu.memory_space<vmem>>, %arg4: memref<128x16xf32, #tpu.memory_space<vmem>>) attributes {dimension_semantics = [#tpu.dimension_semantics<parallel>], iteration_bounds = array<i64: 1>, scalar_prefetch = 0 : i64, scratch_operands = 0 : i64, tpu.core_type = #tpu.core_type<tc>, window_params = [{transform_indices = @transform_0, window_bounds = array<i64: 128, 16>}, {pipeline_mode = #tpu.pipeline_mode<synchronous>, transform_indices = @transform_1, window_bounds = array<i64: 16, 16>}, {transform_indices = @transform_2, window_bounds = array<i64: 128, 16>}, {transform_indices = @transform_3, window_bounds = array<i64: 128, 16>}]} {
    %c0 = arith.constant 0 : index
    %c0_0 = arith.constant 0 : index
    %0 = vector.load %arg1[%c0, %c0_0] : memref<128x16xf32, #tpu.memory_space<vmem>>, vector<128x16xf32>
    %c0_1 = arith.constant 0 : index
    %c0_2 = arith.constant 0 : index
    %1 = vector.load %arg2[%c0_1, %c0_2] : memref<16x16xf32, #tpu.memory_space<vmem>>, vector<16x16xf32>
    %cst = arith.constant dense<0.000000e+00> : vector<128x16xf32>
    %2 = tpu.matmul %0, %1, %cst {dimension_numbers = #tpu.dot_dimension_numbers<[1], [0], [0], [1], [0, 0, 1, 1], [], []>} : vector<128x16xf32>, vector<16x16xf32>, vector<128x16xf32> -> vector<128x16xf32>
    %c0_3 = arith.constant 0 : index
    %c0_4 = arith.constant 0 : index
    %3 = vector.load %arg3[%c0_3, %c0_4] : memref<128x16xf32, #tpu.memory_space<vmem>>, vector<128x16xf32>
    %4 = arith.addf %3, %2 : vector<128x16xf32>
    %c0_5 = arith.constant 0 : index
    %c0_6 = arith.constant 0 : index
    %5 = vector.load %arg4[%c0_5, %c0_6] : memref<128x16xf32, #tpu.memory_space<vmem>>, vector<128x16xf32>
    tpu.vector_store %arg4[%c0_5, %c0_6], %4 {strides = array<i32>} : memref<128x16xf32, #tpu.memory_space<vmem>>, vector<128x16xf32>,
    return
  }
  func.func @transform_0(%arg0: i32) -> (i32, i32) {
    %c0_i32 = arith.constant 0 : i32
    %c0_i32_0 = arith.constant 0 : i32
    return %arg0, %c0_i32 : i32, i32
  }
  func.func @transform_1(%arg0: i32) -> (i32, i32) {
    %c0_i32 = arith.constant 0 : i32
    %c0_i32_0 = arith.constant 0 : i32
    %c0_i32_1 = arith.constant 0 : i32
    return %c0_i32, %c0_i32_0 : i32, i32
  }
  func.func @transform_2(%arg0: i32) -> (i32, i32) {
    %c0_i32 = arith.constant 0 : i32
    %c0_i32_0 = arith.constant 0 : i32
    return %arg0, %c0_i32 : i32, i32
  }
  func.func @transform_3(%arg0: i32) -> (i32, i32) {
    %c0_i32 = arith.constant 0 : i32
    %c0_i32_0 = arith.constant 0 : i32
    return %arg0, %c0_i32 : i32, i32
  }
}

module attributes {stable_mosaic.version = 11 : i64} {
  func.func @_ln_matmul_kernel(%arg0: i32, %arg1: memref<128x16xf32, #tpu.memory_space<vmem>>, %arg2: memref<1x16xf32, #tpu.memory_space<vmem>>, %arg3: memref<1x16xf32, #tpu.memory_space<vmem>>, %arg4: memref<16x84xf32, #tpu.memory_space<vmem>>, %arg5: memref<128x84xf32, #tpu.memory_space<vmem>>) attributes {dimension_semantics = [#tpu.dimension_semantics<parallel>], iteration_bounds = array<i64: 1>, scalar_prefetch = 0 : i64, scratch_operands = 0 : i64, tpu.core_type = #tpu.core_type<tc>, window_params = [{transform_indices = @transform_0, window_bounds = array<i64: 128, 16>}, {pipeline_mode = #tpu.pipeline_mode<synchronous>, transform_indices = @transform_1, window_bounds = array<i64: 1, 16>}, {pipeline_mode = #tpu.pipeline_mode<synchronous>, transform_indices = @transform_2, window_bounds = array<i64: 1, 16>}, {pipeline_mode = #tpu.pipeline_mode<synchronous>, transform_indices = @transform_3, window_bounds = array<i64: 16, 84>}, {transform_indices = @transform_4, window_bounds = array<i64: 128, 84>}]} {
    %c0 = arith.constant 0 : index
    %c0_0 = arith.constant 0 : index
    %0 = vector.load %arg1[%c0, %c0_0] : memref<128x16xf32, #tpu.memory_space<vmem>>, vector<128x16xf32>
    %cst = arith.constant dense<0.000000e+00> : vector<128xf32>
    %1 = vector.multi_reduction <add>, %0, %cst [1] : vector<128x16xf32> to vector<128xf32>
    %2 = vector.shape_cast %1 : vector<128xf32> to vector<128x1xf32>
    %cst_1 = arith.constant 1.600000e+01 : f32
    %3 = vector.broadcast %cst_1 : f32 to vector<128x1xf32>
    %4 = arith.divf %2, %3 : vector<128x1xf32>
    %5 = vector.broadcast %4 : vector<128x1xf32> to vector<128x16xf32>
    %6 = arith.subf %0, %5 : vector<128x16xf32>
    %7 = arith.mulf %6, %6 : vector<128x16xf32>
    %cst_2 = arith.constant dense<0.000000e+00> : vector<128xf32>
    %8 = vector.multi_reduction <add>, %7, %cst_2 [1] : vector<128x16xf32> to vector<128xf32>
    %9 = vector.shape_cast %8 : vector<128xf32> to vector<128x1xf32>
    %cst_3 = arith.constant 1.600000e+01 : f32
    %10 = vector.broadcast %cst_3 : f32 to vector<128x1xf32>
    %11 = arith.divf %9, %10 : vector<128x1xf32>
    %12 = vector.broadcast %4 : vector<128x1xf32> to vector<128x16xf32>
    %13 = arith.subf %0, %12 : vector<128x16xf32>
    %cst_4 = arith.constant 9.99999974E-6 : f32
    %14 = vector.broadcast %cst_4 : f32 to vector<128x1xf32>
    %15 = arith.addf %11, %14 : vector<128x1xf32>
    %16 = math.rsqrt %15 : vector<128x1xf32>
    %17 = vector.broadcast %16 : vector<128x1xf32> to vector<128x16xf32>
    %18 = arith.mulf %13, %17 : vector<128x16xf32>
    %c0_5 = arith.constant 0 : index
    %c0_6 = arith.constant 0 : index
    %19 = vector.load %arg2[%c0_5, %c0_6] : memref<1x16xf32, #tpu.memory_space<vmem>>, vector<1x16xf32>
    %20 = vector.broadcast %19 : vector<1x16xf32> to vector<128x16xf32>
    %21 = arith.mulf %18, %20 : vector<128x16xf32>
    %c0_7 = arith.constant 0 : index
    %c0_8 = arith.constant 0 : index
    %22 = vector.load %arg3[%c0_7, %c0_8] : memref<1x16xf32, #tpu.memory_space<vmem>>, vector<1x16xf32>
    %23 = vector.broadcast %22 : vector<1x16xf32> to vector<128x16xf32>
    %24 = arith.addf %21, %23 : vector<128x16xf32>
    %c0_9 = arith.constant 0 : index
    %c0_10 = arith.constant 0 : index
    %25 = vector.load %arg4[%c0_9, %c0_10] : memref<16x84xf32, #tpu.memory_space<vmem>>, vector<16x84xf32>
    %cst_11 = arith.constant dense<0.000000e+00> : vector<128x84xf32>
    %26 = tpu.matmul %24, %25, %cst_11 {dimension_numbers = #tpu.dot_dimension_numbers<[1], [0], [0], [1], [0, 0, 1, 1], [], []>} : vector<128x16xf32>, vector<16x84xf32>, vector<128x84xf32> -> vector<128x84xf32>
    %c0_12 = arith.constant 0 : index
    %c0_13 = arith.constant 0 : index
    %27 = vector.load %arg5[%c0_12, %c0_13] : memref<128x84xf32, #tpu.memory_space<vmem>>, vector<128x84xf32>
    tpu.vector_store %arg5[%c0_12, %c0_13], %26 {strides = array<i32>} : memref<128x84xf32, #tpu.memory_space<vmem>>, vector<128x84xf32>,
    return
  }
  func.func @transform_0(%arg0: i32) -> (i32, i32) {
    %c0_i32 = arith.constant 0 : i32
    %c0_i32_0 = arith.constant 0 : i32
    return %arg0, %c0_i32 : i32, i32
  }
  func.func @transform_1(%arg0: i32) -> (i32, i32) {
    %c0_i32 = arith.constant 0 : i32
    %c0_i32_0 = arith.constant 0 : i32
    %c0_i32_1 = arith.constant 0 : i32
    return %c0_i32, %c0_i32_0 : i32, i32
  }
  func.func @transform_2(%arg0: i32) -> (i32, i32) {
    %c0_i32 = arith.constant 0 : i32
    %c0_i32_0 = arith.constant 0 : i32
    %c0_i32_1 = arith.constant 0 : i32
    return %c0_i32, %c0_i32_0 : i32, i32
  }
  func.func @transform_3(%arg0: i32) -> (i32, i32) {
    %c0_i32 = arith.constant 0 : i32
    %c0_i32_0 = arith.constant 0 : i32
    %c0_i32_1 = arith.constant 0 : i32
    return %c0_i32, %c0_i32_0 : i32, i32
  }
  func.func @transform_4(%arg0: i32) -> (i32, i32) {
    %c0_i32 = arith.constant 0 : i32
    %c0_i32_0 = arith.constant 0 : i32
    return %arg0, %c0_i32 : i32, i32
  }
}

module attributes {stable_mosaic.version = 11 : i64} {
  func.func @_dwconv_kernel(%arg0: i32, %arg1: memref<1x8x8x84xf32, #tpu.memory_space<vmem>>, %arg2: memref<3x3x84xf32, #tpu.memory_space<vmem>>, %arg3: memref<1x8x8x84xf32, #tpu.memory_space<vmem>>, %arg4: memref<10x10x84xf32, #tpu.memory_space<vmem>>) attributes {dimension_semantics = [#tpu.dimension_semantics<parallel>], iteration_bounds = array<i64: 2>, scalar_prefetch = 0 : i64, scratch_operands = 1 : i64, tpu.core_type = #tpu.core_type<tc>, window_params = [{transform_indices = @transform_0, window_bounds = array<i64: 1, 8, 8, 84>}, {pipeline_mode = #tpu.pipeline_mode<synchronous>, transform_indices = @transform_1, window_bounds = array<i64: 3, 3, 84>}, {transform_indices = @transform_2, window_bounds = array<i64: 1, 8, 8, 84>}]} {
    %cst = arith.constant 0.000000e+00 : f32
    %0 = vector.broadcast %cst : f32 to vector<10x10x84xf32>
    %c0 = arith.constant 0 : index
    %c0_0 = arith.constant 0 : index
    %c0_1 = arith.constant 0 : index
    %1 = vector.load %arg4[%c0, %c0_0, %c0_1] : memref<10x10x84xf32, #tpu.memory_space<vmem>>, vector<10x10x84xf32>
    tpu.vector_store %arg4[%c0, %c0_0, %c0_1], %0 {strides = array<i32>} : memref<10x10x84xf32, #tpu.memory_space<vmem>>, vector<10x10x84xf32>,
    %c0_2 = arith.constant 0 : index
    %c0_3 = arith.constant 0 : index
    %c0_4 = arith.constant 0 : index
    %c0_5 = arith.constant 0 : index
    %2 = vector.load %arg1[%c0_2, %c0_3, %c0_4, %c0_5] : memref<1x8x8x84xf32, #tpu.memory_space<vmem>>, vector<1x8x8x84xf32>
    %3 = vector.shape_cast %2 : vector<1x8x8x84xf32> to vector<8x8x84xf32>
    %c1 = arith.constant 1 : index
    %c1_6 = arith.constant 1 : index
    %c0_7 = arith.constant 0 : index
    %4 = vector.load %arg4[%c1, %c1_6, %c0_7] : memref<10x10x84xf32, #tpu.memory_space<vmem>>, vector<8x8x84xf32>
    tpu.vector_store %arg4[%c1, %c1_6, %c0_7], %3 {strides = array<i32>} : memref<10x10x84xf32, #tpu.memory_space<vmem>>, vector<8x8x84xf32>,
    %c0_8 = arith.constant 0 : index
    %c0_9 = arith.constant 0 : index
    %c0_10 = arith.constant 0 : index
    %5 = vector.load %arg4[%c0_8, %c0_9, %c0_10] : memref<10x10x84xf32, #tpu.memory_space<vmem>>, vector<10x10x84xf32>
    %c0_11 = arith.constant 0 : index
    %c0_12 = arith.constant 0 : index
    %c0_13 = arith.constant 0 : index
    %6 = vector.load %arg2[%c0_11, %c0_12, %c0_13] : memref<3x3x84xf32, #tpu.memory_space<vmem>>, vector<3x3x84xf32>
    %cst_14 = arith.constant 0.000000e+00 : f32
    %7 = vector.broadcast %cst_14 : f32 to vector<8x8x84xf32>
    %8 = vector.extract_strided_slice %5 {offsets = [0, 0, 0], sizes = [8, 8, 84], strides = [1, 1, 1]} : vector<10x10x84xf32> to vector<8x8x84xf32>
    %9 = vector.extract_strided_slice %6 {offsets = [0, 0, 0], sizes = [1, 1, 84], strides = [1, 1, 1]} : vector<3x3x84xf32> to vector<1x1x84xf32>
    %10 = vector.shape_cast %9 : vector<1x1x84xf32> to vector<84xf32>
    %11 = vector.shape_cast %10 : vector<84xf32> to vector<1x1x84xf32>
    %12 = vector.broadcast %11 : vector<1x1x84xf32> to vector<8x8x84xf32>
    %13 = arith.mulf %8, %12 : vector<8x8x84xf32>
    %14 = arith.addf %7, %13 : vector<8x8x84xf32>
    %15 = vector.extract_strided_slice %5 {offsets = [0, 1, 0], sizes = [8, 8, 84], strides = [1, 1, 1]} : vector<10x10x84xf32> to vector<8x8x84xf32>
    %16 = vector.extract_strided_slice %6 {offsets = [0, 1, 0], sizes = [1, 1, 84], strides = [1, 1, 1]} : vector<3x3x84xf32> to vector<1x1x84xf32>
    %17 = vector.shape_cast %16 : vector<1x1x84xf32> to vector<84xf32>
    %18 = vector.shape_cast %17 : vector<84xf32> to vector<1x1x84xf32>
    %19 = vector.broadcast %18 : vector<1x1x84xf32> to vector<8x8x84xf32>
    %20 = arith.mulf %15, %19 : vector<8x8x84xf32>
    %21 = arith.addf %14, %20 : vector<8x8x84xf32>
    %22 = vector.extract_strided_slice %5 {offsets = [0, 2, 0], sizes = [8, 8, 84], strides = [1, 1, 1]} : vector<10x10x84xf32> to vector<8x8x84xf32>
    %23 = vector.extract_strided_slice %6 {offsets = [0, 2, 0], sizes = [1, 1, 84], strides = [1, 1, 1]} : vector<3x3x84xf32> to vector<1x1x84xf32>
    %24 = vector.shape_cast %23 : vector<1x1x84xf32> to vector<84xf32>
    %25 = vector.shape_cast %24 : vector<84xf32> to vector<1x1x84xf32>
    %26 = vector.broadcast %25 : vector<1x1x84xf32> to vector<8x8x84xf32>
    %27 = arith.mulf %22, %26 : vector<8x8x84xf32>
    %28 = arith.addf %21, %27 : vector<8x8x84xf32>
    %29 = vector.extract_strided_slice %5 {offsets = [1, 0, 0], sizes = [8, 8, 84], strides = [1, 1, 1]} : vector<10x10x84xf32> to vector<8x8x84xf32>
    %30 = vector.extract_strided_slice %6 {offsets = [1, 0, 0], sizes = [1, 1, 84], strides = [1, 1, 1]} : vector<3x3x84xf32> to vector<1x1x84xf32>
    %31 = vector.shape_cast %30 : vector<1x1x84xf32> to vector<84xf32>
    %32 = vector.shape_cast %31 : vector<84xf32> to vector<1x1x84xf32>
    %33 = vector.broadcast %32 : vector<1x1x84xf32> to vector<8x8x84xf32>
    %34 = arith.mulf %29, %33 : vector<8x8x84xf32>
    %35 = arith.addf %28, %34 : vector<8x8x84xf32>
    %36 = vector.extract_strided_slice %5 {offsets = [1, 1, 0], sizes = [8, 8, 84], strides = [1, 1, 1]} : vector<10x10x84xf32> to vector<8x8x84xf32>
    %37 = vector.extract_strided_slice %6 {offsets = [1, 1, 0], sizes = [1, 1, 84], strides = [1, 1, 1]} : vector<3x3x84xf32> to vector<1x1x84xf32>
    %38 = vector.shape_cast %37 : vector<1x1x84xf32> to vector<84xf32>
    %39 = vector.shape_cast %38 : vector<84xf32> to vector<1x1x84xf32>
    %40 = vector.broadcast %39 : vector<1x1x84xf32> to vector<8x8x84xf32>
    %41 = arith.mulf %36, %40 : vector<8x8x84xf32>
    %42 = arith.addf %35, %41 : vector<8x8x84xf32>
    %43 = vector.extract_strided_slice %5 {offsets = [1, 2, 0], sizes = [8, 8, 84], strides = [1, 1, 1]} : vector<10x10x84xf32> to vector<8x8x84xf32>
    %44 = vector.extract_strided_slice %6 {offsets = [1, 2, 0], sizes = [1, 1, 84], strides = [1, 1, 1]} : vector<3x3x84xf32> to vector<1x1x84xf32>
    %45 = vector.shape_cast %44 : vector<1x1x84xf32> to vector<84xf32>
    %46 = vector.shape_cast %45 : vector<84xf32> to vector<1x1x84xf32>
    %47 = vector.broadcast %46 : vector<1x1x84xf32> to vector<8x8x84xf32>
    %48 = arith.mulf %43, %47 : vector<8x8x84xf32>
    %49 = arith.addf %42, %48 : vector<8x8x84xf32>
    %50 = vector.extract_strided_slice %5 {offsets = [2, 0, 0], sizes = [8, 8, 84], strides = [1, 1, 1]} : vector<10x10x84xf32> to vector<8x8x84xf32>
    %51 = vector.extract_strided_slice %6 {offsets = [2, 0, 0], sizes = [1, 1, 84], strides = [1, 1, 1]} : vector<3x3x84xf32> to vector<1x1x84xf32>
    %52 = vector.shape_cast %51 : vector<1x1x84xf32> to vector<84xf32>
    %53 = vector.shape_cast %52 : vector<84xf32> to vector<1x1x84xf32>
    %54 = vector.broadcast %53 : vector<1x1x84xf32> to vector<8x8x84xf32>
    %55 = arith.mulf %50, %54 : vector<8x8x84xf32>
    %56 = arith.addf %49, %55 : vector<8x8x84xf32>
    %57 = vector.extract_strided_slice %5 {offsets = [2, 1, 0], sizes = [8, 8, 84], strides = [1, 1, 1]} : vector<10x10x84xf32> to vector<8x8x84xf32>
    %58 = vector.extract_strided_slice %6 {offsets = [2, 1, 0], sizes = [1, 1, 84], strides = [1, 1, 1]} : vector<3x3x84xf32> to vector<1x1x84xf32>
    %59 = vector.shape_cast %58 : vector<1x1x84xf32> to vector<84xf32>
    %60 = vector.shape_cast %59 : vector<84xf32> to vector<1x1x84xf32>
    %61 = vector.broadcast %60 : vector<1x1x84xf32> to vector<8x8x84xf32>
    %62 = arith.mulf %57, %61 : vector<8x8x84xf32>
    %63 = arith.addf %56, %62 : vector<8x8x84xf32>
    %64 = vector.extract_strided_slice %5 {offsets = [2, 2, 0], sizes = [8, 8, 84], strides = [1, 1, 1]} : vector<10x10x84xf32> to vector<8x8x84xf32>
    %65 = vector.extract_strided_slice %6 {offsets = [2, 2, 0], sizes = [1, 1, 84], strides = [1, 1, 1]} : vector<3x3x84xf32> to vector<1x1x84xf32>
    %66 = vector.shape_cast %65 : vector<1x1x84xf32> to vector<84xf32>
    %67 = vector.shape_cast %66 : vector<84xf32> to vector<1x1x84xf32>
    %68 = vector.broadcast %67 : vector<1x1x84xf32> to vector<8x8x84xf32>
    %69 = arith.mulf %64, %68 : vector<8x8x84xf32>
    %70 = arith.addf %63, %69 : vector<8x8x84xf32>
    %c0_15 = arith.constant 0 : index
    %c0_16 = arith.constant 0 : index
    %c0_17 = arith.constant 0 : index
    %c0_18 = arith.constant 0 : index
    %71 = vector.load %arg3[%c0_15, %c0_16, %c0_17, %c0_18] : memref<1x8x8x84xf32, #tpu.memory_space<vmem>>, vector<1x8x8x84xf32>
    %72 = vector.shape_cast %71 : vector<1x8x8x84xf32> to vector<8x8x84xf32>
    %73 = vector.shape_cast %70 : vector<8x8x84xf32> to vector<1x8x8x84xf32>
    tpu.vector_store %arg3[%c0_15, %c0_16, %c0_17, %c0_18], %73 {strides = array<i32>} : memref<1x8x8x84xf32, #tpu.memory_space<vmem>>, vector<1x8x8x84xf32>,
    return
  }
  func.func @transform_0(%arg0: i32) -> (i32, i32, i32, i32) {
    %c0_i32 = arith.constant 0 : i32
    %c0_i32_0 = arith.constant 0 : i32
    %c0_i32_1 = arith.constant 0 : i32
    %c0_i32_2 = arith.constant 0 : i32
    return %arg0, %c0_i32, %c0_i32_0, %c0_i32_1 : i32, i32, i32, i32
  }
  func.func @transform_1(%arg0: i32) -> (i32, i32, i32) {
    %c0_i32 = arith.constant 0 : i32
    %c0_i32_0 = arith.constant 0 : i32
    %c0_i32_1 = arith.constant 0 : i32
    %c0_i32_2 = arith.constant 0 : i32
    return %c0_i32, %c0_i32_0, %c0_i32_1 : i32, i32, i32
  }
  func.func @transform_2(%arg0: i32) -> (i32, i32, i32, i32) {
    %c0_i32 = arith.constant 0 : i32
    %c0_i32_0 = arith.constant 0 : i32
    %c0_i32_1 = arith.constant 0 : i32
    %c0_i32_2 = arith.constant 0 : i32
    return %arg0, %c0_i32, %c0_i32_0, %c0_i32_1 : i32, i32, i32, i32
  }
}

module attributes {stable_mosaic.version = 11 : i64} {
  func.func @_gate_matmul_residual_kernel(%arg0: i32, %arg1: memref<128x84xf32, #tpu.memory_space<vmem>>, %arg2: memref<42x16xf32, #tpu.memory_space<vmem>>, %arg3: memref<128x16xf32, #tpu.memory_space<vmem>>, %arg4: memref<128x16xf32, #tpu.memory_space<vmem>>) attributes {dimension_semantics = [#tpu.dimension_semantics<parallel>], iteration_bounds = array<i64: 1>, scalar_prefetch = 0 : i64, scratch_operands = 0 : i64, tpu.core_type = #tpu.core_type<tc>, window_params = [{transform_indices = @transform_0, window_bounds = array<i64: 128, 84>}, {pipeline_mode = #tpu.pipeline_mode<synchronous>, transform_indices = @transform_1, window_bounds = array<i64: 42, 16>}, {transform_indices = @transform_2, window_bounds = array<i64: 128, 16>}, {transform_indices = @transform_3, window_bounds = array<i64: 128, 16>}]} {
    %c0 = arith.constant 0 : index
    %c0_0 = arith.constant 0 : index
    %0 = vector.load %arg1[%c0, %c0_0] : memref<128x84xf32, #tpu.memory_space<vmem>>, vector<128x84xf32>
    %1 = vector.extract_strided_slice %0 {offsets = [0, 0], sizes = [128, 42], strides = [1, 1]} : vector<128x84xf32> to vector<128x42xf32>
    %2 = vector.extract_strided_slice %0 {offsets = [0, 42], sizes = [128, 42], strides = [1, 1]} : vector<128x84xf32> to vector<128x42xf32>
    %cst = arith.constant 5.000000e-01 : f32
    %3 = vector.broadcast %cst : f32 to vector<128x42xf32>
    %4 = arith.mulf %3, %1 : vector<128x42xf32>
    %cst_1 = arith.constant 0.707106769 : f32
    %5 = vector.broadcast %cst_1 : f32 to vector<128x42xf32>
    %6 = arith.mulf %1, %5 : vector<128x42xf32>
    %7 = math.erf %6 : vector<128x42xf32>
    %cst_2 = arith.constant 1.000000e+00 : f32
    %8 = vector.broadcast %cst_2 : f32 to vector<128x42xf32>
    %9 = arith.addf %8, %7 : vector<128x42xf32>
    %10 = arith.mulf %4, %9 : vector<128x42xf32>
    %11 = arith.mulf %10, %2 : vector<128x42xf32>
    %c0_3 = arith.constant 0 : index
    %c0_4 = arith.constant 0 : index
    %12 = vector.load %arg2[%c0_3, %c0_4] : memref<42x16xf32, #tpu.memory_space<vmem>>, vector<42x16xf32>
    %cst_5 = arith.constant dense<0.000000e+00> : vector<128x16xf32>
    %13 = tpu.matmul %11, %12, %cst_5 {dimension_numbers = #tpu.dot_dimension_numbers<[1], [0], [0], [1], [0, 0, 1, 1], [], []>} : vector<128x42xf32>, vector<42x16xf32>, vector<128x16xf32> -> vector<128x16xf32>
    %c0_6 = arith.constant 0 : index
    %c0_7 = arith.constant 0 : index
    %14 = vector.load %arg3[%c0_6, %c0_7] : memref<128x16xf32, #tpu.memory_space<vmem>>, vector<128x16xf32>
    %15 = arith.addf %14, %13 : vector<128x16xf32>
    %c0_8 = arith.constant 0 : index
    %c0_9 = arith.constant 0 : index
    %16 = vector.load %arg4[%c0_8, %c0_9] : memref<128x16xf32, #tpu.memory_space<vmem>>, vector<128x16xf32>
    tpu.vector_store %arg4[%c0_8, %c0_9], %15 {strides = array<i32>} : memref<128x16xf32, #tpu.memory_space<vmem>>, vector<128x16xf32>,
    return
  }
  func.func @transform_0(%arg0: i32) -> (i32, i32) {
    %c0_i32 = arith.constant 0 : i32
    %c0_i32_0 = arith.constant 0 : i32
    return %arg0, %c0_i32 : i32, i32
  }
  func.func @transform_1(%arg0: i32) -> (i32, i32) {
    %c0_i32 = arith.constant 0 : i32
    %c0_i32_0 = arith.constant 0 : i32
    %c0_i32_1 = arith.constant 0 : i32
    return %c0_i32, %c0_i32_0 : i32, i32
  }
  func.func @transform_2(%arg0: i32) -> (i32, i32) {
    %c0_i32 = arith.constant 0 : i32
    %c0_i32_0 = arith.constant 0 : i32
    return %arg0, %c0_i32 : i32, i32
  }
  func.func @transform_3(%arg0: i32) -> (i32, i32) {
    %c0_i32 = arith.constant 0 : i32
    %c0_i32_0 = arith.constant 0 : i32
    return %arg0, %c0_i32 : i32, i32
  }
}

</mosaic_0001>

<bundles_post_ra>
// kernel: transformer_block_forward.7
= control target key start
LH: loop header
LB: loop body
LE: loop exit
PB: predicated region body
PF: predicated region fallthrough
CT: control target
= control target key end

     0   :  { %9 = vsyncpa [#allocation3], 0  ;;  %s649_s15 = smov [#allocation2]   ;;  %s969_s0 = inlined_call_operand.hbm [shape: f32[128,16], index: 0, kind: input, shape index: {}]   ;;  %s970_s1 = inlined_call_operand.vmem [shape: f32[1,16], index: 1, kind: input, shape index: {}]   ;;  %s971_s2 = inlined_call_operand.vmem [shape: f32[1,16], index: 2, kind: input, shape index: {}]   ;;  %s972_s3 = inlined_call_operand.vmem [shape: f32[16,48], index: 3, kind: input, shape index: {}]   ;;  %s973_s4 = inlined_call_operand.vmem [shape: f32[128,48], index: 4, kind: output, shape index: {}]  }
   0x1   :  { %s15_s16 = sshll.u32 %s649_s15, 4  ;;  %s625_s19 = scalar_lea.hbm %s969_s0, 2048  ;;  %s16_s16 = int_to_ptr.vmem [resolvable:$true] %s15_s16 }
   0x2   :  { %p626_p0 = scmp.ne.s32.totalorder %s969_s0, %s625_s19  ;;  %p629_p1 = scmp.lt.u32.totalorder %s625_s19, %s969_s0 }
   0x4   :  { %p631_p2 = pnand %p629_p1, %p626_p0 }
   0x6   :  { %634 = shalt.err (!%p631_p2)
}
   0x7   :  { %s635_s24 = scalar_lea.vmem %s16_s16, 2048  ;;  %p640_p4 = scmp.lt.s32.totalorder %s16_s16, %s16_s16 }
   0x8   :  { %p636_p3 = scmp.ne.s32.totalorder %s16_s16, %s635_s24  ;;  %p641_p5 = scmp.lt.s32.totalorder %s635_s24, %s635_s24 }
   0xa   :  { %p642_p6 = por %p641_p5, %p640_p4 }
   0xc   :  { %p643_p7 = pnand %p642_p6, %p636_p3 }
   0xe   :  { %646 = shalt.err (!%p643_p7)
}
   0xf   :  { %s650_s25 = smov 128   ;;  %s651_s26 = smov 8  }
  0x10   :  { %21 = dma.hbm_to_vmem [thread:$0]  %s969_s0, 2048, %s16_s16, [#allocation3], %s650_s25, %s650_s25, %s651_s26  }
  0x11   :  { %647 = dma.done.wait [#allocation3], 2048  }
  0x12   :  { %648 = vsyncadd [#allocation3], 4294965248  ;;  %vm47_vm0 = vcmask 130048   ;;  %v31_v0 = vld [vmem:[#allocation2] sm:$0xff]  ;;  %v32_v1 = vld [vmem:[#allocation2 + $0x8] sm:$0xff]  ;;  %vm498_vm1 = vcmask 392192  }
  0x13   :  { %v39_v2 = vld [vmem:[#allocation2 + $0x40] sm:$0xff]  ;;  %v48_v3 = vsel %vm47_vm0, %v31_v0, 0.0  ;;  %v51_v4 = vsel %vm47_vm0, %v32_v1, 0.0  ;;  %v40_v5 = vld [vmem:[#allocation2 + $0x48] sm:$0xff]  ;;  %v33_v8 = vld [vmem:[#allocation2 + $0x10] sm:$0xff] }
  0x14   :  { %49 = vadd.xlane.f32.xlu0 %v48_v3  ;;  %52 = vadd.xlane.f32.xlu1 %v51_v4  ;;  %v72_v6 = vsel %vm47_vm0, %v39_v2, 0.0  ;;  %v75_v7 = vsel %vm47_vm0, %v40_v5, 0.0  ;;  %v41_v9 = vld [vmem:[#allocation2 + $0x50] sm:$0xff]  ;;  %v54_v10 = vsel %vm47_vm0, %v33_v8, 0.0  ;;  %v695_v12 = vld [vmem:[#allocation2 + $0x18] sm:$0xff]  ;;  %v703_v16 = vld [vmem:[#allocation2 + $0x20] sm:$0xff] }
  0x15   :  { %v78_v11 = vsel %vm47_vm0, %v41_v9, 0.0  ;;  %v697_v13 = vld [vmem:[#allocation2 + $0x58] sm:$0xff]  ;;  %v57_v14 = vsel %vm47_vm0, %v695_v12, 0.0  ;;  %v705_v17 = vld [vmem:[#allocation2 + $0x60] sm:$0xff]  ;;  %v60_v18 = vsel %vm47_vm0, %v703_v16, 0.0  ;;  %v711_v20 = vld [vmem:[#allocation2 + $0x28] sm:$0xff] }
  0x16   :  { %v81_v15 = vsel %vm47_vm0, %v697_v13, 0.0  ;;  %v84_v19 = vsel %vm47_vm0, %v705_v17, 0.0  ;;  %v713_v21 = vld [vmem:[#allocation2 + $0x68] sm:$0xff]  ;;  %v63_v22 = vsel %vm47_vm0, %v711_v20, 0.0  ;;  %v719_v24 = vld [vmem:[#allocation2 + $0x30] sm:$0xff]  ;;  %v727_v28 = vld [vmem:[#allocation2 + $0x38] sm:$0xff] }
  0x17   :  { %v87_v23 = vsel %vm47_vm0, %v713_v21, 0.0  ;;  %v721_v25 = vld [vmem:[#allocation2 + $0x70] sm:$0xff]  ;;  %v66_v26 = vsel %vm47_vm0, %v719_v24, 0.0  ;;  %v729_v29 = vld [vmem:[#allocation2 + $0x78] sm:$0xff]  ;;  %v69_v30 = vsel %vm47_vm0, %v727_v28, 0.0 }
  0x18   :  { %73 = vadd.xlane.f32.xlu0 %v72_v6  ;;  %76 = vadd.xlane.f32.xlu1 %v75_v7  ;;  %v90_v27 = vsel %vm47_vm0, %v721_v25, 0.0  ;;  %v93_v31 = vsel %vm47_vm0, %v729_v29, 0.0 }
  0x1c   :  { %55 = vadd.xlane.f32.xlu0 %v54_v10  ;;  %79 = vadd.xlane.f32.xlu1 %v78_v11 }
  0x20   :  { %58 = vadd.xlane.f32.xlu0 %v57_v14  ;;  %82 = vadd.xlane.f32.xlu1 %v81_v15 }
  0x24   :  { %61 = vadd.xlane.f32.xlu0 %v60_v18  ;;  %85 = vadd.xlane.f32.xlu1 %v84_v19 }
  0x28   :  { %64 = vadd.xlane.f32.xlu0 %v63_v22  ;;  %88 = vadd.xlane.f32.xlu1 %v87_v23 }
  0x2c   :  { %67 = vadd.xlane.f32.xlu0 %v66_v26  ;;  %91 = vadd.xlane.f32.xlu1 %v90_v27 }
  0x30   :  { %70 = vadd.xlane.f32.xlu0 %v69_v30  ;;  %94 = vadd.xlane.f32.xlu1 %v93_v31 }
  0xa1   :  { %v50_v32 = vpop.xlane.xlu0 %49  ;;  %v53_v33 = vpop.xlane.xlu1 %52 }
  0xa2   :  { %v97_v34 = vmul.f32 0.0625, %v50_v32  ;;  %v98_v35 = vmul.f32 0.0625, %v53_v33 }
  0xa4   :  { %v735_v36 = vsub.f32 %v31_v0, %v97_v34  ;;  %v737_v37 = vsub.f32 %v32_v1, %v98_v35 }
  0xa5   :  { %v74_v38 = vpop.xlane.xlu0 %73  ;;  %v77_v39 = vpop.xlane.xlu1 %76 }
  0xa6   :  { %v105_v40 = vmul.f32 0.0625, %v74_v38  ;;  %v106_v41 = vmul.f32 0.0625, %v77_v39  ;;  %v129_v42 = vmul.f32 %v735_v36, %v735_v36  ;;  %v130_v43 = vmul.f32 %v737_v37, %v737_v37 }
  0xa8   :  { %v743_v44 = vsub.f32 %v39_v2, %v105_v40  ;;  %v745_v45 = vsub.f32 %v40_v5, %v106_v41  ;;  %v145_v46 = vsel %vm47_vm0, %v129_v42, 0.0  ;;  %v148_v49 = vsel %vm47_vm0, %v130_v43, 0.0 }
  0xa9   :  { %146 = vadd.xlane.f32.xlu0 %v145_v46  ;;  %v56_v47 = vpop.xlane.xlu0 %55  ;;  %v80_v48 = vpop.xlane.xlu1 %79 }
  0xaa   :  { %v99_v50 = vmul.f32 0.0625, %v56_v47  ;;  %v107_v51 = vmul.f32 0.0625, %v80_v48  ;;  %v137_v52 = vmul.f32 %v743_v44, %v743_v44  ;;  %v138_v53 = vmul.f32 %v745_v45, %v745_v45 }
  0xac   :  { %v753_v54 = vsub.f32 %v33_v8, %v99_v50  ;;  %v755_v55 = vsub.f32 %v41_v9, %v107_v51  ;;  %v169_v56 = vsel %vm47_vm0, %v137_v52, 0.0  ;;  %v172_v59 = vsel %vm47_vm0, %v138_v53, 0.0  ;;  %v304_v53 = vld [vmem:[%s972_s3 + $0x8] sm:$0xff] }
  0xad   :  { %149 = vadd.xlane.f32.xlu0 %v148_v49  ;;  %170 = vadd.xlane.f32.xlu1 %v169_v56  ;;  %v59_v57 = vpop.xlane.xlu0 %58  ;;  %v83_v58 = vpop.xlane.xlu1 %82 }
  0xae   :  { %v100_v60 = vmul.f32 0.0625, %v59_v57  ;;  %v108_v61 = vmul.f32 0.0625, %v83_v58  ;;  %v131_v62 = vmul.f32 %v753_v54, %v753_v54  ;;  %v139_v63 = vmul.f32 %v755_v55, %v755_v55 }
  0xb0   :  { %v764_v0 = vsub.f32 %v695_v12, %v100_v60  ;;  %v767_v1 = vsub.f32 %v697_v13, %v108_v61  ;;  %v151_v2 = vsel %vm47_vm0, %v131_v62, 0.0  ;;  %v175_v5 = vsel %vm47_vm0, %v139_v63, 0.0 }
  0xb1   :  { %173 = vadd.xlane.f32.xlu1 %v172_v59  ;;  %152 = vadd.xlane.f32.xlu0 %v151_v2  ;;  %v62_v3 = vpop.xlane.xlu0 %61  ;;  %v86_v4 = vpop.xlane.xlu1 %85 }
  0xb2   :  { %v101_v6 = vmul.f32 0.0625, %v62_v3  ;;  %v109_v7 = vmul.f32 0.0625, %v86_v4  ;;  %v132_v8 = vmul.f32 %v764_v0, %v764_v0  ;;  %v140_v9 = vmul.f32 %v767_v1, %v767_v1 }
  0xb4   :  { %v776_v10 = vsub.f32 %v703_v16, %v101_v6  ;;  %v779_v11 = vsub.f32 %v705_v17, %v109_v7  ;;  %v154_v12 = vsel %vm47_vm0, %v132_v8, 0.0  ;;  %v178_v15 = vsel %vm47_vm0, %v140_v9, 0.0 }
  0xb5   :  { %176 = vadd.xlane.f32.xlu1 %v175_v5  ;;  %155 = vadd.xlane.f32.xlu0 %v154_v12  ;;  %v65_v13 = vpop.xlane.xlu0 %64  ;;  %v89_v14 = vpop.xlane.xlu1 %88 }
  0xb6   :  { %v102_v18 = vmul.f32 0.0625, %v65_v13  ;;  %v110_v19 = vmul.f32 0.0625, %v89_v14  ;;  %v133_v22 = vmul.f32 %v776_v10, %v776_v10  ;;  %v141_v16 = vmul.f32 %v779_v11, %v779_v11 }
  0xb8   :  { %v788_v23 = vsub.f32 %v711_v20, %v102_v18  ;;  %v791_v17 = vsub.f32 %v713_v21, %v110_v19  ;;  %v157_v26 = vsel %vm47_vm0, %v133_v22, 0.0  ;;  %v181_v31 = vsel %vm47_vm0, %v141_v16, 0.0  ;;  %v834_v16 = vld [vmem:[%s970_s1] ss:$0 sm:$0xff] }
  0xb9   :  { %179 = vadd.xlane.f32.xlu1 %v178_v15  ;;  %158 = vadd.xlane.f32.xlu0 %v157_v26  ;;  %v68_v27 = vpop.xlane.xlu0 %67  ;;  %v92_v30 = vpop.xlane.xlu1 %91 }
  0xba   :  { %v103_v32 = vmul.f32 0.0625, %v68_v27  ;;  %v111_v33 = vmul.f32 0.0625, %v92_v30  ;;  %v134_v34 = vmul.f32 %v788_v23, %v788_v23  ;;  %v142_v20 = vmul.f32 %v791_v17, %v791_v17 }
  0xbc   :  { %v800_v35 = vsub.f32 %v719_v24, %v103_v32  ;;  %v803_v21 = vsub.f32 %v721_v25, %v111_v33  ;;  %v160_v38 = vsel %vm47_vm0, %v134_v34, 0.0  ;;  %v184_v41 = vsel %vm47_vm0, %v142_v20, 0.0  ;;  %v840_v33 = vld [vmem:[%s971_s2] ss:$0 sm:$0xff] }
  0xbd   :  { %182 = vadd.xlane.f32.xlu1 %v181_v31  ;;  %161 = vadd.xlane.f32.xlu0 %v160_v38  ;;  %v71_v39 = vpop.xlane.xlu0 %70  ;;  %v95_v40 = vpop.xlane.xlu1 %94 }
  0xbe   :  { %v104_v42 = vmul.f32 0.0625, %v71_v39  ;;  %v112_v43 = vmul.f32 0.0625, %v95_v40  ;;  %v135_v46 = vmul.f32 %v800_v35, %v800_v35  ;;  %v143_v24 = vmul.f32 %v803_v21, %v803_v21 }
  0xc0   :  { %v812_v47 = vsub.f32 %v727_v28, %v104_v42  ;;  %v815_v25 = vsub.f32 %v729_v29, %v112_v43  ;;  %v163_v48 = vsel %vm47_vm0, %v135_v46, 0.0  ;;  %v187_v49 = vsel %vm47_vm0, %v143_v24, 0.0  ;;  %v303_v29 = vld [vmem:[%s972_s3] sm:$0xff] }
  0xc1   :  { %185 = vadd.xlane.f32.xlu1 %v184_v41  ;;  %164 = vadd.xlane.f32.xlu0 %v163_v48  ;;  %v584_v56 = vpack.c.bf16 %v304_v53, %v303_v29 }
  0xc2   :  { %v136_v50 = vmul.f32 %v812_v47, %v812_v47  ;;  %v144_v51 = vmul.f32 %v815_v25, %v815_v25 }
  0xc3   :  { %585 = vmatprep.subr.bf16.mxu0 %v584_v56  ;;  %588 = vmatprep.subr.bf16.mxu1 %v584_v56 }
  0xc4   :  { %v166_v52 = vsel %vm47_vm0, %v136_v50, 0.0  ;;  %v190_v28 = vsel %vm47_vm0, %v144_v51, 0.0  ;;  %587 = vmatpush3.bf16.msra.mxu0 %v584_v56  ;;  %589 = vmatpush3.bf16.msra.mxu1 %v584_v56 }
  0xc5   :  { %188 = vadd.xlane.f32.xlu1 %v187_v49  ;;  %167 = vadd.xlane.f32.xlu0 %v166_v52 }
  0xc9   :  { %191 = vadd.xlane.f32.xlu1 %v190_v28 }
 0x136   :  { %v147_v57 = vpop.xlane.xlu0 %146 }
 0x137   :  { %v193_v58 = vmul.f32 0.0625, %v147_v57 }
 0x139   :  { %v209_v59 = vadd.f32 1e-05, %v193_v58 }
 0x13a   :  { %v171_v60 = vpop.xlane.xlu1 %170  ;;  %v150_v61 = vpop.xlane.xlu0 %149 }
 0x13b   :  { %593 = vrsqrt.f32 %v209_v59  ;;  %v201_v62 = vmul.f32 0.0625, %v171_v60  ;;  %v194_v63 = vmul.f32 0.0625, %v150_v61 }
 0x13d   :  { %v217_v2 = vadd.f32 1e-05, %v201_v62  ;;  %v210_v3 = vadd.f32 1e-05, %v194_v63 }
 0x13e   :  { %v174_v4 = vpop.xlane.xlu1 %173  ;;  %v153_v5 = vpop.xlane.xlu0 %152 }
 0x13f   :  { %595 = vrsqrt.f32 %v217_v2  ;;  %v202_v6 = vmul.f32 0.0625, %v174_v4  ;;  %v195_v7 = vmul.f32 0.0625, %v153_v5 }
 0x140   :  { %597 = vrsqrt.f32 %v210_v3 }
 0x141   :  { %v218_v8 = vadd.f32 1e-05, %v202_v6  ;;  %v211_v9 = vadd.f32 1e-05, %v195_v7 }
 0x142   :  { %v177_v12 = vpop.xlane.xlu1 %176  ;;  %v156_v13 = vpop.xlane.xlu0 %155 }
 0x143   :  { %599 = vrsqrt.f32 %v218_v8  ;;  %v203_v14 = vmul.f32 0.0625, %v177_v12  ;;  %v196_v15 = vmul.f32 0.0625, %v156_v13 }
 0x144   :  { %601 = vrsqrt.f32 %v211_v9 }
 0x145   :  { %v594_v18 = vpop.eup %593  ;;  %v219_v19 = vadd.f32 1e-05, %v203_v14  ;;  %v212_v22 = vadd.f32 1e-05, %v196_v15 }
 0x146   :  { %v180_v26 = vpop.xlane.xlu1 %179  ;;  %v159_v27 = vpop.xlane.xlu0 %158  ;;  %v241_v30 = vmul.f32 %v594_v18, %v735_v36 }
 0x147   :  { %603 = vrsqrt.f32 %v219_v19  ;;  %v204_v31 = vmul.f32 0.0625, %v180_v26  ;;  %v197_v32 = vmul.f32 0.0625, %v159_v27 }
 0x148   :  { %605 = vrsqrt.f32 %v212_v22  ;;  %v264_v34 = vmul.f32 %v834_v16, %v241_v30 }
 0x149   :  { %v596_v20 = vpop.eup %595  ;;  %v220_v38 = vadd.f32 1e-05, %v204_v31  ;;  %v213_v39 = vadd.f32 1e-05, %v197_v32 }
 0x14a   :  { %v598_v40 = vpop.eup %597  ;;  %v183_v41 = vpop.xlane.xlu1 %182  ;;  %v287_v43 = vadd.f32 %v840_v33, %v264_v34  ;;  %v249_v36 = vmul.f32 %v596_v20, %v743_v44 }
 0x14b   :  { %v162_v42 = vpop.xlane.xlu0 %161  ;;  %607 = vrsqrt.f32 %v220_v38  ;;  %v205_v46 = vmul.f32 0.0625, %v183_v41  ;;  %v242_v48 = vmul.f32 %v598_v40, %v737_v37 }
 0x14c   :  { %v198_v24 = vmul.f32 0.0625, %v162_v42  ;;  %609 = vrsqrt.f32 %v213_v39  ;;  %560 = vmatprep.mubr.msk.f32.mxu0 %vm47_vm0, %v287_v43  ;;  %v272_v49 = vmul.f32 %v834_v16, %v249_v36 }
 0x14d   :  { %v600_v50 = vpop.eup %599  ;;  %v221_v51 = vadd.f32 1e-05, %v205_v46  ;;  %v265_v28 = vmul.f32 %v834_v16, %v242_v48 }
 0x14e   :  { %v214_v52 = vadd.f32 1e-05, %v198_v24  ;;  %v602_v29 = vpop.eup %601  ;;  %v186_v53 = vpop.xlane.xlu1 %185  ;;  %v295_v44 = vadd.f32 %v840_v33, %v272_v49  ;;  %v250_v57 = vmul.f32 %v600_v50, %v745_v45 }
 0x14f   :  { %v165_v56 = vpop.xlane.xlu0 %164  ;;  %611 = vrsqrt.f32 %v221_v51  ;;  %v206_v58 = vmul.f32 0.0625, %v186_v53  ;;  %v288_v59 = vadd.f32 %v840_v33, %v265_v28  ;;  %v243_v60 = vmul.f32 %v602_v29, %v753_v54 }
 0x150   :  { %v199_v37 = vmul.f32 0.0625, %v165_v56  ;;  %613 = vrsqrt.f32 %v214_v52  ;;  %572 = vmatprep.mubr.msk.f32.mxu1 %vm47_vm0, %v295_v44  ;;  %v273_v61 = vmul.f32 %v834_v16, %v250_v57 }
 0x151   :  { %v604_v62 = vpop.eup %603  ;;  %v222_v63 = vadd.f32 1e-05, %v206_v58  ;;  %561 = vmatmul.mubr.msk.f32.vlgmr.msra.gmra.mrb[0].mxu0 %vm47_vm0, %v288_v59  ;;  %v266_v5 = vmul.f32 %v834_v16, %v243_v60 }
 0x152   :  { %v215_v2 = vadd.f32 1e-05, %v199_v37  ;;  %v606_v3 = vpop.eup %605  ;;  %v189_v4 = vpop.xlane.xlu1 %188  ;;  %v296_v6 = vadd.f32 %v840_v33, %v273_v61  ;;  %v251_v7 = vmul.f32 %v604_v62, %v755_v55 }
 0x153   :  { %v168_v45 = vpop.xlane.xlu0 %167  ;;  %615 = vrsqrt.f32 %v222_v63  ;;  %v207_v8 = vmul.f32 0.0625, %v189_v4  ;;  %v244_v54 = vmul.f32 %v606_v3, %v764_v0  ;;  %v289_v12 = vadd.f32 %v840_v33, %v266_v5 }
 0x154   :  { %v200_v9 = vmul.f32 0.0625, %v168_v45  ;;  %617 = vrsqrt.f32 %v215_v2  ;;  %573 = vmatmul.mubr.msk.f32.vlgmr.msra.gmra.mrb[0].mxu1 %vm47_vm0, %v296_v6  ;;  %v274_v13 = vmul.f32 %v834_v16, %v251_v7 }
 0x155   :  { %v608_v14 = vpop.eup %607  ;;  %v223_v15 = vadd.f32 1e-05, %v207_v8  ;;  %v267_v19 = vmul.f32 %v834_v16, %v244_v54  ;;  %563 = vmatprep.mubr.msk.f32.mxu0 %vm47_vm0, %v289_v12 }
 0x156   :  { %v216_v18 = vadd.f32 1e-05, %v200_v9  ;;  %v610_v22 = vpop.eup %609  ;;  %v192_v55 = vpop.xlane.xlu1 %191  ;;  %v297_v26 = vadd.f32 %v840_v33, %v274_v13  ;;  %v252_v0 = vmul.f32 %v608_v14, %v767_v1 }
 0x157   :  { %619 = vrsqrt.f32 %v223_v15  ;;  %v208_v27 = vmul.f32 0.0625, %v192_v55  ;;  %v290_v30 = vadd.f32 %v840_v33, %v267_v19  ;;  %v245_v31 = vmul.f32 %v610_v22, %v776_v10 }
 0x158   :  { %621 = vrsqrt.f32 %v216_v18  ;;  %575 = vmatprep.mubr.msk.f32.mxu1 %vm47_vm0, %v297_v26  ;;  %v275_v32 = vmul.f32 %v834_v16, %v252_v0 }
 0x159   :  { %v612_v34 = vpop.eup %611  ;;  %v224_v20 = vadd.f32 1e-05, %v208_v27  ;;  %564 = vmatmul.mubr.msk.f32.gmra.mrb[2].mxu0 %vm47_vm0, %v290_v30  ;;  %v268_v38 = vmul.f32 %v834_v16, %v245_v31 }
 0x15a   :  { %v614_v39 = vpop.eup %613  ;;  %v298_v1 = vadd.f32 %v840_v33, %v275_v32  ;;  %v253_v40 = vmul.f32 %v612_v34, %v779_v11 }
 0x15b   :  { %623 = vrsqrt.f32 %v224_v20  ;;  %v291_v41 = vadd.f32 %v840_v33, %v268_v38  ;;  %v246_v10 = vmul.f32 %v614_v39, %v788_v23 }
 0x15c   :  { %576 = vmatmul.mubr.msk.f32.gmra.mrb[2].mxu1 %vm47_vm0, %v298_v1  ;;  %v276_v42 = vmul.f32 %v834_v16, %v253_v40 }
 0x15d   :  { %v616_v43 = vpop.eup %615  ;;  %566 = vmatprep.mubr.msk.f32.mxu0 %vm47_vm0, %v291_v41  ;;  %v269_v36 = vmul.f32 %v834_v16, %v246_v10 }
 0x15e   :  { %v618_v46 = vpop.eup %617  ;;  %v299_v24 = vadd.f32 %v840_v33, %v276_v42  ;;  %v254_v48 = vmul.f32 %v616_v43, %v791_v17 }
 0x15f   :  { %v292_v11 = vadd.f32 %v840_v33, %v269_v36  ;;  %v247_v49 = vmul.f32 %v618_v46, %v800_v35 }
 0x160   :  { %578 = vmatprep.mubr.msk.f32.mxu1 %vm47_vm0, %v299_v24  ;;  %v277_v23 = vmul.f32 %v834_v16, %v254_v48 }
 0x161   :  { %v620_v50 = vpop.eup %619  ;;  %567 = vmatmul.mubr.msk.f32.gmra.mrb[4].mxu0 %vm47_vm0, %v292_v11  ;;  %v270_v51 = vmul.f32 %v834_v16, %v247_v49 }
 0x162   :  { %v622_v52 = vpop.eup %621  ;;  %v300_v28 = vadd.f32 %v840_v33, %v277_v23  ;;  %v255_v29 = vmul.f32 %v620_v50, %v803_v21 }
 0x163   :  { %v293_v17 = vadd.f32 %v840_v33, %v270_v51  ;;  %v248_v53 = vmul.f32 %v622_v52, %v812_v47 }
 0x164   :  { %579 = vmatmul.mubr.msk.f32.gmra.mrb[4].mxu1 %vm47_vm0, %v300_v28  ;;  %v278_v35 = vmul.f32 %v834_v16, %v255_v29 }
 0x165   :  { %v624_v56 = vpop.eup %623  ;;  %569 = vmatprep.mubr.msk.f32.mxu0 %vm47_vm0, %v293_v17  ;;  %v271_v44 = vmul.f32 %v834_v16, %v248_v53 }
 0x166   :  { %v301_v57 = vadd.f32 %v840_v33, %v278_v35  ;;  %v256_v58 = vmul.f32 %v624_v56, %v815_v25 }
 0x167   :  { %v294_v37 = vadd.f32 %v840_v33, %v271_v44 }
 0x168   :  { %581 = vmatprep.mubr.msk.f32.mxu1 %vm47_vm0, %v301_v57  ;;  %v279_v21 = vmul.f32 %v834_v16, %v256_v58 }
 0x169   :  { %570 = vmatmul.mubr.msk.f32.gmra.mrb[6].mxu0 %vm47_vm0, %v294_v37 }
 0x16a   :  { %v302_v47 = vadd.f32 %v840_v33, %v279_v21 }
 0x16c   :  { %582 = vmatmul.mubr.msk.f32.gmra.mrb[6].mxu1 %vm47_vm0, %v302_v47 }
 0x224   :  { %v562_v59 = vpop.f32.mrb[0].mxu0 }
 0x225   :  { %500 = vst.msk [vmem:[%s973_s4 + $0x8] sm:$0xff] %vm498_vm1, %v562_v59  ;;  %v419_v25 = vpop.f32.mrb[1].mxu0 }
 0x226   :  { %499 = vst.msk [vmem:[%s973_s4] sm:$0xff] %vm498_vm1, %v419_v25 }
 0x227   :  { %v574_v16 = vpop.f32.mrb[0].mxu1 }
 0x228   :  { %508 = vst.msk [vmem:[%s973_s4 + $0x48] sm:$0xff] %vm498_vm1, %v574_v16  ;;  %v459_v33 = vpop.f32.mrb[1].mxu1 }
 0x229   :  { %507 = vst.msk [vmem:[%s973_s4 + $0x40] sm:$0xff] %vm498_vm1, %v459_v33 }
 0x22c   :  { %v565_v60 = vpop.f32.mrb[2].mxu0 }
 0x22d   :  { %502 = vst.msk [vmem:[%s973_s4 + $0x18] sm:$0xff] %vm498_vm1, %v565_v60  ;;  %v429_v61 = vpop.f32.mrb[3].mxu0 }
 0x22e   :  { %501 = vst.msk [vmem:[%s973_s4 + $0x10] sm:$0xff] %vm498_vm1, %v429_v61 }
 0x22f   :  { %v577_v62 = vpop.f32.mrb[2].mxu1 }
 0x230   :  { %510 = vst.msk [vmem:[%s973_s4 + $0x58] sm:$0xff] %vm498_vm1, %v577_v62  ;;  %v469_v63 = vpop.f32.mrb[3].mxu1 }
 0x231   :  { %509 = vst.msk [vmem:[%s973_s4 + $0x50] sm:$0xff] %vm498_vm1, %v469_v63 }
 0x234   :  { %v568_v2 = vpop.f32.mrb[4].mxu0 }
 0x235   :  { %504 = vst.msk [vmem:[%s973_s4 + $0x28] sm:$0xff] %vm498_vm1, %v568_v2  ;;  %v439_v3 = vpop.f32.mrb[5].mxu0 }
 0x236   :  { %503 = vst.msk [vmem:[%s973_s4 + $0x20] sm:$0xff] %vm498_vm1, %v439_v3 }
 0x237   :  { %v580_v4 = vpop.f32.mrb[4].mxu1 }
 0x238   :  { %512 = vst.msk [vmem:[%s973_s4 + $0x68] sm:$0xff] %vm498_vm1, %v580_v4  ;;  %v479_v45 = vpop.f32.mrb[5].mxu1 }
 0x239   :  { %511 = vst.msk [vmem:[%s973_s4 + $0x60] sm:$0xff] %vm498_vm1, %v479_v45 }
 0x23c   :  { %v571_v5 = vpop.f32.mrb[6].mxu0 }
 0x23d   :  { %506 = vst.msk [vmem:[%s973_s4 + $0x38] sm:$0xff] %vm498_vm1, %v571_v5  ;;  %v449_v6 = vpop.f32.mrb[7].mxu0 }
 0x23e   :  { %505 = vst.msk [vmem:[%s973_s4 + $0x30] sm:$0xff] %vm498_vm1, %v449_v6 }
 0x23f   :  { %v583_v7 = vpop.f32.mrb[6].mxu1 }
 0x240   :  { %514 = vst.msk [vmem:[%s973_s4 + $0x78] sm:$0xff] %vm498_vm1, %v583_v7  ;;  %v489_v8 = vpop.f32.mrb[7].mxu1 }
 0x241   :  { %513 = vst.msk [vmem:[%s973_s4 + $0x70] sm:$0xff] %vm498_vm1, %v489_v8 }
 0x242   :  { %519 = vsyncpa [#allocation3], 1 }

// kernel: transformer_block_forward.8
= control target key start
LH: loop header
LB: loop body
LE: loop exit
PB: predicated region body
PF: predicated region fallthrough
CT: control target
= control target key end

     0   :  { %s833_s9 = smov 0   ;;  %s1222_s0 = inlined_call_operand.vmem [shape: f32[2,8,8,48], index: 0, kind: input, shape index: {}]   ;;  %s1223_s1 = inlined_call_operand.vmem [shape: f32[3,3,48], index: 1, kind: input, shape index: {}]   ;;  %s1224_s2 = inlined_call_operand.vmem [shape: f32[2,8,8,48], index: 2, kind: output, shape index: {}]  }
   0x1 LB: > { %s787_s10 = sadd.s32 4294967295, %s815_s9   ;;  %p791_p0 = scmp.ge.s32.totalorder %s815_s9, 1  ;;  %s815_s9 = sphi %s833_s9, %s12_s9  }
   0x2   : > { %p112_p1 = scmp.lt.s32.totalorder %s815_s9, 3 }
   0x4   : > { %p113_p2 = pnand %p791_p0, %p112_p1 }
   0x5   : > { %vm144_vm0 = vcmask (!%p113_p2), 392192   ;;  %vm146_vm1 = vcmask (!%p113_p2), 386048   ;;  %p843_p3 = scmp.lt.s32.totalorder (!%p113_p2), %s787_s10, 1  ;;  %v206_v0 = vlaneseq (!%p113_p2)  ;;  %v817_v1 = vmov (!%p113_p2), 0.0   ;;  %v203_v3 = vld [vmem:[%s1223_s1] sm:$0x7] (!%p113_p2) }
   0x6   : > { %116 = sbr.rel (%p113_p2) target bundleno = 114 (0x72), region = 28  ;;  %145 = vst.msk [vmem:[#allocation2] sm:$0xff] (!%p113_p2), %vm144_vm0, %v817_v1  ;;  %148 = vst.msk [vmem:[#allocation2 + $0x10] sm:$0xff] (!%p113_p2), %vm144_vm0, %v817_v1  ;;  %v204_v7 = vld [vmem:[%s1223_s1 + $0x4] sm:$0x7] (!%p113_p2)  ;;  %vm262_vm2 = vcmask (!%p113_p2), 1046528  }
   0x7   : > { %150 = vst.msk [vmem:[#allocation2 + $0x20] sm:$0xff] (!%p113_p2), %vm144_vm0, %v817_v1  ;;  %152 = vst.msk [vmem:[#allocation2 + $0x30] sm:$0xff] (!%p113_p2), %vm144_vm0, %v817_v1  ;;  %v207_v2 = vshrl.u32 (!%p113_p2), %v206_v0, 7  ;;  %v205_v21 = vld [vmem:[%s1223_s1 + $0x8] sm:$0x7] (!%p113_p2)  ;;  %vm339_vm3 = vcmask (!%p113_p2), 1045504  }
   0x8   : > { %154 = vst.msk [vmem:[#allocation2 + $0x40] sm:$0xff] (!%p113_p2), %vm144_vm0, %v817_v1  ;;  %156 = vst.msk [vmem:[#allocation2 + $0x50] sm:$0xff] (!%p113_p2), %vm144_vm0, %v817_v1 }
   0x9   : > { %158 = vst.msk [vmem:[#allocation2 + $0x60] sm:$0xff] (!%p113_p2), %vm144_vm0, %v817_v1  ;;  %160 = vst.msk [vmem:[#allocation2 + $0x70] sm:$0xff] (!%p113_p2), %vm144_vm0, %v817_v1  ;;  %v208_v4 = vsub.s32 (!%p113_p2), 0, %v207_v2  ;;  %v228_v5 = vsub.s32 (!%p113_p2), 1, %v207_v2  ;;  %v305_v6 = vsub.s32 (!%p113_p2), 2, %v207_v2 }
   0xa   : > { %162 = vst.msk [vmem:[#allocation2 + $0x80] sm:$0xff] (!%p113_p2), %vm144_vm0, %v817_v1  ;;  %164 = vst.msk [vmem:[#allocation2 + $0x90] sm:$0xff] (!%p113_p2), %vm144_vm0, %v817_v1 }
   0xb   : > { %147 = vst.msk [vmem:[#allocation2 + $0x8] sm:$0x3] (!%p113_p2), %vm146_vm1, %v817_v1  ;;  %149 = vst.msk [vmem:[#allocation2 + $0x18] sm:$0x3] (!%p113_p2), %vm146_vm1, %v817_v1  ;;  %v885_v11 = vrot.slane (!%p113_p2), %v203_v3, %v228_v5  ;;  %v887_v12 = vrot.slane (!%p113_p2), %v203_v3, %v305_v6  ;;  %v892_v16 = vrot.slane (!%p113_p2), %v203_v3, %v208_v4 }
   0xc   : > { %151 = vst.msk [vmem:[#allocation2 + $0x28] sm:$0x3] (!%p113_p2), %vm146_vm1, %v817_v1  ;;  %153 = vst.msk [vmem:[#allocation2 + $0x38] sm:$0x3] (!%p113_p2), %vm146_vm1, %v817_v1  ;;  %v906_v26 = vrot.slane (!%p113_p2), %v204_v7, %v208_v4  ;;  %v909_v30 = vrot.slane (!%p113_p2), %v204_v7, %v228_v5  ;;  %v911_v33 = vrot.slane (!%p113_p2), %v204_v7, %v305_v6 }
   0xd   : > { %155 = vst.msk [vmem:[#allocation2 + $0x48] sm:$0x3] %vm146_vm1, %v817_v1  ;;  %157 = vst.msk [vmem:[#allocation2 + $0x58] sm:$0x3] %vm146_vm1, %v817_v1  ;;  %s1227_s10 = smov (!%p843_p3, %s787_s10), 1  ;;  %v183_v19 = vld [vmem:[#allocation2] sm:$0xff]  ;;  %v913_v34 = vrot.slane %v205_v21, %v228_v5  ;;  %v919_v40 = vrot.slane %v205_v21, %v305_v6  ;;  %v928_v48 = vrot.slane %v205_v21, %v208_v4 }
   0xe   : > { %159 = vst.msk [vmem:[#allocation2 + $0x68] sm:$0x3] %vm146_vm1, %v817_v1  ;;  %161 = vst.msk [vmem:[#allocation2 + $0x78] sm:$0x3] %vm146_vm1, %v817_v1  ;;  %s798_s14 = sshll.u32 %s1227_s10, 6  ;;  %v230_v22 = vmul.f32 %v885_v11, %v183_v19  ;;  %v307_v23 = vmul.f32 %v887_v12, %v183_v19  ;;  %v210_v27 = vmul.f32 %v892_v16, %v183_v19 }
   0xf   : > { %163 = vst.msk [vmem:[#allocation2 + $0x88] sm:$0x3] %vm146_vm1, %v817_v1  ;;  %165 = vst.msk [vmem:[#allocation2 + $0x98] sm:$0x3] %vm146_vm1, %v817_v1  ;;  %s138_s17 = scalar_lea.vmem %s1222_s0, %s798_s14  ;;  %s971_s24 = scalar_lea.vmem %s1224_s2, %s798_s14 }
  0x10   : > { %v166_v8 = vld [vmem:[%s138_s17] sm:$0xff]  ;;  %v167_v9 = vld [vmem:[%s138_s17 + $0x8] sm:$0xff]  ;;  %v168_v10 = vld [vmem:[%s138_s17 + $0x10] sm:$0xff]  ;;  %v263_v28 = vrot.slane %v230_v22, 1  ;;  %v340_v29 = vrot.slane %v307_v23, 2 }
  0x11   : > { %175 = vst.msk [vmem:[#allocation2 + $0x11] sm:$0xff] %vm144_vm0, %v166_v8  ;;  %176 = vst.msk [vmem:[#allocation2 + $0x21] sm:$0xff] %vm144_vm0, %v167_v9  ;;  %v169_v13 = vld [vmem:[%s138_s17 + $0x18] sm:$0xff]  ;;  %v170_v14 = vld [vmem:[%s138_s17 + $0x20] sm:$0xff] }
  0x12   : > { %177 = vst.msk [vmem:[#allocation2 + $0x31] sm:$0xff] %vm144_vm0, %v168_v10  ;;  %v171_v15 = vld [vmem:[%s138_s17 + $0x28] sm:$0xff]  ;;  %178 = vst.msk [vmem:[#allocation2 + $0x41] sm:$0xff] %vm144_vm0, %v169_v13  ;;  %v172_v17 = vld [vmem:[%s138_s17 + $0x30] sm:$0xff] }
  0x13   : > { %179 = vst.msk [vmem:[#allocation2 + $0x51] sm:$0xff] %vm144_vm0, %v170_v14  ;;  %180 = vst.msk [vmem:[#allocation2 + $0x61] sm:$0xff] %vm144_vm0, %v171_v15  ;;  %v173_v18 = vld [vmem:[%s138_s17 + $0x38] sm:$0xff]  ;;  %v184_v20 = vld [vmem:[#allocation2 + $0x8] sm:$0x3] }
  0x14   : > { %181 = vst.msk [vmem:[#allocation2 + $0x71] sm:$0xff] %vm144_vm0, %v172_v17  ;;  %182 = vst.msk [vmem:[#allocation2 + $0x81] sm:$0xff] %vm144_vm0, %v173_v18  ;;  %v231_v24 = vmul.f32 %v885_v11, %v184_v20  ;;  %v308_v25 = vmul.f32 %v887_v12, %v184_v20 }
  0x16   : > { %v264_v31 = vrot.slane %v231_v24, 1  ;;  %v341_v32 = vrot.slane %v308_v25, 2 }
  0x18   : > { %v185_v35 = vld [vmem:[#allocation2 + $0x10] sm:$0xff]  ;;  %v186_v36 = vld [vmem:[#allocation2 + $0x18] sm:$0x3]  ;;  %v915_v37 = vld [vmem:[#allocation2 + $0x20] sm:$0xff]  ;;  %v265_v38 = vsel %vm262_vm2, %v263_v28, %v264_v31  ;;  %v342_v39 = vsel %vm339_vm3, %v340_v29, %v341_v32 }
  0x19   : > { %v921_v41 = vld [vmem:[#allocation2 + $0x28] sm:$0x3]  ;;  %v295_v42 = vadd.f32 %v265_v38, %v210_v27  ;;  %v384_v43 = vmul.f32 %v906_v26, %v185_v35  ;;  %v404_v44 = vmul.f32 %v909_v30, %v185_v35  ;;  %v405_v45 = vmul.f32 %v909_v30, %v186_v36  ;;  %v950_v15 = vld [vmem:[#allocation2 + $0x30] sm:$0xff]  ;;  %v956_v22 = vld [vmem:[#allocation2 + $0x38] sm:$0x3] }
  0x1a   : > { %v480_v46 = vmul.f32 %v911_v33, %v185_v35  ;;  %v481_v47 = vmul.f32 %v911_v33, %v186_v36  ;;  %v576_v49 = vmul.f32 %v913_v34, %v915_v37  ;;  %v577_v53 = vmul.f32 %v913_v34, %v921_v41 }
  0x1b   : > { %v372_v50 = vadd.f32 %v342_v39, %v295_v42  ;;  %v436_v51 = vrot.slane %v404_v44, 1  ;;  %v437_v52 = vrot.slane %v405_v45, 1  ;;  %v652_v57 = vmul.f32 %v919_v40, %v915_v37 }
  0x1c   : > { %v512_v54 = vrot.slane %v480_v46, 2  ;;  %v513_v55 = vrot.slane %v481_v47, 2  ;;  %v608_v56 = vrot.slane %v576_v49, 1  ;;  %v609_v60 = vrot.slane %v577_v53, 1 }
  0x1d   : > { %v392_v58 = vadd.f32 %v384_v43, %v372_v50  ;;  %v438_v59 = vsel %vm262_vm2, %v436_v51, %v437_v52  ;;  %v653_v61 = vmul.f32 %v919_v40, %v921_v41  ;;  %v556_v63 = vmul.f32 %v928_v48, %v915_v37 }
  0x1e   : > { %v514_v62 = vsel %vm339_vm3, %v512_v54, %v513_v55  ;;  %v232_v0 = vmul.f32 %v885_v11, %v185_v35  ;;  %v684_v2 = vrot.slane %v652_v57, 2  ;;  %v211_v3 = vmul.f32 %v892_v16, %v185_v35 }
  0x1f   : > { %v468_v1 = vadd.f32 %v438_v59, %v392_v58  ;;  %v233_v4 = vmul.f32 %v885_v11, %v186_v36  ;;  %v610_v5 = vsel %vm262_vm2, %v608_v56, %v609_v60  ;;  %v309_v7 = vmul.f32 %v887_v12, %v185_v35 }
  0x20   : > { %v266_v6 = vrot.slane %v232_v0, 1  ;;  %v310_v8 = vmul.f32 %v887_v12, %v186_v36  ;;  %v685_v10 = vrot.slane %v653_v61, 2  ;;  %v406_v14 = vmul.f32 %v909_v30, %v915_v37 }
  0x21   : > { %v544_v9 = vadd.f32 %v514_v62, %v468_v1  ;;  %v267_v13 = vrot.slane %v233_v4, 1  ;;  %v343_v17 = vrot.slane %v309_v7, 2  ;;  %v407_v19 = vmul.f32 %v909_v30, %v921_v41  ;;  %v1003_v7 = vld [vmem:[#allocation2 + $0x48] sm:$0x3] }
  0x22   : > { %v344_v18 = vrot.slane %v310_v8, 2  ;;  %v482_v20 = vmul.f32 %v911_v33, %v915_v37  ;;  %v385_v24 = vmul.f32 %v906_v26, %v915_v37  ;;  %v483_v25 = vmul.f32 %v911_v33, %v921_v41 }
  0x23   : > { %v564_v21 = vadd.f32 %v556_v63, %v544_v9  ;;  %v268_v23 = vsel %vm262_vm2, %v266_v6, %v267_v13  ;;  %v439_v28 = vrot.slane %v406_v14, 1  ;;  %v440_v29 = vrot.slane %v407_v19, 1 }
  0x24   : > { %v296_v27 = vadd.f32 %v268_v23, %v211_v3  ;;  %v515_v31 = vrot.slane %v482_v20, 2  ;;  %v345_v35 = vsel %vm339_vm3, %v343_v17, %v344_v18  ;;  %v516_v36 = vrot.slane %v483_v25, 2  ;;  %v997_v3 = vld [vmem:[#allocation2 + $0x40] sm:$0xff] }
  0x25   : > { %v640_v32 = vadd.f32 %v610_v5, %v564_v21  ;;  %v578_v38 = vmul.f32 %v913_v34, %v950_v15  ;;  %v686_v39 = vsel %vm339_vm3, %v684_v2, %v685_v10  ;;  %v579_v43 = vmul.f32 %v913_v34, %v956_v22 }
  0x26   : > { %v373_v42 = vadd.f32 %v345_v35, %v296_v27  ;;  %v654_v44 = vmul.f32 %v919_v40, %v950_v15  ;;  %v557_v46 = vmul.f32 %v928_v48, %v950_v15  ;;  %v655_v49 = vmul.f32 %v919_v40, %v956_v22 }
  0x27   : > { %v716_v45 = vadd.f32 %v686_v39, %v640_v32  ;;  %v611_v47 = vrot.slane %v578_v38, 1  ;;  %v441_v51 = vsel %vm262_vm2, %v439_v28, %v440_v29  ;;  %v517_v52 = vsel %vm339_vm3, %v515_v31, %v516_v36 }
  0x28   : > { %v393_v50 = vadd.f32 %v385_v24, %v373_v42  ;;  %v612_v53 = vrot.slane %v579_v43, 1  ;;  %v687_v54 = vrot.slane %v654_v44, 2  ;;  %v234_v55 = vmul.f32 %v885_v11, %v915_v37 }
  0x29   : > { %724 = vst.msk [vmem:[%s971_s24] sm:$0xff] %vm144_vm0, %v716_v45  ;;  %v235_v56 = vmul.f32 %v885_v11, %v921_v41  ;;  %v311_v57 = vmul.f32 %v887_v12, %v915_v37  ;;  %v688_v59 = vrot.slane %v655_v49, 2  ;;  %v212_v60 = vmul.f32 %v892_v16, %v915_v37 }
  0x2a   : > { %v469_v58 = vadd.f32 %v441_v51, %v393_v50  ;;  %v312_v61 = vmul.f32 %v887_v12, %v921_v41  ;;  %v613_v62 = vsel %vm262_vm2, %v611_v47, %v612_v53  ;;  %v269_v63 = vrot.slane %v234_v55, 1 }
  0x2b   : > { %v270_v0 = vrot.slane %v235_v56, 1  ;;  %v346_v1 = vrot.slane %v311_v57, 2  ;;  %v408_v5 = vmul.f32 %v909_v30, %v950_v15  ;;  %v409_v6 = vmul.f32 %v909_v30, %v956_v22 }
  0x2c   : > { %v545_v2 = vadd.f32 %v517_v52, %v469_v58  ;;  %v347_v4 = vrot.slane %v312_v61, 2  ;;  %v386_v41 = vmul.f32 %v906_v26, %v950_v15  ;;  %v484_v8 = vmul.f32 %v911_v33, %v950_v15 }
  0x2d   : > { %v271_v37 = vsel %vm262_vm2, %v269_v63, %v270_v0  ;;  %v485_v9 = vmul.f32 %v911_v33, %v956_v22  ;;  %v442_v17 = vrot.slane %v408_v5, 1  ;;  %v443_v18 = vrot.slane %v409_v6, 1 }
  0x2e   : > { %v565_v10 = vadd.f32 %v557_v46, %v545_v2  ;;  %v297_v13 = vadd.f32 %v271_v37, %v212_v60  ;;  %v348_v14 = vsel %vm339_vm3, %v346_v1, %v347_v4  ;;  %v518_v19 = vrot.slane %v484_v8, 2  ;;  %v1043_v60 = vld [vmem:[#allocation2 + $0x58] sm:$0x3] }
  0x2f   : > { %v519_v20 = vrot.slane %v485_v9, 2  ;;  %v580_v21 = vmul.f32 %v913_v34, %v997_v3  ;;  %v581_v25 = vmul.f32 %v913_v34, %v1003_v7  ;;  %v656_v27 = vmul.f32 %v919_v40, %v997_v3 }
  0x30   : > { %v641_v23 = vadd.f32 %v613_v62, %v565_v10  ;;  %v374_v24 = vadd.f32 %v348_v14, %v297_v13  ;;  %v689_v28 = vsel %vm339_vm3, %v687_v54, %v688_v59  ;;  %v558_v29 = vmul.f32 %v928_v48, %v997_v3  ;;  %v1041_v59 = vld [vmem:[#allocation2 + $0x50] sm:$0xff] }
  0x31   : > { %v614_v31 = vrot.slane %v580_v21, 1  ;;  %v657_v32 = vmul.f32 %v919_v40, %v1003_v7  ;;  %v444_v38 = vsel %vm262_vm2, %v442_v17, %v443_v18  ;;  %v615_v39 = vrot.slane %v581_v25, 1 }
  0x32   : > { %v717_v35 = vadd.f32 %v689_v28, %v641_v23  ;;  %v394_v36 = vadd.f32 %v386_v41, %v374_v24  ;;  %v520_v42 = vsel %vm339_vm3, %v518_v19, %v519_v20  ;;  %v690_v43 = vrot.slane %v656_v27, 2 }
  0x33   : > { %v236_v44 = vmul.f32 %v885_v11, %v950_v15  ;;  %v237_v45 = vmul.f32 %v885_v11, %v956_v22  ;;  %v691_v47 = vrot.slane %v657_v32, 2  ;;  %v313_v49 = vmul.f32 %v887_v12, %v950_v15 }
  0x34   : > { %725 = vst.msk [vmem:[%s971_s24 + $0x8] sm:$0xff] %vm144_vm0, %v717_v35  ;;  %v470_v46 = vadd.f32 %v444_v38, %v394_v36  ;;  %v314_v50 = vmul.f32 %v887_v12, %v956_v22  ;;  %v616_v51 = vsel %vm262_vm2, %v614_v31, %v615_v39  ;;  %v213_v52 = vmul.f32 %v892_v16, %v950_v15 }
  0x35   : > { %v272_v53 = vrot.slane %v236_v44, 1  ;;  %v273_v54 = vrot.slane %v237_v45, 1  ;;  %v349_v56 = vrot.slane %v313_v49, 2  ;;  %v410_v58 = vmul.f32 %v909_v30, %v997_v3  ;;  %v1085_v49 = vld [vmem:[#allocation2 + $0x68] sm:$0x3] }
  0x36   : > { %v546_v55 = vadd.f32 %v520_v42, %v470_v46  ;;  %v350_v57 = vrot.slane %v314_v50, 2  ;;  %v411_v22 = vmul.f32 %v909_v30, %v1003_v7  ;;  %v486_v15 = vmul.f32 %v911_v33, %v997_v3 }
  0x37   : > { %v274_v61 = vsel %vm262_vm2, %v272_v53, %v273_v54  ;;  %v487_v62 = vmul.f32 %v911_v33, %v1003_v7  ;;  %v387_v2 = vmul.f32 %v906_v26, %v997_v3  ;;  %v445_v4 = vrot.slane %v410_v58, 1 }
  0x38   : > { %v566_v63 = vadd.f32 %v558_v29, %v546_v55  ;;  %v298_v0 = vadd.f32 %v274_v61, %v213_v52  ;;  %v351_v1 = vsel %vm339_vm3, %v349_v56, %v350_v57  ;;  %v446_v5 = vrot.slane %v411_v22, 1 }
  0x39   : > { %v521_v6 = vrot.slane %v486_v15, 2  ;;  %v522_v37 = vrot.slane %v487_v62, 2  ;;  %v582_v9 = vmul.f32 %v913_v34, %v1041_v59  ;;  %v583_v10 = vmul.f32 %v913_v34, %v1043_v60 }
  0x3a   : > { %v642_v41 = vadd.f32 %v616_v51, %v566_v63  ;;  %v375_v8 = vadd.f32 %v351_v1, %v298_v0  ;;  %v692_v13 = vsel %vm339_vm3, %v690_v43, %v691_v47  ;;  %v559_v14 = vmul.f32 %v928_v48, %v1041_v59  ;;  %v1083_v47 = vld [vmem:[#allocation2 + $0x60] sm:$0xff] }
  0x3b   : > { %v658_v17 = vmul.f32 %v919_v40, %v1041_v59  ;;  %v659_v18 = vmul.f32 %v919_v40, %v1043_v60  ;;  %v617_v21 = vrot.slane %v582_v9, 1  ;;  %v618_v23 = vrot.slane %v583_v10, 1 }
  0x3c   : > { %v718_v19 = vadd.f32 %v692_v13, %v642_v41  ;;  %v395_v20 = vadd.f32 %v387_v2, %v375_v8  ;;  %v447_v24 = vsel %vm262_vm2, %v445_v4, %v446_v5  ;;  %v523_v25 = vsel %vm339_vm3, %v521_v6, %v522_v37 }
  0x3d   : > { %v693_v27 = vrot.slane %v658_v17, 2  ;;  %v238_v28 = vmul.f32 %v885_v11, %v997_v3  ;;  %v694_v31 = vrot.slane %v659_v18, 2  ;;  %v239_v32 = vmul.f32 %v885_v11, %v1003_v7 }
  0x3e   : > { %726 = vst.msk [vmem:[%s971_s24 + $0x10] sm:$0xff] %vm144_vm0, %v718_v19  ;;  %v471_v29 = vadd.f32 %v447_v24, %v395_v20  ;;  %v315_v35 = vmul.f32 %v887_v12, %v997_v3  ;;  %v619_v36 = vsel %vm262_vm2, %v617_v21, %v618_v23  ;;  %v214_v38 = vmul.f32 %v892_v16, %v997_v3 }
  0x3f   : > { %v275_v39 = vrot.slane %v238_v28, 1  ;;  %v316_v42 = vmul.f32 %v887_v12, %v1003_v7  ;;  %v276_v44 = vrot.slane %v239_v32, 1  ;;  %v412_v46 = vmul.f32 %v909_v30, %v1041_v59  ;;  %v1126_v32 = vld [vmem:[#allocation2 + $0x78] sm:$0x3] }
  0x40   : > { %v547_v43 = vadd.f32 %v523_v25, %v471_v29  ;;  %v352_v45 = vrot.slane %v315_v35, 2  ;;  %v413_v51 = vmul.f32 %v909_v30, %v1043_v60  ;;  %v488_v3 = vmul.f32 %v911_v33, %v1041_v59 }
  0x41   : > { %v353_v50 = vrot.slane %v316_v42, 2  ;;  %v489_v7 = vmul.f32 %v911_v33, %v1043_v60  ;;  %v695_v53 = vsel %vm339_vm3, %v693_v27, %v694_v31  ;;  %v277_v54 = vsel %vm262_vm2, %v275_v39, %v276_v44  ;;  %v1124_v31 = vld [vmem:[#allocation2 + $0x70] sm:$0xff] }
  0x42   : > { %v567_v52 = vadd.f32 %v559_v14, %v547_v43  ;;  %v448_v55 = vrot.slane %v412_v46, 1  ;;  %v299_v56 = vadd.f32 %v277_v54, %v214_v38  ;;  %v449_v58 = vrot.slane %v413_v51, 1 }
  0x43   : > { %v354_v57 = vsel %vm339_vm3, %v352_v45, %v353_v50  ;;  %v524_v61 = vrot.slane %v488_v3, 2  ;;  %v525_v15 = vrot.slane %v489_v7, 2  ;;  %v584_v62 = vmul.f32 %v913_v34, %v1083_v47 }
  0x44   : > { %v643_v22 = vadd.f32 %v619_v36, %v567_v52  ;;  %v585_v63 = vmul.f32 %v913_v34, %v1085_v49  ;;  %v376_v0 = vadd.f32 %v354_v57, %v299_v56  ;;  %v388_v1 = vmul.f32 %v906_v26, %v1041_v59 }
  0x45   : > { %v660_v2 = vmul.f32 %v919_v40, %v1083_v47  ;;  %v661_v4 = vmul.f32 %v919_v40, %v1085_v49  ;;  %v450_v6 = vsel %vm262_vm2, %v448_v55, %v449_v58  ;;  %v560_v37 = vmul.f32 %v928_v48, %v1083_v47 }
  0x46   : > { %v719_v5 = vadd.f32 %v695_v53, %v643_v22  ;;  %v396_v41 = vadd.f32 %v388_v1, %v376_v0  ;;  %v526_v8 = vsel %vm339_vm3, %v524_v61, %v525_v15  ;;  %v620_v9 = vrot.slane %v584_v62, 1 }
  0x47   : > { %v621_v10 = vrot.slane %v585_v63, 1  ;;  %v696_v13 = vrot.slane %v660_v2, 2  ;;  %v240_v14 = vmul.f32 %v885_v11, %v1041_v59  ;;  %v241_v17 = vmul.f32 %v885_v11, %v1043_v60 }
  0x48   : > { %727 = vst.msk [vmem:[%s971_s24 + $0x18] sm:$0xff] %vm144_vm0, %v719_v5  ;;  %v317_v18 = vmul.f32 %v887_v12, %v1041_v59  ;;  %v472_v19 = vadd.f32 %v450_v6, %v396_v41  ;;  %v697_v20 = vrot.slane %v661_v4, 2  ;;  %v215_v21 = vmul.f32 %v892_v16, %v1041_v59 }
  0x49   : > { %v318_v23 = vmul.f32 %v887_v12, %v1043_v60  ;;  %v278_v24 = vrot.slane %v240_v14, 1  ;;  %v279_v25 = vrot.slane %v241_v17, 1  ;;  %v414_v28 = vmul.f32 %v909_v30, %v1083_v47  ;;  %v199_v17 = vld [vmem:[#allocation2 + $0x80] sm:$0xff] }
  0x4a   : > { %v355_v27 = vrot.slane %v317_v18, 2  ;;  %v548_v29 = vadd.f32 %v526_v8, %v472_v19  ;;  %v415_v36 = vmul.f32 %v909_v30, %v1085_v49  ;;  %v490_v59 = vmul.f32 %v911_v33, %v1083_v47 }
  0x4b   : > { %v356_v35 = vrot.slane %v318_v23, 2  ;;  %v622_v60 = vsel %vm262_vm2, %v620_v9, %v621_v10  ;;  %v280_v38 = vsel %vm262_vm2, %v278_v24, %v279_v25  ;;  %v451_v39 = vrot.slane %v414_v28, 1  ;;  %v200_v23 = vld [vmem:[#allocation2 + $0x88] sm:$0x3] }
  0x4c   : > { %v491_v42 = vmul.f32 %v911_v33, %v1085_v49  ;;  %v568_v43 = vadd.f32 %v560_v37, %v548_v29  ;;  %v300_v44 = vadd.f32 %v280_v38, %v215_v21  ;;  %v452_v46 = vrot.slane %v415_v36, 1 }
  0x4d   : > { %v357_v45 = vsel %vm339_vm3, %v355_v27, %v356_v35  ;;  %v527_v50 = vrot.slane %v490_v59, 2  ;;  %v586_v3 = vmul.f32 %v913_v34, %v1124_v31  ;;  %v587_v7 = vmul.f32 %v913_v34, %v1126_v32 }
  0x4e   : > { %v528_v51 = vrot.slane %v491_v42, 2  ;;  %v644_v52 = vadd.f32 %v622_v60, %v568_v43  ;;  %v377_v53 = vadd.f32 %v357_v45, %v300_v44  ;;  %v389_v54 = vmul.f32 %v906_v26, %v1083_v47 }
  0x4f   : > { %v662_v55 = vmul.f32 %v919_v40, %v1124_v31  ;;  %v698_v56 = vsel %vm339_vm3, %v696_v13, %v697_v20  ;;  %v561_v57 = vmul.f32 %v928_v48, %v1124_v31  ;;  %v623_v58 = vrot.slane %v586_v3, 1 }
  0x50   : > { %v624_v61 = vrot.slane %v587_v7, 1  ;;  %v720_v22 = vadd.f32 %v698_v56, %v644_v52  ;;  %v397_v15 = vadd.f32 %v389_v54, %v377_v53  ;;  %v453_v62 = vsel %vm262_vm2, %v451_v39, %v452_v46 }
  0x51   : > { %v529_v63 = vsel %vm339_vm3, %v527_v50, %v528_v51  ;;  %v663_v0 = vmul.f32 %v919_v40, %v1126_v32  ;;  %v699_v1 = vrot.slane %v662_v55, 2  ;;  %v242_v2 = vmul.f32 %v885_v11, %v1083_v47 }
  0x52   : > { %v243_v4 = vmul.f32 %v885_v11, %v1085_v49  ;;  %728 = vst.msk [vmem:[%s971_s24 + $0x20] sm:$0xff] %vm144_vm0, %v720_v22  ;;  %v473_v5 = vadd.f32 %v453_v62, %v397_v15  ;;  %v216_v6 = vmul.f32 %v892_v16, %v1083_v47  ;;  %v319_v37 = vmul.f32 %v887_v12, %v1083_v47 }
  0x53   : > { %v320_v41 = vmul.f32 %v887_v12, %v1085_v49  ;;  %v625_v8 = vsel %vm262_vm2, %v623_v58, %v624_v61  ;;  %v281_v9 = vrot.slane %v242_v2, 1  ;;  %v416_v13 = vmul.f32 %v909_v30, %v1124_v31 }
  0x54   : > { %v282_v10 = vrot.slane %v243_v4, 1  ;;  %v549_v14 = vadd.f32 %v529_v63, %v473_v5  ;;  %v358_v18 = vrot.slane %v319_v37, 2  ;;  %v417_v20 = vmul.f32 %v909_v30, %v1126_v32  ;;  %v201_v63 = vld [vmem:[#allocation2 + $0x90] sm:$0xff]  ;;  %v202_v4 = vld [vmem:[#allocation2 + $0x98] sm:$0x3] }
  0x55   : > { %v359_v19 = vrot.slane %v320_v41, 2  ;;  %v700_v21 = vrot.slane %v663_v0, 2  ;;  %v492_v49 = vmul.f32 %v911_v33, %v1124_v31  ;;  %v493_v24 = vmul.f32 %v911_v33, %v1126_v32 }
  0x56   : > { %v283_v47 = vsel %vm262_vm2, %v281_v9, %v282_v10  ;;  %v569_v25 = vadd.f32 %v561_v57, %v549_v14  ;;  %v454_v28 = vrot.slane %v416_v13, 1  ;;  %v455_v29 = vrot.slane %v417_v20, 1 }
  0x57   : > { %v301_v27 = vadd.f32 %v283_v47, %v216_v6  ;;  %v360_v35 = vsel %vm339_vm3, %v358_v18, %v359_v19  ;;  %v530_v36 = vrot.slane %v492_v49, 2  ;;  %v531_v59 = vrot.slane %v493_v24, 2 }
  0x58   : > { %v588_v60 = vmul.f32 %v913_v34, %v199_v17  ;;  %v645_v38 = vadd.f32 %v625_v8, %v569_v25  ;;  %v390_v42 = vmul.f32 %v906_v26, %v1124_v31  ;;  %v589_v43 = vmul.f32 %v913_v34, %v200_v23 }
  0x59   : > { %v378_v39 = vadd.f32 %v360_v35, %v301_v27  ;;  %v701_v44 = vsel %vm339_vm3, %v699_v1, %v700_v21  ;;  %v562_v45 = vmul.f32 %v928_v48, %v199_v17  ;;  %v664_v46 = vmul.f32 %v919_v40, %v199_v17 }
  0x5a   : > { %v665_v50 = vmul.f32 %v919_v40, %v200_v23  ;;  %v721_v51 = vadd.f32 %v701_v44, %v645_v38  ;;  %v456_v7 = vsel %vm262_vm2, %v454_v28, %v455_v29  ;;  %v532_v52 = vsel %vm339_vm3, %v530_v36, %v531_v59 }
  0x5b   : > { %v398_v3 = vadd.f32 %v390_v42, %v378_v39  ;;  %v626_v53 = vrot.slane %v588_v60, 1  ;;  %v627_v54 = vrot.slane %v589_v43, 1  ;;  %v244_v55 = vmul.f32 %v885_v11, %v1124_v31 }
  0x5c   : > { %v245_v56 = vmul.f32 %v885_v11, %v1126_v32  ;;  %729 = vst.msk [vmem:[%s971_s24 + $0x28] sm:$0xff] %vm144_vm0, %v721_v51  ;;  %v217_v58 = vmul.f32 %v892_v16, %v1124_v31  ;;  %v321_v61 = vmul.f32 %v887_v12, %v1124_v31  ;;  %v322_v22 = vmul.f32 %v887_v12, %v1126_v32 }
  0x5d   : > { %v474_v57 = vadd.f32 %v456_v7, %v398_v3  ;;  %v702_v15 = vrot.slane %v664_v46, 2  ;;  %v703_v62 = vrot.slane %v665_v50, 2  ;;  %v284_v0 = vrot.slane %v244_v55, 1 }
  0x5e   : > { %v285_v1 = vrot.slane %v245_v56, 1  ;;  %v361_v11 = vrot.slane %v321_v61, 2  ;;  %v362_v5 = vrot.slane %v322_v22, 2  ;;  %v418_v6 = vmul.f32 %v909_v30, %v199_v17 }
  0x5f   : > { %v550_v2 = vadd.f32 %v532_v52, %v474_v57  ;;  %v419_v16 = vmul.f32 %v909_v30, %v200_v23  ;;  %v494_v31 = vmul.f32 %v911_v33, %v199_v17  ;;  %v495_v41 = vmul.f32 %v911_v33, %v200_v23 }
  0x60   : > { %v286_v37 = vsel %vm262_vm2, %v284_v0, %v285_v1  ;;  %v457_v8 = vrot.slane %v418_v6, 1  ;;  %v590_v9 = vmul.f32 %v913_v34, %v201_v63  ;;  %v628_v10 = vsel %vm262_vm2, %v626_v53, %v627_v54 }
  0x61   : > { %v570_v12 = vadd.f32 %v562_v45, %v550_v2  ;;  %v302_v32 = vadd.f32 %v286_v37, %v217_v58  ;;  %v363_v13 = vsel %vm339_vm3, %v361_v11, %v362_v5  ;;  %v458_v14 = vrot.slane %v419_v16, 1 }
  0x62   : > { %v591_v18 = vmul.f32 %v913_v34, %v202_v4  ;;  %v391_v30 = vmul.f32 %v906_v26, %v199_v17  ;;  %v704_v21 = vsel %vm339_vm3, %v702_v15, %v703_v62  ;;  %v533_v23 = vrot.slane %v494_v31, 2 }
  0x63   : > { %v646_v19 = vadd.f32 %v628_v10, %v570_v12  ;;  %v379_v20 = vadd.f32 %v363_v13, %v302_v32  ;;  %v459_v33 = vsel %vm262_vm2, %v457_v8, %v458_v14  ;;  %v534_v47 = vrot.slane %v495_v41, 2 }
  0x64   : > { %v629_v25 = vrot.slane %v590_v9, 1  ;;  %v630_v27 = vrot.slane %v591_v18, 1  ;;  %v666_v28 = vmul.f32 %v919_v40, %v201_v63  ;;  %v667_v29 = vmul.f32 %v919_v40, %v202_v4 }
  0x65   : > { %v722_v49 = vadd.f32 %v704_v21, %v646_v19  ;;  %v399_v24 = vadd.f32 %v391_v30, %v379_v20  ;;  %v563_v26 = vmul.f32 %v928_v48, %v201_v63  ;;  %v535_v17 = vsel %vm339_vm3, %v533_v23, %v534_v47 }
  0x66   : > { %v631_v36 = vsel %vm262_vm2, %v629_v25, %v630_v27  ;;  %v705_v59 = vrot.slane %v666_v28, 2  ;;  %v706_v60 = vrot.slane %v667_v29, 2 }
  0x67   : > { %730 = vst.msk [vmem:[%s971_s24 + $0x30] sm:$0xff] %vm144_vm0, %v722_v49  ;;  %v475_v34 = vadd.f32 %v459_v33, %v399_v24 }
  0x68   : > { %v707_v42 = vsel %vm339_vm3, %v705_v59, %v706_v60 }
  0x69   : > { %v551_v35 = vadd.f32 %v535_v17, %v475_v34 }
  0x6b   : > { %v571_v38 = vadd.f32 %v563_v26, %v551_v35 }
  0x6d   : > { %v647_v39 = vadd.f32 %v631_v36, %v571_v38 }
  0x6f   : > { %v723_v43 = vadd.f32 %v707_v42, %v647_v39 }
  0x71   : > { %731 = vst.msk [vmem:[%s971_s24 + $0x38] sm:$0xff] %vm144_vm0, %v723_v43 }
  0x72 PF: > { %s12_s9 = sadd.s32 1, %s815_s9  }
  0x73   : > { %p9_p4 = scmp.ge.s32.totalorder %s12_s9, 4  }
  0x75   :  { %11 = sbr.rel (!%p9_p4) target bundleno = 1 (0x1), region = 59 }

// kernel: transformer_block_forward.9
= control target key start
LH: loop header
LB: loop body
LE: loop exit
PB: predicated region body
PF: predicated region fallthrough
CT: control target
= control target key end

     0   :  { %7 = vsyncpa [#allocation3], 0  ;;  %s1341_s9 = smov 0   ;;  %s1607_s0 = inlined_call_operand.vmem [shape: f32[2], index: 0, kind: input, shape index: {}]   ;;  %s1608_s1 = inlined_call_operand.vmem [shape: f32[2,64,48], index: 1, kind: input, shape index: {}]   ;;  %s1609_s2 = inlined_call_operand.vmem [shape: f32[2,64,16], index: 2, kind: output, shape index: {}]  }
   0x1 LB: > { %s1041_s10 = sadd.s32 4294967295, %s1314_s9   ;;  %p1043_p0 = scmp.ge.s32.totalorder %s1314_s9, 1  ;;  %s1314_s9 = sphi %s1341_s9, %s13_s9  }
   0x2   : > { %p91_p1 = scmp.lt.s32.totalorder %s1314_s9, 3  ;;  %s104_s13 = sshll.u32 %s1607_s0, 4  ;;  %s105_s13 = int_to_ptr.vmem [resolvable:$true] %s104_s13 }
   0x3   : > { %p1213_p3 = scmp.eq.s32.totalorder %s1041_s10, 0  ;;  %s1289_s15 = scalar_lea.vmem %s105_s13, 16 }
   0x4   : > { %p1352_p2 = pnand %p1043_p0, %p91_p1  ;;  %p1290_p6 = scmp.ne.s32.totalorder %s105_s13, %s1289_s15 }
   0x5   : > { %p1297_p10 = scmp.lt.s32.totalorder %s105_s13, %s105_s13  ;;  %p1298_p11 = scmp.lt.s32.totalorder %s1289_s15, %s1289_s15 }
   0x6   : > { %p1209_p4 = pneg %p1352_p2 }
   0x7   : > { %p1299_p12 = por %p1298_p11, %p1297_p10 }
   0x8   : > { %p1210_p5 = pnand %p1213_p3, %p1209_p4 }
   0xa   : > { %p1291_p7 = pneg %p1210_p5 }
   0xc   : > { %p1292_p8 = pnand %p1291_p7, %p1290_p6 }
   0xe   : > { %p1293_p9 = pneg %p1292_p8 }
  0x10   : > { %p1300_p13 = pnand %p1299_p12, %p1293_p9 }
  0x12   : > { %1303 = shalt.err (!%p1300_p13)
}
  0x13   : > { %s1316_s16 = smov [#allocation2]   ;;  %125 = sbr.rel (%p1352_p2) target bundleno = 1673 (0x689), region = 28 }
  0x14   : > { %1212 = dma.vmem_to_smem (!%p1210_p5), %s105_s13, 16, %s1316_s16, [#allocation3]  }
  0x1a   : > { %1309 = dma.done.wait (%p1213_p3), [#allocation3], 16  }
  0x1b   : > { %1311 = vsyncadd (%p1213_p3), [#allocation3], 4294967280 }
  0x1c   : > { %131 = sfence }
  0x1d   : > { %p148_p0 = scmp.lt.s32.totalorder %s1041_s10, 1  ;;  %vm206_vm0 = vcmask 195712   ;;  %vm538_vm1 = vcmask 130112   ;;  %vm174_vm2 = vcmask 64512   ;;  %vm570_vm3 = vcmask 261312   ;;  %s1318_s21 = smov 112  }
  0x1e   : > { %vm1319_vm4 = vmmov 0   ;;  %vm302_vm5 = vcmask 523264   ;;  %s1321_s22 = smov 120   ;;  %s1322_s23 = smov 96   ;;  %vm965_vm6 = vcmask 130048  }
  0x1f   : > { %s1612_s10 = smov (!%p148_p0, %s1041_s10), 1  ;;  %s376_s24 = sld [smem:[#allocation2]] }
  0x20   : > { %s1075_s17 = sshll.u32 %s1612_s10, 6  ;;  %s1323_s25 = smov 104  }
  0x21   : > { %s152_s20 = scalar_lea.vmem %s1608_s1, %s1075_s17  ;;  %s1324_s26 = smov 88  }
  0x22   : > { %v1371_v0 = vld [vmem:[%s152_s20] sm:$0xff]  ;;  %v1373_v1 = vld [vmem:[%s152_s20 + $0x8] sm:$0xff]  ;;  %v1375_v2 = vld [vmem:[%s152_s20 + $0x10] sm:$0xff]  ;;  %s1063_s27 = sld [smem:[#allocation2 + $0x1]]  ;;  %s1325_s28 = smov 8  }
  0x23   : > { %v1377_v3 = vld [vmem:[%s152_s20 + $0x18] sm:$0xff]  ;;  %v166_v4 = vmul.f32 %v1371_v0, %v1371_v0  ;;  %v167_v5 = vmul.f32 %v1373_v1, %v1373_v1  ;;  %v168_v6 = vmul.f32 %v1375_v2, %v1375_v2  ;;  %v1385_v7 = vld [vmem:[%s152_s20 + $0x20] sm:$0xff]  ;;  %v1389_v9 = vld [vmem:[%s152_s20 + $0x28] sm:$0xff]  ;;  %s157_s3 = scalar_lea.vmem %s1609_s2, %s1075_s17 }
  0x24   : > { %v169_v8 = vmul.f32 %v1377_v3, %v1377_v3  ;;  %v1392_v11 = vld [vmem:[%s152_s20 + $0x30] sm:$0xff]  ;;  %v170_v12 = vmul.f32 %v1385_v7, %v1385_v7  ;;  %v1398_v15 = vld [vmem:[%s152_s20 + $0x38] sm:$0xff]  ;;  %v171_v17 = vmul.f32 %v1389_v9, %v1389_v9 }
  0x25   : > { %v207_v10 = vsel %vm206_vm0, %v166_v4, 0.0  ;;  %v208_v13 = vsel %vm206_vm0, %v167_v5, 0.0  ;;  %v210_v14 = vsel %vm206_vm0, %v168_v6, 0.0  ;;  %v539_v19 = vsel %vm538_vm1, %v166_v4, 0.0 }
  0x26   : > { %v209_v16 = vadd.f32 %v208_v13, %v207_v10  ;;  %v212_v18 = vsel %vm206_vm0, %v169_v8, 0.0  ;;  %v540_v20 = vsel %vm538_vm1, %v167_v5, 0.0  ;;  %v172_v21 = vmul.f32 %v1392_v11, %v1392_v11 }
  0x27   : > { %v541_v23 = vadd.f32 %v540_v20, %v539_v19  ;;  %v542_v24 = vsel %vm538_vm1, %v168_v6, 0.0  ;;  %v173_v25 = vmul.f32 %v1398_v15, %v1398_v15  ;;  %v176_v26 = vsel %vm174_vm2, %v167_v5, 0.0 }
  0x28   : > { %v211_v22 = vadd.f32 %v210_v14, %v209_v16  ;;  %v214_v27 = vsel %vm206_vm0, %v170_v12, 0.0  ;;  %v544_v28 = vsel %vm538_vm1, %v169_v8, 0.0  ;;  %v571_v31 = vsel %vm570_vm3, %v166_v4, 0.0 }
  0x29   : > { %v543_v30 = vadd.f32 %v542_v24, %v541_v23  ;;  %v572_v32 = vsel %vm570_vm3, %v167_v5, 0.0  ;;  %v216_v33 = vsel %vm206_vm0, %v171_v17, 0.0  ;;  %v546_v34 = vsel %vm538_vm1, %v170_v12, 0.0 }
  0x2a   : > { %v213_v29 = vadd.f32 %v212_v18, %v211_v22  ;;  %v573_v35 = vadd.f32 %v572_v32, %v571_v31  ;;  %v574_v36 = vsel %vm570_vm3, %v168_v6, 0.0  ;;  %v178_v37 = vsel %vm174_vm2, %v168_v6, 0.0 }
  0x2b   : > { %v545_v39 = vadd.f32 %v544_v28, %v543_v30  ;;  %v576_v40 = vsel %vm570_vm3, %v169_v8, 0.0  ;;  %v218_v41 = vsel %vm206_vm0, %v172_v21, 0.0  ;;  %v548_v42 = vsel %vm538_vm1, %v171_v17, 0.0 }
  0x2c   : > { %v215_v38 = vadd.f32 %v214_v27, %v213_v29  ;;  %v575_v43 = vadd.f32 %v574_v36, %v573_v35  ;;  %v175_v44 = vsel %vm174_vm2, %v166_v4, 0.0  ;;  %v578_v47 = vsel %vm570_vm3, %v170_v12, 0.0 }
  0x2d   : > { %v547_v46 = vadd.f32 %v546_v34, %v545_v39  ;;  %v177_v48 = vadd.f32 %v176_v26, %v175_v44  ;;  %v180_v49 = vsel %vm174_vm2, %v169_v8, 0.0  ;;  %v220_v50 = vsel %vm206_vm0, %v173_v25, 0.0 }
  0x2e   : > { %v217_v45 = vadd.f32 %v216_v33, %v215_v38  ;;  %v550_v51 = vsel %vm538_vm1, %v172_v21, 0.0  ;;  %v577_v52 = vadd.f32 %v576_v40, %v575_v43  ;;  %v580_v55 = vsel %vm570_vm3, %v171_v17, 0.0 }
  0x2f   : > { %v549_v54 = vadd.f32 %v548_v42, %v547_v46  ;;  %v179_v56 = vadd.f32 %v178_v37, %v177_v48  ;;  %v182_v57 = vsel %vm174_vm2, %v170_v12, 0.0  ;;  %v552_v58 = vsel %vm538_vm1, %v173_v25, 0.0 }
  0x30   : > { %v219_v53 = vadd.f32 %v218_v41, %v217_v45  ;;  %v579_v59 = vadd.f32 %v578_v47, %v577_v52  ;;  %v582_v62 = vsel %vm570_vm3, %v172_v21, 0.0  ;;  %v584_v8 = vsel %vm570_vm3, %v173_v25, 0.0 }
  0x31   : > { %v551_v61 = vadd.f32 %v550_v51, %v549_v54  ;;  %v181_v63 = vadd.f32 %v180_v49, %v179_v56  ;;  %v184_v13 = vsel %vm174_vm2, %v171_v17, 0.0  ;;  %v186_v20 = vsel %vm174_vm2, %v172_v21, 0.0 }
  0x32   : > { %v221_v60 = vadd.f32 %v220_v50, %v219_v53  ;;  %v581_v4 = vadd.f32 %v580_v55, %v579_v59  ;;  %v188_v26 = vsel %vm174_vm2, %v173_v25, 0.0  ;;  %v1317_v31 = vmov 0.0|0.0  }
  0x33   : > { %v1431_v6 = vadd.f32 %v552_v58, %v551_v61  ;;  %v183_v10 = vadd.f32 %v182_v57, %v181_v63  ;;  %1179 = vmatprep.subr.bf16.mxu0 %v1317_v31  ;;  %v1320_v46 = vmov 0.0  }
  0x34   : > { %v222_v5 = vrot.slane %v221_v60, 4  ;;  %v583_v14 = vadd.f32 %v582_v62, %v581_v4  ;;  %1129 = vmatprep.mubr.msk.f32.mxu0 %vm1319_vm4, %v1320_v46 }
  0x35   : > { %v185_v19 = vadd.f32 %v184_v13, %v183_v10 }
  0x36   : > { %v223_v16 = vadd.f32 %v222_v5, %v221_v60  ;;  %v1435_v12 = vadd.f32 %v584_v8, %v583_v14 }
  0x37   : > { %v187_v24 = vadd.f32 %v186_v20, %v185_v19 }
  0x38   : > { %v224_v18 = vrot.slane %v223_v16, 2 }
  0x39   : > { %v189_v29 = vadd.f32 %v188_v26, %v187_v24 }
  0x3a   : > { %v225_v22 = vadd.f32 %v224_v18, %v223_v16 }
  0x3b   : > { %v190_v30 = vrot.slane %v189_v29, 4 }
  0x3c   : > { %v226_v23 = vrot.slane %v225_v22, 1 }
  0x3d   : > { %v191_v17 = vadd.f32 %v190_v30, %v189_v29 }
  0x3e   : > { %v227_v27 = vadd.f32 %v226_v23, %v225_v22  ;;  %v554_v23 = vrot.slane %v1431_v6, 4 }
  0x3f   : > { %v192_v33 = vrot.slane %v191_v17, 2 }
  0x40   : > { %v228_v28 = vmax.f32 %v227_v27, 1e-24  ;;  %v555_v24 = vadd.f32 %v554_v23, %v1431_v6 }
  0x41   : > { %v193_v43 = vadd.f32 %v192_v33, %v191_v17 }
  0x42   : > { %1273 = vrsqrt.f32 %v228_v28  ;;  %v556_v26 = vrot.slane %v555_v24, 2 }
  0x43   : > { %v194_v45 = vrot.slane %v193_v43, 1 }
  0x44   : > { %v557_v27 = vadd.f32 %v556_v26, %v555_v24 }
  0x45   : > { %v195_v47 = vadd.f32 %v194_v45, %v193_v43 }
  0x46   : > { %v558_v28 = vrot.slane %v557_v27, 1 }
  0x47   : > { %v196_v48 = vmax.f32 %v195_v47, 1e-24 }
  0x48   : > { %v559_v29 = vadd.f32 %v558_v28, %v557_v27 }
  0x49   : > { %1275 = vrsqrt.f32 %v196_v48 }
  0x4a   : > { %v560_v30 = vmax.f32 %v559_v29, 1e-24 }
  0x4c   : > { %v1274_v32 = vpop.eup %1273  ;;  %1277 = vrsqrt.f32 %v560_v30 }
  0x4d   : > { %v230_v34 = vmul.f32 %v1274_v32, %v1371_v0  ;;  %v231_v21 = vmul.f32 %v1274_v32, %v1373_v1  ;;  %v232_v35 = vmul.f32 %v1274_v32, %v1375_v2  ;;  %v233_v36 = vmul.f32 %v1274_v32, %v1377_v3 }
  0x4e   : > { %v234_v25 = vmul.f32 %v1274_v32, %v1385_v7  ;;  %v235_v37 = vmul.f32 %v1274_v32, %v1389_v9  ;;  %v236_v38 = vmul.f32 %v1274_v32, %v1392_v11  ;;  %v237_v39 = vmul.f32 %v1274_v32, %v1398_v15 }
  0x4f   : > { %v1233_v40 = vpack.i.bf16 %v231_v21, %v230_v34  ;;  %v1238_v42 = vpack.i.bf16 %v233_v36, %v232_v35  ;;  %v586_v21 = vrot.slane %v1435_v12, 4 }
  0x50   : > { %v1243_v41 = vpack.i.bf16 %v235_v37, %v234_v25  ;;  %v1248_v44 = vpack.i.bf16 %v237_v39, %v236_v38  ;;  %v377_v37 = vstv %s376_s24 }
  0x51   : > { %1234 = vrot.lane.b32.xlu0 %v1233_v40, %s1318_s21  ;;  %v587_v35 = vadd.f32 %v586_v21, %v1435_v12 }
  0x52   : > { %1244 = vrot.lane.b32.xlu1 %v1243_v41, %s1318_s21 }
  0x53   : > { %v1276_v49 = vpop.eup %1275  ;;  %v588_v36 = vrot.slane %v587_v35, 2 }
  0x54   : > { %v198_v50 = vmul.f32 %v1276_v49, %v1371_v0  ;;  %v199_v51 = vmul.f32 %v1276_v49, %v1373_v1  ;;  %v200_v52 = vmul.f32 %v1276_v49, %v1375_v2  ;;  %v201_v53 = vmul.f32 %v1276_v49, %v1377_v3 }
  0x55   : > { %1239 = vrot.lane.b32.xlu0 %v1238_v42, %s1318_s21  ;;  %v202_v54 = vmul.f32 %v1276_v49, %v1385_v7  ;;  %v203_v55 = vmul.f32 %v1276_v49, %v1389_v9  ;;  %v204_v56 = vmul.f32 %v1276_v49, %v1392_v11  ;;  %v205_v57 = vmul.f32 %v1276_v49, %v1398_v15 }
  0x56   : > { %1249 = vrot.lane.b32.xlu1 %v1248_v44, %s1318_s21  ;;  %v1278_v17 = vpop.eup %1277  ;;  %v589_v25 = vadd.f32 %v588_v36, %v587_v35 }
  0x57   : > { %v563_v32 = vmul.f32 %v1278_v17, %v1373_v1  ;;  %v565_v33 = vmul.f32 %v1278_v17, %v1377_v3  ;;  %v566_v34 = vmul.f32 %v1278_v17, %v1385_v7  ;;  %v568_v6 = vmul.f32 %v1278_v17, %v1392_v11 }
  0x58   : > { %v590_v38 = vrot.slane %v589_v25, 1  ;;  %v562_v45 = vmul.f32 %v1278_v17, %v1371_v0  ;;  %v564_v12 = vmul.f32 %v1278_v17, %v1375_v2 }
  0x5a   : > { %v591_v42 = vadd.f32 %v590_v38, %v589_v25 }
  0x5c   : > { %v592_v44 = vmax.f32 %v591_v42, 1e-24 }
  0x5e   : > { %1279 = vrsqrt.f32 %v592_v44 }
  0x68   : > { %v1280_v47 = vpop.eup %1279 }
  0x69   : > { %v596_v48 = vmul.f32 %v1280_v47, %v1375_v2  ;;  %v597_v49 = vmul.f32 %v1280_v47, %v1377_v3 }
  0x73   : > { %238 = vxpose.xlu0.b32.start [1/8] (short) (narrow) %v198_v50, 8  ;;  %v1258_v50 = vpack.i.bf16 %v597_v49, %v596_v48 }
  0x77   : > { %239 = vxpose.xlu0.b32.cont [2/8] (short) (narrow) %v199_v51, 8  ;;  %v567_v51 = vmul.f32 %v1278_v17, %v1389_v9 }
  0x7b   : > { %240 = vxpose.xlu0.b32.cont [3/8] (short) (narrow) %v200_v52, 8  ;;  %v569_v52 = vmul.f32 %v1278_v17, %v1398_v15 }
  0x7f   : > { %241 = vxpose.xlu0.b32.cont [4/8] (short) (narrow) %v201_v53, 8  ;;  %v594_v53 = vmul.f32 %v1280_v47, %v1371_v0 }
  0x83   : > { %242 = vxpose.xlu0.b32.cont [5/8] (short) (narrow) %v202_v54, 8  ;;  %v595_v54 = vmul.f32 %v1280_v47, %v1373_v1 }
  0x87   : > { %243 = vxpose.xlu0.b32.cont [6/8] (short) (narrow) %v203_v55, 8  ;;  %v1253_v55 = vpack.i.bf16 %v595_v54, %v594_v53 }
  0x8b   : > { %244 = vxpose.xlu0.b32.cont [7/8] (short) (narrow) %v204_v56, 8  ;;  %v600_v56 = vmul.f32 %v1280_v47, %v1392_v11 }
  0x8f   : > { %245 = vxpose.xlu0.b32.end [8/8] (short) (narrow) %v205_v57, 8  ;;  %v601_v57 = vmul.f32 %v1280_v47, %v1398_v15 }
  0xb8   : > { %612 = vrot.lane.b32.xlu0 %v563_v32, %s1321_s22 }
  0xbc   : > { %616 = vrot.lane.b32.xlu0 %v565_v33, %s1321_s22 }
  0xc0   : > { %618 = vrot.lane.b32.xlu0 %v566_v34, %s1321_s22 }
  0xc3   : > { %v1235_v58 = vpop.permute.xlu0 %1234 }
  0xc4   : > { %v1237_v59 = vunpack.i.h.bf16 %v1235_v58  ;;  %v1236_v60 = vunpack.i.l.bf16 %v1235_v58  ;;  %v1245_v61 = vpop.permute.xlu1 %1244  ;;  %622 = vrot.lane.b32.xlu0 %v568_v6, %s1321_s22  ;;  %v1268_v58 = vpack.i.bf16 %v601_v57, %v600_v56 }
  0xc5   : > { %v1247_v8 = vunpack.i.h.bf16 %v1245_v61  ;;  %v1246_v10 = vunpack.i.l.bf16 %v1245_v61 }
  0xc6   : > { %v1180_v62 = vpack.c.bf16 %v1237_v59, %v1236_v60 }
  0xc7   : > { %v1240_v63 = vpop.permute.xlu0 %1239  ;;  %v1186_v16 = vpack.c.bf16 %v1247_v8, %v1246_v10 }
  0xc8   : > { %v1242_v4 = vunpack.i.h.bf16 %v1240_v63  ;;  %v1241_v5 = vunpack.i.l.bf16 %v1240_v63  ;;  %1181 = vmatpush3.bf16.msra.mxu0 %v1180_v62  ;;  %v1250_v13 = vpop.permute.xlu1 %1249  ;;  %398 = vrot.lane.b32.xlu0 %v1371_v0, %s1322_s23 }
  0xc9   : > { %1182 = vmatprep.subr.bf16.mxu0 %v1317_v31  ;;  %v1252_v18 = vunpack.i.h.bf16 %v1250_v13  ;;  %v1251_v19 = vunpack.i.l.bf16 %v1250_v13 }
  0xca   : > { %v1183_v14 = vpack.c.bf16 %v1242_v4, %v1241_v5 }
  0xcb   : > { %v1189_v20 = vpack.c.bf16 %v1252_v18, %v1251_v19  ;;  %v598_v19 = vmul.f32 %v1280_v47, %v1385_v7 }
  0xcc   : > { %1184 = vmatpush3.bf16.msra.mxu0 %v1183_v14  ;;  %400 = vrot.lane.b32.xlu0 %v1373_v1, %s1322_s23 }
  0xcd   : > { %1185 = vmatprep.subr.bf16.mxu0 %v1317_v31 }
  0xd0   : > { %1187 = vmatpush3.bf16.msra.mxu0 %v1186_v16  ;;  %1259 = vrot.lane.b32.xlu0 %v1258_v50, %s1323_s25 }
  0xd1   : > { %1188 = vmatprep.subr.bf16.mxu0 %v1317_v31 }
  0xd4   : > { %1190 = vmatpush3.bf16.msra.mxu0 %v1189_v20  ;;  %406 = vrot.lane.b32.xlu0 %v1385_v7, %s1322_s23  ;;  %v599_v20 = vmul.f32 %v1280_v47, %v1389_v9 }
  0xd8   : > { %408 = vrot.lane.b32.xlu0 %v1389_v9, %s1322_s23 }
  0xdc   : > { %1269 = vrot.lane.b32.xlu0 %v1268_v58, %s1323_s25 }
  0xf3   : > { %v254_v22 = vpop.trf.xlu0 }
  0xf4   : > { %1130 = vmatmul.mubr.msk.f32.vlgmr.msra.gmra.mrb[0].mxu0 %vm302_vm5, %v254_v22  ;;  %v1263_v22 = vpack.i.bf16 %v599_v20, %v598_v19 }
 0x12a   : > { %v613_v59 = vpop.permute.xlu0 %612 }
 0x12e   : > { %v617_v60 = vpop.permute.xlu0 %616 }
 0x132   : > { %v619_v61 = vpop.permute.xlu0 %618 }
 0x136   : > { %v623_v62 = vpop.permute.xlu0 %622 }
 0x13a   : > { %v399_v63 = vpop.permute.xlu0 %398 }
 0x13b   : > { %1134 = vmatprep.mubr.msk.f32.mxu1 %vm174_vm2, %v399_v63 }
 0x13e   : > { %v401_v28 = vpop.permute.xlu0 %400 }
 0x142   : > { %v1260_v30 = vpop.permute.xlu0 %1259 }
 0x143   : > { %v1262_v25 = vunpack.i.h.bf16 %v1260_v30 }
 0x146   : > { %v407_v17 = vpop.permute.xlu0 %406 }
 0x14a   : > { %v409_v35 = vpop.permute.xlu0 %408 }
 0x14e   : > { %v1270_v42 = vpop.permute.xlu0 %1269 }
 0x14f   : > { %v1272_v44 = vunpack.i.h.bf16 %v1270_v42 }
 0x1c7   : > { %v372_v39 = vpop.f32.mrb[0].mxu0 }
 0x1c8   : > { %v378_v40 = vmul.f32 %v377_v37, %v372_v39  ;;  %v1131_v41 = vpop.f32.mrb[1].mxu0  ;;  %v1261_v37 = vunpack.i.l.bf16 %v1260_v30 }
 0x1ca   : > { %v379_v43 = vsel %vm174_vm2, %v378_v40, -inf }
 0x1cb   : > { %380 = vmax.xlane.f32.xlu1 %v379_v43 }
 0x1dc   : > { %610 = vrot.lane.b32.xlu1 %v562_v45, %s1321_s22  ;;  %v1271_v45 = vunpack.i.l.bf16 %v1270_v42 }
 0x1e0   : > { %614 = vrot.lane.b32.xlu1 %v564_v12, %s1321_s22  ;;  %v1201_v12 = vpack.c.bf16 %v1272_v44, %v1271_v45 }
 0x1e4   : > { %620 = vrot.lane.b32.xlu1 %v567_v51, %s1321_s22 }
 0x1e8   : > { %624 = vrot.lane.b32.xlu1 %v569_v52, %s1321_s22 }
 0x1ec   : > { %1254 = vrot.lane.b32.xlu1 %v1253_v55, %s1323_s25  ;;  %v772_v55 = vstv %s1063_s27 }
 0x1f0   : > { %402 = vrot.lane.b32.xlu1 %v1375_v2, %s1322_s23 }
 0x1f4   : > { %404 = vrot.lane.b32.xlu1 %v1377_v3, %s1322_s23 }
 0x258   : > { %v381_v4 = vpop.xlane.xlu1 %380 }
 0x259   : > { %v382_v5 = vsub.f32 %v378_v40, %v381_v4  ;;  %v1195_v40 = vpack.c.bf16 %v1262_v25, %v1261_v37 }
 0x25b   : > { %v383_v8 = vmul.f32 1.442695, %v382_v5 }
 0x25c   : > { %v611_v10 = vpop.permute.xlu1 %610 }
 0x25d   : > { %1281 = vpow2.f32 %v383_v8  ;;  %634 = vxpose.xlu0.b32.start [1/8] (short) (narrow) %v611_v10, 8 }
 0x260   : > { %v615_v13 = vpop.permute.xlu1 %614 }
 0x261   : > { %635 = vxpose.xlu0.b32.cont [2/8] (short) (narrow) %v613_v59, 8 }
 0x264   : > { %v621_v18 = vpop.permute.xlu1 %620 }
 0x265   : > { %636 = vxpose.xlu0.b32.cont [3/8] (short) (narrow) %v615_v13, 8 }
 0x267   : > { %v1282_v14 = vpop.eup %1281 }
 0x268   : > { %v385_v16 = vsel %vm174_vm2, %v1282_v14, 0.0  ;;  %v625_v23 = vpop.permute.xlu1 %624 }
 0x269   : > { %386 = vadd.xlane.f32.xlu1 %v385_v16  ;;  %637 = vxpose.xlu0.b32.cont [4/8] (short) (narrow) %v617_v60, 8 }
 0x26c   : > { %v1255_v24 = vpop.permute.xlu1 %1254 }
 0x26d   : > { %638 = vxpose.xlu0.b32.cont [5/8] (short) (narrow) %v619_v61, 8  ;;  %v1257_v34 = vunpack.i.h.bf16 %v1255_v24  ;;  %v1256_v6 = vunpack.i.l.bf16 %v1255_v24 }
 0x26f   : > { %v1192_v36 = vpack.c.bf16 %v1257_v34, %v1256_v6 }
 0x270   : > { %v403_v26 = vpop.permute.xlu1 %402 }
 0x271   : > { %639 = vxpose.xlu0.b32.cont [6/8] (short) (narrow) %v621_v18, 8 }
 0x274   : > { %v405_v27 = vpop.permute.xlu1 %404 }
 0x275   : > { %640 = vxpose.xlu0.b32.cont [7/8] (short) (narrow) %v623_v62, 8 }
 0x279   : > { %641 = vxpose.xlu0.b32.end [8/8] (short) (narrow) %v625_v23, 8 }
 0x27a   : > { %1264 = vrot.lane.b32.xlu1 %v1263_v22, %s1323_s25 }
 0x27e   : > { %410 = vrot.lane.b32.xlu1 %v1392_v11, %s1322_s23 }
 0x282   : > { %412 = vrot.lane.b32.xlu1 %v1398_v15, %s1322_s23 }
 0x2a2   : > { %787 = vrot.lane.b32.xlu0 %v1373_v1, %s1324_s26 }
 0x2dd   : > { %v650_v48 = vpop.trf.xlu0 }
 0x2f6   : > { %v387_v29 = vpop.xlane.xlu1 %386 }
 0x2f7   : > { %1283 = vrcp.f32 %v387_v29 }
 0x2fa   : > { %v1265_v21 = vpop.permute.xlu1 %1264 }
 0x2fb   : > { %v1267_v38 = vunpack.i.h.bf16 %v1265_v21  ;;  %v1266_v39 = vunpack.i.l.bf16 %v1265_v21 }
 0x2fd   : > { %v1198_v43 = vpack.c.bf16 %v1267_v38, %v1266_v39 }
 0x2fe   : > { %v411_v41 = vpop.permute.xlu1 %410 }
 0x301   : > { %v1284_v32 = vpop.eup %1283 }
 0x302   : > { %v389_v33 = vmul.f32 %v1284_v32, %v1282_v14  ;;  %v413_v47 = vpop.permute.xlu1 %412 }
 0x304   : > { %1132 = vmatprep.subr.msk.mxu1 %vm174_vm2, %v389_v33 }
 0x305   : > { %1133 = vmatpush3.xpose.msk.msra.mxu1 %vm174_vm2, %v389_v33 }
 0x306   : > { %1191 = vmatprep.subr.bf16.mxu1 %v1317_v31 }
 0x308   : > { %1135 = vmatmul.mubr.msk.f32.vlgmr.msra.gmra.mrb[0].mxu1 %vm174_vm2, %v401_v28 }
 0x309   : > { %1137 = vmatprep.mubr.msk.f32.mxu1 %vm174_vm2, %v403_v26  ;;  %1193 = vmatpush3.bf16.msra.mxu1 %v1192_v36 }
 0x30a   : > { %1194 = vmatprep.subr.bf16.mxu1 %v1317_v31 }
 0x30c   : > { %1138 = vmatmul.mubr.msk.f32.gmra.mrb[2].mxu1 %vm174_vm2, %v405_v27 }
 0x30d   : > { %1140 = vmatprep.mubr.msk.f32.mxu1 %vm174_vm2, %v407_v17  ;;  %1196 = vmatpush3.bf16.msra.mxu1 %v1195_v40 }
 0x30e   : > { %1197 = vmatprep.subr.bf16.mxu1 %v1317_v31 }
 0x310   : > { %1141 = vmatmul.mubr.msk.f32.gmra.mrb[4].mxu1 %vm174_vm2, %v409_v35 }
 0x311   : > { %1143 = vmatprep.mubr.msk.f32.mxu1 %vm174_vm2, %v411_v41  ;;  %1199 = vmatpush3.bf16.msra.mxu1 %v1198_v43 }
 0x312   : > { %1200 = vmatprep.subr.bf16.mxu1 %v1317_v31 }
 0x314   : > { %1144 = vmatmul.mubr.msk.f32.gmra.mrb[6].mxu1 %vm174_vm2, %v413_v47  ;;  %v788_v13 = vpop.permute.xlu0 %787 }
 0x315   : > { %1202 = vmatpush3.bf16.msra.mxu1 %v1201_v12  ;;  %1162 = vmatprep.mubr.msk.f32.mxu1 %vm1319_vm4, %v1320_v46 }
 0x318   : > { %1163 = vmatmul.mubr.msk.f32.vlgmr.msra.gmra.mrb[8].mxu1 %vm302_vm5, %v650_v48 }
 0x3db   : > { %v1531_v49 = vpop.f32.mrb[0].mxu1 }
 0x3dc   : > { %v1533_v50 = vpop.f32.mrb[1].mxu1 }
 0x3df   : > { %v1535_v51 = vpop.f32.mrb[2].mxu1 }
 0x3e0   : > { %v1537_v31 = vpop.f32.mrb[3].mxu1 }
 0x3e3   : > { %v1539_v52 = vpop.f32.mrb[4].mxu1 }
 0x3e4   : > { %v1541_v53 = vpop.f32.mrb[5].mxu1 }
 0x3e7   : > { %v1543_v46 = vpop.f32.mrb[6].mxu1 }
 0x3e8   : > { %v1545_v54 = vpop.f32.mrb[7].mxu1 }
 0x3eb   : > { %v767_v56 = vpop.f32.mrb[8].mxu1 }
 0x3ec   : > { %v773_v1 = vmul.f32 %v772_v55, %v767_v56  ;;  %v1164_v57 = vpop.f32.mrb[9].mxu1 }
 0x3ee   : > { %v774_v58 = vsel %vm174_vm2, %v773_v1, -inf }
 0x3ef   : > { %775 = vmax.xlane.f32.xlu1 %v774_v58 }
 0x400   : > { %785 = vrot.lane.b32.xlu1 %v1371_v0, %s1324_s26 }
 0x404   : > { %789 = vrot.lane.b32.xlu1 %v1375_v2, %s1324_s26 }
 0x408   : > { %791 = vrot.lane.b32.xlu1 %v1377_v3, %s1324_s26 }
 0x40c   : > { %793 = vrot.lane.b32.xlu1 %v1385_v7, %s1324_s26 }
 0x410   : > { %797 = vrot.lane.b32.xlu1 %v1392_v11, %s1324_s26 }
 0x47c   : > { %v776_v59 = vpop.xlane.xlu1 %775 }
 0x47d   : > { %v777_v60 = vsub.f32 %v773_v1, %v776_v59 }
 0x47f   : > { %v778_v61 = vmul.f32 1.442695, %v777_v60 }
 0x480   : > { %v786_v62 = vpop.permute.xlu1 %785 }
 0x481   : > { %1285 = vpow2.f32 %v778_v61  ;;  %1167 = vmatprep.mubr.msk.f32.mxu0 %vm174_vm2, %v786_v62 }
 0x484   : > { %v790_v0 = vpop.permute.xlu1 %789 }
 0x488   : > { %v792_v63 = vpop.permute.xlu1 %791 }
 0x48b   : > { %v1286_v4 = vpop.eup %1285 }
 0x48c   : > { %v780_v2 = vsel %vm174_vm2, %v1286_v4, 0.0  ;;  %v794_v5 = vpop.permute.xlu1 %793 }
 0x48d   : > { %781 = vadd.xlane.f32.xlu1 %v780_v2 }
 0x490   : > { %v798_v3 = vpop.permute.xlu1 %797 }
 0x491   : > { %1176 = vmatprep.mubr.msk.f32.mxu1 %vm174_vm2, %v798_v3 }
 0x49e   : > { %795 = vrot.lane.b32.xlu1 %v1389_v9, %s1324_s26 }
 0x4a2   : > { %799 = vrot.lane.b32.xlu1 %v1398_v15, %s1324_s26 }
 0x51a   : > { %v782_v7 = vpop.xlane.xlu1 %781 }
 0x51b   : > { %1287 = vrcp.f32 %v782_v7 }
 0x51e   : > { %v796_v11 = vpop.permute.xlu1 %795 }
 0x522   : > { %v800_v14 = vpop.permute.xlu1 %799 }
 0x525   : > { %v1288_v8 = vpop.eup %1287 }
 0x526   : > { %v784_v10 = vmul.f32 %v1288_v8, %v1286_v4 }
 0x528   : > { %1165 = vmatprep.subr.msk.mxu0 %vm174_vm2, %v784_v10  ;;  %1203 = vmatprep.subr.msk.mxu1 %vm174_vm2, %v784_v10 }
 0x529   : > { %1166 = vmatpush3.xpose.msk.msra.mxu0 %vm174_vm2, %v784_v10  ;;  %1204 = vmatpush3.xpose.msk.msra.mxu1 %vm174_vm2, %v784_v10 }
 0x52c   : > { %1168 = vmatmul.mubr.msk.f32.vlgmr.msra.gmra.mrb[2].mxu0 %vm174_vm2, %v788_v13  ;;  %1177 = vmatmul.mubr.msk.f32.vlgmr.msra.gmra.mrb[10].mxu1 %vm174_vm2, %v800_v14 }
 0x52d   : > { %1170 = vmatprep.mubr.msk.f32.mxu0 %vm174_vm2, %v790_v0 }
 0x530   : > { %1171 = vmatmul.mubr.msk.f32.gmra.mrb[4].mxu0 %vm174_vm2, %v792_v63 }
 0x531   : > { %1173 = vmatprep.mubr.msk.f32.mxu0 %vm174_vm2, %v794_v5 }
 0x534   : > { %1174 = vmatmul.mubr.msk.f32.gmra.mrb[6].mxu0 %vm174_vm2, %v796_v11 }
 0x5ff   : > { %v1169_v9 = vpop.f32.mrb[2].mxu0  ;;  %v1178_v15 = vpop.f32.mrb[10].mxu1 }
 0x600   : > { %935 = vrot.lane.b32.xlu1 %v1169_v9, %s1325_s28  ;;  %v886_v16 = vpop.f32.mrb[3].mxu0  ;;  %v916_v18 = vpop.f32.mrb[11].mxu1 }
 0x603   : > { %v1172_v19 = vpop.f32.mrb[4].mxu0 }
 0x604   : > { %933 = vrot.lane.b32.xlu1 %v886_v16, %s1325_s28  ;;  %v896_v20 = vpop.f32.mrb[5].mxu0 }
 0x607   : > { %v1175_v22 = vpop.f32.mrb[6].mxu0 }
 0x608   : > { %939 = vrot.lane.b32.xlu1 %v1172_v19, %s1325_s28  ;;  %v906_v23 = vpop.f32.mrb[7].mxu0 }
 0x609   : > { %941 = vrot.lane.b32.xlu0 %v906_v23, %s1325_s28 }
 0x60c   : > { %937 = vrot.lane.b32.xlu1 %v896_v20, %s1325_s28 }
 0x60d   : > { %945 = vrot.lane.b32.xlu0 %v916_v18, %s1325_s28 }
 0x610   : > { %943 = vrot.lane.b32.xlu1 %v1175_v22, %s1325_s28 }
 0x614   : > { %947 = vrot.lane.b32.xlu1 %v1178_v15, %s1325_s28 }
 0x672   : > { %v936_v24 = vpop.permute.xlu1 %935 }
 0x673   : > { %v958_v26 = vsel %vm174_vm2, %v1531_v49, %v936_v24 }
 0x674   : > { %967 = vst.msk [vmem:[%s157_s3 + $0x8] sm:$0xff] %vm965_vm6, %v958_v26 }
 0x676   : > { %v934_v27 = vpop.permute.xlu1 %933 }
 0x677   : > { %v957_v28 = vsel %vm174_vm2, %v1533_v50, %v934_v27 }
 0x678   : > { %966 = vst.msk [vmem:[%s157_s3] sm:$0xff] %vm965_vm6, %v957_v28 }
 0x67a   : > { %v940_v29 = vpop.permute.xlu1 %939 }
 0x67b   : > { %v960_v30 = vsel %vm174_vm2, %v1535_v51, %v940_v29  ;;  %v942_v17 = vpop.permute.xlu0 %941 }
 0x67c   : > { %969 = vst.msk [vmem:[%s157_s3 + $0x18] sm:$0xff] %vm965_vm6, %v960_v30  ;;  %v961_v32 = vsel %vm174_vm2, %v1541_v53, %v942_v17 }
 0x67d   : > { %970 = vst.msk [vmem:[%s157_s3 + $0x20] sm:$0xff] %vm965_vm6, %v961_v32 }
 0x67e   : > { %v938_v33 = vpop.permute.xlu1 %937 }
 0x67f   : > { %v959_v34 = vsel %vm174_vm2, %v1537_v31, %v938_v33  ;;  %v946_v6 = vpop.permute.xlu0 %945 }
 0x680   : > { %968 = vst.msk [vmem:[%s157_s3 + $0x10] sm:$0xff] %vm965_vm6, %v959_v34  ;;  %v963_v21 = vsel %vm174_vm2, %v1545_v54, %v946_v6 }
 0x681   : > { %972 = vst.msk [vmem:[%s157_s3 + $0x30] sm:$0xff] %vm965_vm6, %v963_v21 }
 0x682   : > { %v944_v35 = vpop.permute.xlu1 %943 }
 0x683   : > { %v962_v36 = vsel %vm174_vm2, %v1539_v52, %v944_v35 }
 0x684   : > { %971 = vst.msk [vmem:[%s157_s3 + $0x28] sm:$0xff] %vm965_vm6, %v962_v36 }
 0x686   : > { %v948_v25 = vpop.permute.xlu1 %947 }
 0x687   : > { %v964_v37 = vsel %vm174_vm2, %v1543_v46, %v948_v25 }
 0x688   : > { %973 = vst.msk [vmem:[%s157_s3 + $0x38] sm:$0xff] %vm965_vm6, %v964_v37 }
 0x689 PF: > { %s13_s9 = sadd.s32 1, %s1314_s9  }
 0x68a   : > { %p10_p1 = scmp.ge.s32.totalorder %s13_s9, 4  }
 0x68c   :  { %12 = sbr.rel (!%p10_p1) target bundleno = 1 (0x1), region = 63 }
 0x693   :  { %995 = vsyncpa [#allocation3], 1 }
 0x694   :  { %997 = vsyncpa [#allocation3 + $0x1], 1 }

// kernel: transformer_block_forward.10
= control target key start
LH: loop header
LB: loop body
LE: loop exit
PB: predicated region body
PF: predicated region fallthrough
CT: control target
= control target key end

     0   :  { %vm32_vm0 = vcmask 130048   ;;  %s548_s1 = inlined_call_operand.vmem [shape: f32[16,16], index: 1, kind: input, shape index: {}]   ;;  %s549_s0 = inlined_call_operand.vmem [shape: f32[128,16], index: 0, kind: input, shape index: {}]   ;;  %s550_s2 = inlined_call_operand.vmem [shape: f32[128,16], index: 2, kind: input, shape index: {}]   ;;  %s551_s3 = inlined_call_operand.vmem [shape: f32[128,16], index: 3, kind: output, shape index: {}]  }
   0x1   :  { %v30_v0 = vld [vmem:[%s548_s1] sm:$0xff]  ;;  %v31_v1 = vld [vmem:[%s548_s1 + $0x8] sm:$0xff]  ;;  %v16_v7 = vld [vmem:[%s549_s0 + $0x10] sm:$0xff] }
   0x2   :  { %v14_v2 = vld [vmem:[%s549_s0] sm:$0xff]  ;;  %v340_v3 = vpack.c.bf16 %v31_v1, %v30_v0  ;;  %v15_v5 = vld [vmem:[%s549_s0 + $0x8] sm:$0xff]  ;;  %v24_v8 = vld [vmem:[%s549_s0 + $0x50] sm:$0xff] }
   0x3   :  { %316 = vmatprep.mubr.msk.f32.mxu0 %vm32_vm0, %v14_v2  ;;  %v22_v4 = vld [vmem:[%s549_s0 + $0x40] sm:$0xff]  ;;  %v23_v6 = vld [vmem:[%s549_s0 + $0x48] sm:$0xff]  ;;  %v17_v9 = vld [vmem:[%s549_s0 + $0x18] sm:$0xff] }
   0x4   :  { %328 = vmatprep.mubr.msk.f32.mxu1 %vm32_vm0, %v22_v4  ;;  %341 = vmatprep.subr.bf16.mxu0 %v340_v3  ;;  %v25_v10 = vld [vmem:[%s549_s0 + $0x58] sm:$0xff]  ;;  %v18_v11 = vld [vmem:[%s549_s0 + $0x20] sm:$0xff]  ;;  %v19_v13 = vld [vmem:[%s549_s0 + $0x28] sm:$0xff] }
   0x5   :  { %344 = vmatprep.subr.bf16.mxu1 %v340_v3  ;;  %343 = vmatpush3.bf16.msra.mxu0 %v340_v3  ;;  %v26_v12 = vld [vmem:[%s549_s0 + $0x60] sm:$0xff]  ;;  %v27_v14 = vld [vmem:[%s549_s0 + $0x68] sm:$0xff]  ;;  %v20_v15 = vld [vmem:[%s549_s0 + $0x30] sm:$0xff] }
   0x6   :  { %345 = vmatpush3.bf16.msra.mxu1 %v340_v3  ;;  %v28_v16 = vld [vmem:[%s549_s0 + $0x70] sm:$0xff]  ;;  %v21_v17 = vld [vmem:[%s549_s0 + $0x38] sm:$0xff]  ;;  %v227_v19 = vld [vmem:[%s550_s2 + $0x8] sm:$0xff] }
   0x7   :  { %v29_v18 = vld [vmem:[%s549_s0 + $0x78] sm:$0xff]  ;;  %v235_v20 = vld [vmem:[%s550_s2 + $0x48] sm:$0xff]  ;;  %v226_v21 = vld [vmem:[%s550_s2] sm:$0xff] }
   0x8   :  { %317 = vmatmul.mubr.msk.f32.vlgmr.msra.gmra.mrb[0].mxu0 %vm32_vm0, %v15_v5  ;;  %v234_v22 = vld [vmem:[%s550_s2 + $0x40] sm:$0xff]  ;;  %v229_v31 = vld [vmem:[%s550_s2 + $0x18] sm:$0xff]  ;;  %v228_v33 = vld [vmem:[%s550_s2 + $0x10] sm:$0xff] }
   0x9   :  { %329 = vmatmul.mubr.msk.f32.vlgmr.msra.gmra.mrb[0].mxu1 %vm32_vm0, %v23_v6  ;;  %319 = vmatprep.mubr.msk.f32.mxu0 %vm32_vm0, %v16_v7  ;;  %v237_v32 = vld [vmem:[%s550_s2 + $0x58] sm:$0xff]  ;;  %v236_v34 = vld [vmem:[%s550_s2 + $0x50] sm:$0xff]  ;;  %v231_v43 = vld [vmem:[%s550_s2 + $0x28] sm:$0xff] }
   0xa   :  { %331 = vmatprep.mubr.msk.f32.mxu1 %vm32_vm0, %v24_v8  ;;  %v239_v44 = vld [vmem:[%s550_s2 + $0x68] sm:$0xff]  ;;  %v230_v45 = vld [vmem:[%s550_s2 + $0x20] sm:$0xff]  ;;  %v233_v55 = vld [vmem:[%s550_s2 + $0x38] sm:$0xff] }
   0xb   :  { %v238_v46 = vld [vmem:[%s550_s2 + $0x60] sm:$0xff]  ;;  %v241_v56 = vld [vmem:[%s550_s2 + $0x78] sm:$0xff]  ;;  %v232_v57 = vld [vmem:[%s550_s2 + $0x30] sm:$0xff] }
   0xc   :  { %320 = vmatmul.mubr.msk.f32.gmra.mrb[2].mxu0 %vm32_vm0, %v17_v9  ;;  %v240_v58 = vld [vmem:[%s550_s2 + $0x70] sm:$0xff] }
   0xd   :  { %332 = vmatmul.mubr.msk.f32.gmra.mrb[2].mxu1 %vm32_vm0, %v25_v10  ;;  %322 = vmatprep.mubr.msk.f32.mxu0 %vm32_vm0, %v18_v11 }
   0xe   :  { %334 = vmatprep.mubr.msk.f32.mxu1 %vm32_vm0, %v26_v12 }
  0x10   :  { %323 = vmatmul.mubr.msk.f32.gmra.mrb[4].mxu0 %vm32_vm0, %v19_v13 }
  0x11   :  { %335 = vmatmul.mubr.msk.f32.gmra.mrb[4].mxu1 %vm32_vm0, %v27_v14  ;;  %325 = vmatprep.mubr.msk.f32.mxu0 %vm32_vm0, %v20_v15 }
  0x12   :  { %337 = vmatprep.mubr.msk.f32.mxu1 %vm32_vm0, %v28_v16 }
  0x14   :  { %326 = vmatmul.mubr.msk.f32.gmra.mrb[6].mxu0 %vm32_vm0, %v21_v17 }
  0x15   :  { %338 = vmatmul.mubr.msk.f32.gmra.mrb[6].mxu1 %vm32_vm0, %v29_v18 }
  0xdb   :  { %v318_v23 = vpop.f32.mrb[0].mxu0 }
  0xdc   :  { %v330_v24 = vpop.f32.mrb[0].mxu1  ;;  %v243_v25 = vadd.f32 %v318_v23, %v227_v19  ;;  %v147_v27 = vpop.f32.mrb[1].mxu0 }
  0xdd   :  { %v251_v26 = vadd.f32 %v330_v24, %v235_v20  ;;  %v187_v28 = vpop.f32.mrb[1].mxu1  ;;  %v242_v29 = vadd.f32 %v226_v21, %v147_v27 }
  0xde   :  { %v250_v30 = vadd.f32 %v234_v22, %v187_v28  ;;  %259 = vst.msk [vmem:[%s551_s3 + $0x8] sm:$0xff] %vm32_vm0, %v243_v25 }
  0xdf   :  { %267 = vst.msk [vmem:[%s551_s3 + $0x48] sm:$0xff] %vm32_vm0, %v251_v26  ;;  %258 = vst.msk [vmem:[%s551_s3] sm:$0xff] %vm32_vm0, %v242_v29  ;;  %v321_v35 = vpop.f32.mrb[2].mxu0 }
  0xe0   :  { %266 = vst.msk [vmem:[%s551_s3 + $0x40] sm:$0xff] %vm32_vm0, %v250_v30  ;;  %v333_v36 = vpop.f32.mrb[2].mxu1  ;;  %v245_v37 = vadd.f32 %v321_v35, %v229_v31  ;;  %v157_v39 = vpop.f32.mrb[3].mxu0 }
  0xe1   :  { %v253_v38 = vadd.f32 %v333_v36, %v237_v32  ;;  %v197_v40 = vpop.f32.mrb[3].mxu1  ;;  %v244_v41 = vadd.f32 %v228_v33, %v157_v39 }
  0xe2   :  { %v252_v42 = vadd.f32 %v236_v34, %v197_v40  ;;  %261 = vst.msk [vmem:[%s551_s3 + $0x18] sm:$0xff] %vm32_vm0, %v245_v37 }
  0xe3   :  { %269 = vst.msk [vmem:[%s551_s3 + $0x58] sm:$0xff] %vm32_vm0, %v253_v38  ;;  %260 = vst.msk [vmem:[%s551_s3 + $0x10] sm:$0xff] %vm32_vm0, %v244_v41  ;;  %v324_v47 = vpop.f32.mrb[4].mxu0 }
  0xe4   :  { %268 = vst.msk [vmem:[%s551_s3 + $0x50] sm:$0xff] %vm32_vm0, %v252_v42  ;;  %v336_v48 = vpop.f32.mrb[4].mxu1  ;;  %v247_v49 = vadd.f32 %v324_v47, %v231_v43  ;;  %v167_v51 = vpop.f32.mrb[5].mxu0 }
  0xe5   :  { %v255_v50 = vadd.f32 %v336_v48, %v239_v44  ;;  %v207_v52 = vpop.f32.mrb[5].mxu1  ;;  %v246_v53 = vadd.f32 %v230_v45, %v167_v51 }
  0xe6   :  { %v254_v54 = vadd.f32 %v238_v46, %v207_v52  ;;  %263 = vst.msk [vmem:[%s551_s3 + $0x28] sm:$0xff] %vm32_vm0, %v247_v49 }
  0xe7   :  { %271 = vst.msk [vmem:[%s551_s3 + $0x68] sm:$0xff] %vm32_vm0, %v255_v50  ;;  %262 = vst.msk [vmem:[%s551_s3 + $0x20] sm:$0xff] %vm32_vm0, %v246_v53  ;;  %v327_v59 = vpop.f32.mrb[6].mxu0 }
  0xe8   :  { %270 = vst.msk [vmem:[%s551_s3 + $0x60] sm:$0xff] %vm32_vm0, %v254_v54  ;;  %v339_v60 = vpop.f32.mrb[6].mxu1  ;;  %v249_v61 = vadd.f32 %v327_v59, %v233_v55  ;;  %v177_v63 = vpop.f32.mrb[7].mxu0 }
  0xe9   :  { %v257_v62 = vadd.f32 %v339_v60, %v241_v56  ;;  %v217_v0 = vpop.f32.mrb[7].mxu1  ;;  %v248_v1 = vadd.f32 %v232_v57, %v177_v63 }
  0xea   :  { %v256_v2 = vadd.f32 %v240_v58, %v217_v0  ;;  %265 = vst.msk [vmem:[%s551_s3 + $0x38] sm:$0xff] %vm32_vm0, %v249_v61 }
  0xeb   :  { %273 = vst.msk [vmem:[%s551_s3 + $0x78] sm:$0xff] %vm32_vm0, %v257_v62  ;;  %264 = vst.msk [vmem:[%s551_s3 + $0x30] sm:$0xff] %vm32_vm0, %v248_v1 }
  0xec   :  { %272 = vst.msk [vmem:[%s551_s3 + $0x70] sm:$0xff] %vm32_vm0, %v256_v2 }

// kernel: transformer_block_forward.11
= control target key start
LH: loop header
LB: loop body
LE: loop exit
PB: predicated region body
PF: predicated region fallthrough
CT: control target
= control target key end

     0   :  { %vm33_vm0 = vcmask 130048   ;;  %vm484_vm1 = vcmask 687104   ;;  %s960_s0 = inlined_call_operand.vmem [shape: f32[128,16], index: 0, kind: input, shape index: {}]   ;;  %s961_s3 = inlined_call_operand.vmem [shape: f32[16,84], index: 3, kind: input, shape index: {}]   ;;  %s962_s1 = inlined_call_operand.vmem [shape: f32[1,16], index: 1, kind: input, shape index: {}]   ;;  %s963_s2 = inlined_call_operand.vmem [shape: f32[1,16], index: 2, kind: input, shape index: {}]   ;;  %s964_s4 = inlined_call_operand.vmem [shape: f32[128,84], index: 4, kind: output, shape index: {}]  }
   0x1   :  { %v17_v0 = vld [vmem:[%s960_s0] sm:$0xff]  ;;  %v18_v1 = vld [vmem:[%s960_s0 + $0x8] sm:$0xff]  ;;  %v19_v8 = vld [vmem:[%s960_s0 + $0x10] sm:$0xff] }
   0x2   :  { %v25_v2 = vld [vmem:[%s960_s0 + $0x40] sm:$0xff]  ;;  %v34_v3 = vsel %vm33_vm0, %v17_v0, 0.0  ;;  %v37_v4 = vsel %vm33_vm0, %v18_v1, 0.0  ;;  %v26_v5 = vld [vmem:[%s960_s0 + $0x48] sm:$0xff]  ;;  %v27_v9 = vld [vmem:[%s960_s0 + $0x50] sm:$0xff]  ;;  %v40_v10 = vsel %vm33_vm0, %v19_v8, 0.0 }
   0x3   :  { %35 = vadd.xlane.f32.xlu0 %v34_v3  ;;  %38 = vadd.xlane.f32.xlu1 %v37_v4  ;;  %v58_v6 = vsel %vm33_vm0, %v25_v2, 0.0  ;;  %v61_v7 = vsel %vm33_vm0, %v26_v5, 0.0  ;;  %v64_v11 = vsel %vm33_vm0, %v27_v9, 0.0  ;;  %v659_v12 = vld [vmem:[%s960_s0 + $0x18] sm:$0xff]  ;;  %v673_v16 = vld [vmem:[%s960_s0 + $0x20] sm:$0xff]  ;;  %v687_v20 = vld [vmem:[%s960_s0 + $0x28] sm:$0xff] }
   0x4   :  { %v664_v13 = vld [vmem:[%s960_s0 + $0x58] sm:$0xff]  ;;  %v43_v14 = vsel %vm33_vm0, %v659_v12, 0.0  ;;  %v678_v17 = vld [vmem:[%s960_s0 + $0x60] sm:$0xff]  ;;  %v46_v18 = vsel %vm33_vm0, %v673_v16, 0.0  ;;  %v692_v21 = vld [vmem:[%s960_s0 + $0x68] sm:$0xff]  ;;  %v49_v22 = vsel %vm33_vm0, %v687_v20, 0.0 }
   0x5   :  { %v67_v15 = vsel %vm33_vm0, %v664_v13, 0.0  ;;  %v70_v19 = vsel %vm33_vm0, %v678_v17, 0.0  ;;  %v73_v23 = vsel %vm33_vm0, %v692_v21, 0.0  ;;  %v701_v24 = vld [vmem:[%s960_s0 + $0x30] sm:$0xff]  ;;  %v715_v28 = vld [vmem:[%s960_s0 + $0x38] sm:$0xff] }
   0x6   :  { %v706_v25 = vld [vmem:[%s960_s0 + $0x70] sm:$0xff]  ;;  %v52_v26 = vsel %vm33_vm0, %v701_v24, 0.0  ;;  %v720_v29 = vld [vmem:[%s960_s0 + $0x78] sm:$0xff]  ;;  %v55_v30 = vsel %vm33_vm0, %v715_v28, 0.0 }
   0x7   :  { %59 = vadd.xlane.f32.xlu0 %v58_v6  ;;  %62 = vadd.xlane.f32.xlu1 %v61_v7  ;;  %v76_v27 = vsel %vm33_vm0, %v706_v25, 0.0  ;;  %v79_v31 = vsel %vm33_vm0, %v720_v29, 0.0 }
   0xb   :  { %41 = vadd.xlane.f32.xlu0 %v40_v10  ;;  %65 = vadd.xlane.f32.xlu1 %v64_v11 }
   0xf   :  { %44 = vadd.xlane.f32.xlu0 %v43_v14  ;;  %68 = vadd.xlane.f32.xlu1 %v67_v15 }
  0x13   :  { %47 = vadd.xlane.f32.xlu0 %v46_v18  ;;  %71 = vadd.xlane.f32.xlu1 %v70_v19 }
  0x17   :  { %50 = vadd.xlane.f32.xlu0 %v49_v22  ;;  %74 = vadd.xlane.f32.xlu1 %v73_v23 }
  0x1b   :  { %53 = vadd.xlane.f32.xlu0 %v52_v26  ;;  %77 = vadd.xlane.f32.xlu1 %v76_v27 }
  0x1f   :  { %56 = vadd.xlane.f32.xlu0 %v55_v30  ;;  %80 = vadd.xlane.f32.xlu1 %v79_v31 }
  0x90   :  { %v36_v32 = vpop.xlane.xlu0 %35  ;;  %v39_v33 = vpop.xlane.xlu1 %38 }
  0x91   :  { %v83_v34 = vmul.f32 0.0625, %v36_v32  ;;  %v84_v35 = vmul.f32 0.0625, %v39_v33 }
  0x93   :  { %v726_v36 = vsub.f32 %v17_v0, %v83_v34  ;;  %v728_v37 = vsub.f32 %v18_v1, %v84_v35 }
  0x94   :  { %v60_v38 = vpop.xlane.xlu0 %59  ;;  %v63_v39 = vpop.xlane.xlu1 %62 }
  0x95   :  { %v91_v40 = vmul.f32 0.0625, %v60_v38  ;;  %v92_v41 = vmul.f32 0.0625, %v63_v39  ;;  %v115_v42 = vmul.f32 %v726_v36, %v726_v36  ;;  %v116_v43 = vmul.f32 %v728_v37, %v728_v37 }
  0x97   :  { %v734_v44 = vsub.f32 %v25_v2, %v91_v40  ;;  %v736_v45 = vsub.f32 %v26_v5, %v92_v41  ;;  %v131_v46 = vsel %vm33_vm0, %v115_v42, 0.0  ;;  %v134_v49 = vsel %vm33_vm0, %v116_v43, 0.0 }
  0x98   :  { %132 = vadd.xlane.f32.xlu0 %v131_v46  ;;  %v42_v47 = vpop.xlane.xlu0 %41  ;;  %v66_v48 = vpop.xlane.xlu1 %65 }
  0x99   :  { %v85_v50 = vmul.f32 0.0625, %v42_v47  ;;  %v93_v51 = vmul.f32 0.0625, %v66_v48  ;;  %v123_v52 = vmul.f32 %v734_v44, %v734_v44  ;;  %v124_v53 = vmul.f32 %v736_v45, %v736_v45 }
  0x9b   :  { %v744_v54 = vsub.f32 %v19_v8, %v85_v50  ;;  %v746_v55 = vsub.f32 %v27_v9, %v93_v51  ;;  %v155_v56 = vsel %vm33_vm0, %v123_v52, 0.0  ;;  %v158_v59 = vsel %vm33_vm0, %v124_v53, 0.0  ;;  %v290_v53 = vld [vmem:[%s961_s3 + $0x8] sm:$0xff] }
  0x9c   :  { %135 = vadd.xlane.f32.xlu0 %v134_v49  ;;  %156 = vadd.xlane.f32.xlu1 %v155_v56  ;;  %v45_v57 = vpop.xlane.xlu0 %44  ;;  %v69_v58 = vpop.xlane.xlu1 %68 }
  0x9d   :  { %v86_v60 = vmul.f32 0.0625, %v45_v57  ;;  %v94_v61 = vmul.f32 0.0625, %v69_v58  ;;  %v117_v62 = vmul.f32 %v744_v54, %v744_v54  ;;  %v125_v63 = vmul.f32 %v746_v55, %v746_v55 }
  0x9f   :  { %v755_v0 = vsub.f32 %v659_v12, %v86_v60  ;;  %v758_v1 = vsub.f32 %v664_v13, %v94_v61  ;;  %v137_v2 = vsel %vm33_vm0, %v117_v62, 0.0  ;;  %v161_v5 = vsel %vm33_vm0, %v125_v63, 0.0 }
  0xa0   :  { %159 = vadd.xlane.f32.xlu1 %v158_v59  ;;  %138 = vadd.xlane.f32.xlu0 %v137_v2  ;;  %v48_v3 = vpop.xlane.xlu0 %47  ;;  %v72_v4 = vpop.xlane.xlu1 %71 }
  0xa1   :  { %v87_v6 = vmul.f32 0.0625, %v48_v3  ;;  %v95_v7 = vmul.f32 0.0625, %v72_v4  ;;  %v118_v8 = vmul.f32 %v755_v0, %v755_v0  ;;  %v126_v9 = vmul.f32 %v758_v1, %v758_v1 }
  0xa3   :  { %v767_v10 = vsub.f32 %v673_v16, %v87_v6  ;;  %v770_v11 = vsub.f32 %v678_v17, %v95_v7  ;;  %v140_v12 = vsel %vm33_vm0, %v118_v8, 0.0  ;;  %v164_v15 = vsel %vm33_vm0, %v126_v9, 0.0 }
  0xa4   :  { %162 = vadd.xlane.f32.xlu1 %v161_v5  ;;  %141 = vadd.xlane.f32.xlu0 %v140_v12  ;;  %v51_v13 = vpop.xlane.xlu0 %50  ;;  %v75_v14 = vpop.xlane.xlu1 %74 }
  0xa5   :  { %v88_v18 = vmul.f32 0.0625, %v51_v13  ;;  %v96_v19 = vmul.f32 0.0625, %v75_v14  ;;  %v119_v22 = vmul.f32 %v767_v10, %v767_v10  ;;  %v127_v16 = vmul.f32 %v770_v11, %v770_v11 }
  0xa7   :  { %v779_v23 = vsub.f32 %v687_v20, %v88_v18  ;;  %v782_v17 = vsub.f32 %v692_v21, %v96_v19  ;;  %v143_v26 = vsel %vm33_vm0, %v119_v22, 0.0  ;;  %v167_v31 = vsel %vm33_vm0, %v127_v16, 0.0  ;;  %v825_v16 = vld [vmem:[%s962_s1] ss:$0 sm:$0xff] }
  0xa8   :  { %165 = vadd.xlane.f32.xlu1 %v164_v15  ;;  %144 = vadd.xlane.f32.xlu0 %v143_v26  ;;  %v54_v27 = vpop.xlane.xlu0 %53  ;;  %v78_v30 = vpop.xlane.xlu1 %77 }
  0xa9   :  { %v89_v32 = vmul.f32 0.0625, %v54_v27  ;;  %v97_v33 = vmul.f32 0.0625, %v78_v30  ;;  %v120_v34 = vmul.f32 %v779_v23, %v779_v23  ;;  %v128_v20 = vmul.f32 %v782_v17, %v782_v17 }
  0xab   :  { %v791_v35 = vsub.f32 %v701_v24, %v89_v32  ;;  %v794_v21 = vsub.f32 %v706_v25, %v97_v33  ;;  %v146_v38 = vsel %vm33_vm0, %v120_v34, 0.0  ;;  %v170_v41 = vsel %vm33_vm0, %v128_v20, 0.0  ;;  %v831_v33 = vld [vmem:[%s963_s2] ss:$0 sm:$0xff] }
  0xac   :  { %168 = vadd.xlane.f32.xlu1 %v167_v31  ;;  %147 = vadd.xlane.f32.xlu0 %v146_v38  ;;  %v57_v39 = vpop.xlane.xlu0 %56  ;;  %v81_v40 = vpop.xlane.xlu1 %80 }
  0xad   :  { %v90_v42 = vmul.f32 0.0625, %v57_v39  ;;  %v98_v43 = vmul.f32 0.0625, %v81_v40  ;;  %v121_v46 = vmul.f32 %v791_v35, %v791_v35  ;;  %v129_v24 = vmul.f32 %v794_v21, %v794_v21 }
  0xaf   :  { %v803_v47 = vsub.f32 %v715_v28, %v90_v42  ;;  %v806_v25 = vsub.f32 %v720_v29, %v98_v43  ;;  %v149_v48 = vsel %vm33_vm0, %v121_v46, 0.0  ;;  %v173_v49 = vsel %vm33_vm0, %v129_v24, 0.0  ;;  %v289_v29 = vld [vmem:[%s961_s3] sm:$0xff] }
  0xb0   :  { %171 = vadd.xlane.f32.xlu1 %v170_v41  ;;  %150 = vadd.xlane.f32.xlu0 %v149_v48  ;;  %v569_v56 = vpack.c.bf16 %v290_v53, %v289_v29 }
  0xb1   :  { %v122_v50 = vmul.f32 %v803_v47, %v803_v47  ;;  %v130_v51 = vmul.f32 %v806_v25, %v806_v25 }
  0xb2   :  { %570 = vmatprep.subr.bf16.mxu0 %v569_v56  ;;  %573 = vmatprep.subr.bf16.mxu1 %v569_v56 }
  0xb3   :  { %v152_v52 = vsel %vm33_vm0, %v122_v50, 0.0  ;;  %v176_v28 = vsel %vm33_vm0, %v130_v51, 0.0  ;;  %572 = vmatpush3.bf16.msra.mxu0 %v569_v56  ;;  %574 = vmatpush3.bf16.msra.mxu1 %v569_v56 }
  0xb4   :  { %174 = vadd.xlane.f32.xlu1 %v173_v49  ;;  %153 = vadd.xlane.f32.xlu0 %v152_v52 }
  0xb8   :  { %177 = vadd.xlane.f32.xlu1 %v176_v28 }
 0x125   :  { %v133_v57 = vpop.xlane.xlu0 %132 }
 0x126   :  { %v179_v58 = vmul.f32 0.0625, %v133_v57 }
 0x128   :  { %v195_v59 = vadd.f32 1e-05, %v179_v58 }
 0x129   :  { %v157_v60 = vpop.xlane.xlu1 %156  ;;  %v136_v61 = vpop.xlane.xlu0 %135 }
 0x12a   :  { %575 = vrsqrt.f32 %v195_v59  ;;  %v187_v62 = vmul.f32 0.0625, %v157_v60  ;;  %v180_v63 = vmul.f32 0.0625, %v136_v61 }
 0x12c   :  { %v203_v2 = vadd.f32 1e-05, %v187_v62  ;;  %v196_v3 = vadd.f32 1e-05, %v180_v63 }
 0x12d   :  { %v160_v4 = vpop.xlane.xlu1 %159  ;;  %v139_v5 = vpop.xlane.xlu0 %138 }
 0x12e   :  { %577 = vrsqrt.f32 %v203_v2  ;;  %v188_v6 = vmul.f32 0.0625, %v160_v4  ;;  %v181_v7 = vmul.f32 0.0625, %v139_v5 }
 0x12f   :  { %579 = vrsqrt.f32 %v196_v3 }
 0x130   :  { %v204_v8 = vadd.f32 1e-05, %v188_v6  ;;  %v197_v9 = vadd.f32 1e-05, %v181_v7 }
 0x131   :  { %v163_v12 = vpop.xlane.xlu1 %162  ;;  %v142_v13 = vpop.xlane.xlu0 %141 }
 0x132   :  { %581 = vrsqrt.f32 %v204_v8  ;;  %v189_v14 = vmul.f32 0.0625, %v163_v12  ;;  %v182_v15 = vmul.f32 0.0625, %v142_v13 }
 0x133   :  { %583 = vrsqrt.f32 %v197_v9 }
 0x134   :  { %v576_v18 = vpop.eup %575  ;;  %v205_v19 = vadd.f32 1e-05, %v189_v14  ;;  %v198_v22 = vadd.f32 1e-05, %v182_v15 }
 0x135   :  { %v166_v26 = vpop.xlane.xlu1 %165  ;;  %v145_v27 = vpop.xlane.xlu0 %144  ;;  %v227_v30 = vmul.f32 %v576_v18, %v726_v36 }
 0x136   :  { %585 = vrsqrt.f32 %v205_v19  ;;  %v190_v31 = vmul.f32 0.0625, %v166_v26  ;;  %v183_v32 = vmul.f32 0.0625, %v145_v27 }
 0x137   :  { %587 = vrsqrt.f32 %v198_v22  ;;  %v250_v34 = vmul.f32 %v825_v16, %v227_v30 }
 0x138   :  { %v578_v20 = vpop.eup %577  ;;  %v206_v38 = vadd.f32 1e-05, %v190_v31  ;;  %v199_v39 = vadd.f32 1e-05, %v183_v32 }
 0x139   :  { %v580_v40 = vpop.eup %579  ;;  %v169_v41 = vpop.xlane.xlu1 %168  ;;  %v273_v43 = vadd.f32 %v831_v33, %v250_v34  ;;  %v235_v36 = vmul.f32 %v578_v20, %v734_v44 }
 0x13a   :  { %v148_v42 = vpop.xlane.xlu0 %147  ;;  %589 = vrsqrt.f32 %v206_v38  ;;  %v191_v46 = vmul.f32 0.0625, %v169_v41  ;;  %v228_v48 = vmul.f32 %v580_v40, %v728_v37 }
 0x13b   :  { %v184_v24 = vmul.f32 0.0625, %v148_v42  ;;  %591 = vrsqrt.f32 %v199_v39  ;;  %545 = vmatprep.mubr.msk.f32.mxu0 %vm33_vm0, %v273_v43  ;;  %v258_v49 = vmul.f32 %v825_v16, %v235_v36 }
 0x13c   :  { %v582_v50 = vpop.eup %581  ;;  %v207_v51 = vadd.f32 1e-05, %v191_v46  ;;  %v251_v28 = vmul.f32 %v825_v16, %v228_v48 }
 0x13d   :  { %v200_v52 = vadd.f32 1e-05, %v184_v24  ;;  %v584_v29 = vpop.eup %583  ;;  %v172_v53 = vpop.xlane.xlu1 %171  ;;  %v281_v44 = vadd.f32 %v831_v33, %v258_v49  ;;  %v236_v57 = vmul.f32 %v582_v50, %v736_v45 }
 0x13e   :  { %v151_v56 = vpop.xlane.xlu0 %150  ;;  %593 = vrsqrt.f32 %v207_v51  ;;  %v192_v58 = vmul.f32 0.0625, %v172_v53  ;;  %v274_v59 = vadd.f32 %v831_v33, %v251_v28  ;;  %v229_v60 = vmul.f32 %v584_v29, %v744_v54 }
 0x13f   :  { %v185_v37 = vmul.f32 0.0625, %v151_v56  ;;  %595 = vrsqrt.f32 %v200_v52  ;;  %557 = vmatprep.mubr.msk.f32.mxu1 %vm33_vm0, %v281_v44  ;;  %v259_v61 = vmul.f32 %v825_v16, %v236_v57 }
 0x140   :  { %v586_v62 = vpop.eup %585  ;;  %v208_v63 = vadd.f32 1e-05, %v192_v58  ;;  %546 = vmatmul.mubr.msk.f32.vlgmr.msra.gmra.mrb[0].mxu0 %vm33_vm0, %v274_v59  ;;  %v252_v5 = vmul.f32 %v825_v16, %v229_v60 }
 0x141   :  { %v201_v2 = vadd.f32 1e-05, %v185_v37  ;;  %v588_v3 = vpop.eup %587  ;;  %v175_v4 = vpop.xlane.xlu1 %174  ;;  %v282_v6 = vadd.f32 %v831_v33, %v259_v61  ;;  %v237_v7 = vmul.f32 %v586_v62, %v746_v55 }
 0x142   :  { %v154_v45 = vpop.xlane.xlu0 %153  ;;  %597 = vrsqrt.f32 %v208_v63  ;;  %v193_v8 = vmul.f32 0.0625, %v175_v4  ;;  %v230_v54 = vmul.f32 %v588_v3, %v755_v0  ;;  %v275_v12 = vadd.f32 %v831_v33, %v252_v5 }
 0x143   :  { %v186_v9 = vmul.f32 0.0625, %v154_v45  ;;  %599 = vrsqrt.f32 %v201_v2  ;;  %558 = vmatmul.mubr.msk.f32.vlgmr.msra.gmra.mrb[0].mxu1 %vm33_vm0, %v282_v6  ;;  %v260_v13 = vmul.f32 %v825_v16, %v237_v7 }
 0x144   :  { %v590_v14 = vpop.eup %589  ;;  %v209_v15 = vadd.f32 1e-05, %v193_v8  ;;  %v253_v19 = vmul.f32 %v825_v16, %v230_v54  ;;  %548 = vmatprep.mubr.msk.f32.mxu0 %vm33_vm0, %v275_v12 }
 0x145   :  { %v202_v18 = vadd.f32 1e-05, %v186_v9  ;;  %v592_v22 = vpop.eup %591  ;;  %v178_v55 = vpop.xlane.xlu1 %177  ;;  %v283_v26 = vadd.f32 %v831_v33, %v260_v13  ;;  %v238_v0 = vmul.f32 %v590_v14, %v758_v1 }
 0x146   :  { %601 = vrsqrt.f32 %v209_v15  ;;  %v194_v27 = vmul.f32 0.0625, %v178_v55  ;;  %v276_v30 = vadd.f32 %v831_v33, %v253_v19  ;;  %v231_v31 = vmul.f32 %v592_v22, %v767_v10 }
 0x147   :  { %603 = vrsqrt.f32 %v202_v18  ;;  %560 = vmatprep.mubr.msk.f32.mxu1 %vm33_vm0, %v283_v26  ;;  %v261_v32 = vmul.f32 %v825_v16, %v238_v0 }
 0x148   :  { %v594_v34 = vpop.eup %593  ;;  %v210_v20 = vadd.f32 1e-05, %v194_v27  ;;  %549 = vmatmul.mubr.msk.f32.gmra.mrb[2].mxu0 %vm33_vm0, %v276_v30  ;;  %v254_v38 = vmul.f32 %v825_v16, %v231_v31 }
 0x149   :  { %v596_v39 = vpop.eup %595  ;;  %v284_v1 = vadd.f32 %v831_v33, %v261_v32  ;;  %v239_v40 = vmul.f32 %v594_v34, %v770_v11 }
 0x14a   :  { %605 = vrsqrt.f32 %v210_v20  ;;  %v277_v41 = vadd.f32 %v831_v33, %v254_v38  ;;  %v232_v10 = vmul.f32 %v596_v39, %v779_v23 }
 0x14b   :  { %561 = vmatmul.mubr.msk.f32.gmra.mrb[2].mxu1 %vm33_vm0, %v284_v1  ;;  %v262_v42 = vmul.f32 %v825_v16, %v239_v40 }
 0x14c   :  { %v598_v43 = vpop.eup %597  ;;  %551 = vmatprep.mubr.msk.f32.mxu0 %vm33_vm0, %v277_v41  ;;  %v255_v36 = vmul.f32 %v825_v16, %v232_v10 }
 0x14d   :  { %v600_v46 = vpop.eup %599  ;;  %v285_v24 = vadd.f32 %v831_v33, %v262_v42  ;;  %v240_v48 = vmul.f32 %v598_v43, %v782_v17 }
 0x14e   :  { %v278_v11 = vadd.f32 %v831_v33, %v255_v36  ;;  %v233_v49 = vmul.f32 %v600_v46, %v791_v35 }
 0x14f   :  { %563 = vmatprep.mubr.msk.f32.mxu1 %vm33_vm0, %v285_v24  ;;  %v263_v23 = vmul.f32 %v825_v16, %v240_v48 }
 0x150   :  { %v602_v50 = vpop.eup %601  ;;  %552 = vmatmul.mubr.msk.f32.gmra.mrb[4].mxu0 %vm33_vm0, %v278_v11  ;;  %v256_v51 = vmul.f32 %v825_v16, %v233_v49 }
 0x151   :  { %v604_v52 = vpop.eup %603  ;;  %v286_v28 = vadd.f32 %v831_v33, %v263_v23  ;;  %v241_v29 = vmul.f32 %v602_v50, %v794_v21 }
 0x152   :  { %v279_v17 = vadd.f32 %v831_v33, %v256_v51  ;;  %v234_v53 = vmul.f32 %v604_v52, %v803_v47 }
 0x153   :  { %564 = vmatmul.mubr.msk.f32.gmra.mrb[4].mxu1 %vm33_vm0, %v286_v28  ;;  %v264_v35 = vmul.f32 %v825_v16, %v241_v29 }
 0x154   :  { %v606_v56 = vpop.eup %605  ;;  %554 = vmatprep.mubr.msk.f32.mxu0 %vm33_vm0, %v279_v17  ;;  %v257_v44 = vmul.f32 %v825_v16, %v234_v53 }
 0x155   :  { %v287_v57 = vadd.f32 %v831_v33, %v264_v35  ;;  %v242_v58 = vmul.f32 %v606_v56, %v806_v25 }
 0x156   :  { %v280_v37 = vadd.f32 %v831_v33, %v257_v44 }
 0x157   :  { %566 = vmatprep.mubr.msk.f32.mxu1 %vm33_vm0, %v287_v57  ;;  %v265_v21 = vmul.f32 %v825_v16, %v242_v58 }
 0x158   :  { %555 = vmatmul.mubr.msk.f32.gmra.mrb[6].mxu0 %vm33_vm0, %v280_v37 }
 0x159   :  { %v288_v47 = vadd.f32 %v831_v33, %v265_v21 }
 0x15b   :  { %567 = vmatmul.mubr.msk.f32.gmra.mrb[6].mxu1 %vm33_vm0, %v288_v47 }
 0x213   :  { %v547_v59 = vpop.f32.mrb[0].mxu0 }
 0x214   :  { %486 = vst.msk [vmem:[%s964_s4 + $0x8] sm:$0xff] %vm484_vm1, %v547_v59  ;;  %v405_v25 = vpop.f32.mrb[1].mxu0 }
 0x215   :  { %485 = vst.msk [vmem:[%s964_s4] sm:$0xff] %vm484_vm1, %v405_v25 }
 0x216   :  { %v559_v16 = vpop.f32.mrb[0].mxu1 }
 0x217   :  { %494 = vst.msk [vmem:[%s964_s4 + $0x48] sm:$0xff] %vm484_vm1, %v559_v16  ;;  %v445_v33 = vpop.f32.mrb[1].mxu1 }
 0x218   :  { %493 = vst.msk [vmem:[%s964_s4 + $0x40] sm:$0xff] %vm484_vm1, %v445_v33 }
 0x21b   :  { %v550_v60 = vpop.f32.mrb[2].mxu0 }
 0x21c   :  { %488 = vst.msk [vmem:[%s964_s4 + $0x18] sm:$0xff] %vm484_vm1, %v550_v60  ;;  %v415_v61 = vpop.f32.mrb[3].mxu0 }
 0x21d   :  { %487 = vst.msk [vmem:[%s964_s4 + $0x10] sm:$0xff] %vm484_vm1, %v415_v61 }
 0x21e   :  { %v562_v62 = vpop.f32.mrb[2].mxu1 }
 0x21f   :  { %496 = vst.msk [vmem:[%s964_s4 + $0x58] sm:$0xff] %vm484_vm1, %v562_v62  ;;  %v455_v63 = vpop.f32.mrb[3].mxu1 }
 0x220   :  { %495 = vst.msk [vmem:[%s964_s4 + $0x50] sm:$0xff] %vm484_vm1, %v455_v63 }
 0x223   :  { %v553_v2 = vpop.f32.mrb[4].mxu0 }
 0x224   :  { %490 = vst.msk [vmem:[%s964_s4 + $0x28] sm:$0xff] %vm484_vm1, %v553_v2  ;;  %v425_v3 = vpop.f32.mrb[5].mxu0 }
 0x225   :  { %489 = vst.msk [vmem:[%s964_s4 + $0x20] sm:$0xff] %vm484_vm1, %v425_v3 }
 0x226   :  { %v565_v4 = vpop.f32.mrb[4].mxu1 }
 0x227   :  { %498 = vst.msk [vmem:[%s964_s4 + $0x68] sm:$0xff] %vm484_vm1, %v565_v4  ;;  %v465_v45 = vpop.f32.mrb[5].mxu1 }
 0x228   :  { %497 = vst.msk [vmem:[%s964_s4 + $0x60] sm:$0xff] %vm484_vm1, %v465_v45 }
 0x22b   :  { %v556_v5 = vpop.f32.mrb[6].mxu0 }
 0x22c   :  { %492 = vst.msk [vmem:[%s964_s4 + $0x38] sm:$0xff] %vm484_vm1, %v556_v5  ;;  %v435_v6 = vpop.f32.mrb[7].mxu0 }
 0x22d   :  { %491 = vst.msk [vmem:[%s964_s4 + $0x30] sm:$0xff] %vm484_vm1, %v435_v6 }
 0x22e   :  { %v568_v7 = vpop.f32.mrb[6].mxu1 }
 0x22f   :  { %500 = vst.msk [vmem:[%s964_s4 + $0x78] sm:$0xff] %vm484_vm1, %v568_v7  ;;  %v475_v8 = vpop.f32.mrb[7].mxu1 }
 0x230   :  { %499 = vst.msk [vmem:[%s964_s4 + $0x70] sm:$0xff] %vm484_vm1, %v475_v8 }

// kernel: transformer_block_forward.13
= control target key start
LH: loop header
LB: loop body
LE: loop exit
PB: predicated region body
PF: predicated region fallthrough
CT: control target
= control target key end

     0   :  { %s616_s16 = smov 86   ;;  %s895_s0 = inlined_call_operand.vmem [shape: f32[128,84], index: 0, kind: input, shape index: {}]   ;;  %s896_s1 = inlined_call_operand.vmem [shape: f32[42,16], index: 1, kind: input, shape index: {}]   ;;  %s897_s2 = inlined_call_operand.vmem [shape: f32[128,16], index: 2, kind: input, shape index: {}]   ;;  %s898_s3 = inlined_call_operand.hbm [shape: f32[128,16], index: 3, kind: output, shape index: {}]  }
   0x1   :  { %v644_v0 = vld [vmem:[%s895_s0 + $0x8] sm:$0xff]  ;;  %v649_v1 = vld [vmem:[%s895_s0] sm:$0xff]  ;;  %v672_v4 = vld [vmem:[%s895_s0 + $0x50] sm:$0xff] }
   0x2   :  { %129 = vrot.lane.b32.xlu1 %v644_v0, %s616_s16  ;;  %127 = vrot.lane.b32.xlu0 %v649_v1, %s616_s16  ;;  %v658_v2 = vld [vmem:[%s895_s0 + $0x48] sm:$0xff]  ;;  %v663_v3 = vld [vmem:[%s895_s0 + $0x40] sm:$0xff] }
   0x3   :  { %v677_v5 = vld [vmem:[%s895_s0 + $0x10] sm:$0xff]  ;;  %v191_v6 = vld [vmem:[%s896_s1] sm:$0xff]  ;;  %v689_v7 = vld [vmem:[%s895_s0 + $0x58] sm:$0xff] }
   0x4   :  { %v694_v8 = vld [vmem:[%s895_s0 + $0x18] sm:$0xff]  ;;  %v192_v9 = vld [vmem:[%s896_s1 + $0x8] sm:$0xff]  ;;  %v193_v11 = vld [vmem:[%s896_s1 + $0x10] sm:$0xff] }
   0x5   :  { %v535_v10 = vpack.c.bf16 %v192_v9, %v191_v6  ;;  %v194_v12 = vld [vmem:[%s896_s1 + $0x18] sm:$0xff] }
   0x6   :  { %145 = vrot.lane.b32.xlu1 %v658_v2, %s616_s16  ;;  %143 = vrot.lane.b32.xlu0 %v663_v3, %s616_s16  ;;  %v539_v13 = vpack.c.bf16 %v194_v12, %v193_v11 }
   0xa   :  { %147 = vrot.lane.b32.xlu1 %v672_v4, %s616_s16  ;;  %131 = vrot.lane.b32.xlu0 %v677_v5, %s616_s16 }
   0xb   :  { %8 = vsyncpa [#allocation3], 0  ;;  %v195_v14 = vld [vmem:[%s896_s1 + $0x20] sm:$0xff]  ;;  %v196_v15 = vld [vmem:[%s896_s1 + $0x28] sm:$0x3]  ;;  %536 = vmatprep.subr.bf16.mxu0 %v535_v10  ;;  %549 = vmatprep.subr.bf16.mxu1 %v535_v10  ;;  %vm246_vm0 = vcmask 1041408  }
   0xc   :  { %v718_v16 = vld [vmem:[%s895_s0 + $0x60] sm:$0xff]  ;;  %538 = vmatpush3.bf16.msra.mxu0 %v535_v10  ;;  %552 = vmatpush3.bf16.msra.mxu1 %v535_v10  ;;  %v543_v18 = vpack.c.bf16 %v196_v15, %v195_v14  ;;  %vm617_vm1 = vmmov 1   ;;  %v732_v19 = vld [vmem:[%s895_s0 + $0x68] sm:$0xff]  ;;  %v746_v21 = vld [vmem:[%s895_s0 + $0x70] sm:$0xff]  ;;  %v48_v25 = vmul.f32 0.70710677, %v644_v0 }
   0xd   :  { %v723_v17 = vld [vmem:[%s895_s0 + $0x20] sm:$0xff]  ;;  %540 = vmatprep.subr.bf16.mxu0 %v539_v13  ;;  %550 = vmatprep.subr.bf16.mxu1 %v539_v13  ;;  %vm544_vm2 = vmpackc.low %vm246_vm0, %vm617_vm1  ;;  %v737_v20 = vld [vmem:[%s895_s0 + $0x28] sm:$0xff]  ;;  %v47_v26 = vmul.f32 0.70710677, %v649_v1  ;;  %v56_v27 = vmul.f32 0.70710677, %v658_v2 }
   0xe   :  { %149 = vrot.lane.b32.xlu1 %v689_v7, %s616_s16  ;;  %133 = vrot.lane.b32.xlu0 %v694_v8, %s616_s16  ;;  %v751_v22 = vld [vmem:[%s895_s0 + $0x30] sm:$0xff]  ;;  %v760_v23 = vld [vmem:[%s895_s0 + $0x78] sm:$0xff]  ;;  %560 = verf.f32 %v48_v25  ;;  %v55_v28 = vmul.f32 0.70710677, %v663_v3  ;;  %v57_v29 = vmul.f32 0.70710677, %v672_v4 }
   0xf   :  { %v765_v24 = vld [vmem:[%s895_s0 + $0x38] sm:$0xff]  ;;  %562 = verf.f32 %v47_v26  ;;  %v49_v30 = vmul.f32 0.70710677, %v677_v5  ;;  %v58_v31 = vmul.f32 0.70710677, %v689_v7  ;;  %v32_v38 = vmul.f32 0.5, %v644_v0 }
  0x10   :  { %542 = vmatpush3.bf16.msra.mxu0 %v539_v13  ;;  %553 = vmatpush3.bf16.msra.mxu1 %v539_v13  ;;  %564 = verf.f32 %v56_v27  ;;  %v50_v32 = vmul.f32 0.70710677, %v694_v8  ;;  %v59_v35 = vmul.f32 0.70710677, %v718_v16  ;;  %v51_v36 = vmul.f32 0.70710677, %v723_v17 }
  0x11   :  { %545 = vmatprep.subr.msk.bf16.mxu0 %vm544_vm2, %v543_v18  ;;  %551 = vmatprep.subr.msk.bf16.mxu1 %vm544_vm2, %v543_v18  ;;  %566 = verf.f32 %v55_v28  ;;  %v31_v39 = vmul.f32 0.5, %v649_v1  ;;  %v60_v43 = vmul.f32 0.70710677, %v732_v19  ;;  %v40_v44 = vmul.f32 0.5, %v658_v2  ;;  %s618_s29 = smov [#allocation2]  }
  0x12   :  { %151 = vrot.lane.b32.xlu1 %v718_v16, %s616_s16  ;;  %135 = vrot.lane.b32.xlu0 %v723_v17, %s616_s16  ;;  %568 = verf.f32 %v57_v29  ;;  %v52_v45 = vmul.f32 0.70710677, %v737_v20  ;;  %v39_v48 = vmul.f32 0.5, %v663_v3  ;;  %v41_v53 = vmul.f32 0.5, %v672_v4  ;;  %s449_s0 = sshll.u32 %s618_s29, 4  ;;  %s450_s0 = int_to_ptr.vmem [resolvable:$true] %s449_s0 }
  0x13   :  { %570 = verf.f32 %v49_v30  ;;  %v33_v54 = vmul.f32 0.5, %v677_v5  ;;  %v61_v55 = vmul.f32 0.70710677, %v746_v21  ;;  %v53_v56 = vmul.f32 0.70710677, %v751_v22  ;;  %s592_s6 = scalar_lea.vmem %s450_s0, 2048  ;;  %p597_p1 = scmp.lt.s32.totalorder %s450_s0, %s450_s0 }
  0x14   :  { %548 = vmatpush3.bf16.msk.msra.mxu0 %vm544_vm2, %v543_v18  ;;  %554 = vmatpush3.bf16.msk.msra.mxu1 %vm544_vm2, %v543_v18  ;;  %572 = verf.f32 %v58_v31  ;;  %vm197_vm3 = vcmask 343040   ;;  %v42_v3 = vmul.f32 0.5, %v689_v7  ;;  %v34_v4 = vmul.f32 0.5, %v694_v8  ;;  %p593_p0 = scmp.ne.s32.totalorder %s450_s0, %s592_s6  ;;  %p598_p2 = scmp.lt.s32.totalorder %s592_s6, %s592_s6 }
  0x15   :  { %574 = verf.f32 %v50_v32  ;;  %v62_v5 = vmul.f32 0.70710677, %v760_v23  ;;  %v54_v6 = vmul.f32 0.70710677, %v765_v24  ;;  %v43_v25 = vmul.f32 0.5, %v718_v16 }
  0x16   :  { %153 = vrot.lane.b32.xlu1 %v732_v19, %s616_s16  ;;  %137 = vrot.lane.b32.xlu0 %v737_v20, %s616_s16  ;;  %576 = verf.f32 %v59_v35  ;;  %v35_v26 = vmul.f32 0.5, %v723_v17  ;;  %v44_v16 = vmul.f32 0.5, %v732_v19  ;;  %v36_v17 = vmul.f32 0.5, %v737_v20  ;;  %p599_p3 = por %p598_p2, %p597_p1 }
  0x17   :  { %578 = verf.f32 %v51_v36  ;;  %v37_v19 = vmul.f32 0.5, %v751_v22  ;;  %vm427_vm4 = vcmask 130048  }
  0x18   :  { %v561_v33 = vpop.eup %560  ;;  %580 = verf.f32 %v60_v43  ;;  %p600_p4 = pnand %p599_p3, %p593_p0 }
  0x19   :  { %v563_v34 = vpop.eup %562  ;;  %v80_v40 = vadd.f32 1.0, %v561_v33  ;;  %582 = verf.f32 %v52_v45 }
  0x1a   :  { %155 = vrot.lane.b32.xlu1 %v746_v21, %s616_s16  ;;  %139 = vrot.lane.b32.xlu0 %v751_v22, %s616_s16  ;;  %v565_v37 = vpop.eup %564  ;;  %v79_v41 = vadd.f32 1.0, %v563_v34  ;;  %584 = verf.f32 %v61_v55 }
  0x1b   :  { %v567_v42 = vpop.eup %566  ;;  %v88_v46 = vadd.f32 1.0, %v565_v37  ;;  %v96_v49 = vmul.f32 %v80_v40, %v32_v38  ;;  %586 = verf.f32 %v53_v56 }
  0x1c   :  { %v569_v47 = vpop.eup %568  ;;  %v95_v50 = vmul.f32 %v79_v41, %v31_v39  ;;  %v87_v51 = vadd.f32 1.0, %v567_v42  ;;  %588 = verf.f32 %v62_v5 }
  0x1d   :  { %v571_v52 = vpop.eup %570  ;;  %v104_v59 = vmul.f32 %v88_v46, %v40_v44  ;;  %v89_v60 = vadd.f32 1.0, %v569_v47  ;;  %590 = verf.f32 %v54_v6  ;;  %v45_v47 = vmul.f32 0.5, %v746_v21 }
  0x1e   :  { %157 = vrot.lane.b32.xlu1 %v760_v23, %s616_s16  ;;  %141 = vrot.lane.b32.xlu0 %v765_v24, %s616_s16  ;;  %v573_v61 = vpop.eup %572  ;;  %v103_v0 = vmul.f32 %v87_v51, %v39_v48  ;;  %v81_v1 = vadd.f32 1.0, %v571_v52  ;;  %v38_v21 = vmul.f32 0.5, %v765_v24 }
  0x1f   :  { %v575_v2 = vpop.eup %574  ;;  %v105_v11 = vmul.f32 %v89_v60, %v41_v53  ;;  %v90_v12 = vadd.f32 1.0, %v573_v61 }
  0x20   :  { %v577_v13 = vpop.eup %576  ;;  %v97_v7 = vmul.f32 %v81_v1, %v33_v54  ;;  %v82_v18 = vadd.f32 1.0, %v575_v2 }
  0x21   :  { %v579_v8 = vpop.eup %578  ;;  %v106_v29 = vmul.f32 %v90_v12, %v42_v3  ;;  %v91_v30 = vadd.f32 1.0, %v577_v13  ;;  %v395_v12 = vld [vmem:[%s897_s2] sm:$0xff] }
  0x22   :  { %v581_v31 = vpop.eup %580  ;;  %v98_v34 = vmul.f32 %v82_v18, %v34_v4  ;;  %v83_v35 = vadd.f32 1.0, %v579_v8  ;;  %v404_v18 = vld [vmem:[%s897_s2 + $0x48] sm:$0xff]  ;;  %v403_v8 = vld [vmem:[%s897_s2 + $0x40] sm:$0xff] }
  0x23   :  { %v583_v36 = vpop.eup %582  ;;  %v107_v39 = vmul.f32 %v91_v30, %v43_v25  ;;  %v92_v40 = vadd.f32 1.0, %v581_v31  ;;  %v406_v30 = vld [vmem:[%s897_s2 + $0x58] sm:$0xff]  ;;  %v397_v31 = vld [vmem:[%s897_s2 + $0x10] sm:$0xff] }
  0x24   :  { %v585_v41 = vpop.eup %584  ;;  %v99_v44 = vmul.f32 %v83_v35, %v35_v26  ;;  %v84_v45 = vadd.f32 1.0, %v583_v36 }
  0x25   :  { %v587_v46 = vpop.eup %586 }
  0x26   :  { %v589_v51 = vpop.eup %588  ;;  %v100_v54 = vmul.f32 %v84_v45, %v36_v17  ;;  %v85_v55 = vadd.f32 1.0, %v587_v46 }
  0x27   :  { %v591_v56 = vpop.eup %590  ;;  %v94_v60 = vadd.f32 1.0, %v589_v51  ;;  %v401_v51 = vld [vmem:[%s897_s2 + $0x30] sm:$0xff] }
  0x74   :  { %v130_v57 = vpop.permute.xlu1 %129  ;;  %v128_v58 = vpop.permute.xlu0 %127 }
  0x75   :  { %v176_v62 = vmul.f32 %v130_v57, %v96_v49  ;;  %v175_v63 = vmul.f32 %v128_v58, %v95_v50  ;;  %v108_v49 = vmul.f32 %v92_v40, %v44_v16  ;;  %v93_v50 = vadd.f32 1.0, %v585_v41  ;;  %v408_v40 = vld [vmem:[%s897_s2 + $0x68] sm:$0xff]  ;;  %v399_v41 = vld [vmem:[%s897_s2 + $0x20] sm:$0xff] }
  0x76   :  { %v46_v57 = vmul.f32 0.5, %v760_v23 }
  0x77   :  { %511 = vmatprep.mubr.msk.f32.mxu0 %vm197_vm3, %v175_v63  ;;  %v101_v63 = vmul.f32 %v85_v55, %v37_v19 }
  0x78   :  { %v146_v9 = vpop.permute.xlu1 %145  ;;  %v144_v10 = vpop.permute.xlu0 %143  ;;  %512 = vmatmul.mubr.msk.f32.vlgmr.msra.gmra.mrb[0].mxu0 %vm197_vm3, %v176_v62  ;;  %v110_v5 = vmul.f32 %v94_v60, %v46_v57 }
  0x79   :  { %v184_v14 = vmul.f32 %v146_v9, %v104_v59  ;;  %v183_v15 = vmul.f32 %v144_v10, %v103_v0  ;;  %v109_v59 = vmul.f32 %v93_v50, %v45_v47  ;;  %v86_v0 = vadd.f32 1.0, %v591_v56  ;;  %v410_v50 = vld [vmem:[%s897_s2 + $0x78] sm:$0xff] }
  0x7b   :  { %523 = vmatprep.mubr.msk.f32.mxu1 %vm197_vm3, %v183_v15  ;;  %v102_v23 = vmul.f32 %v86_v0, %v38_v21 }
  0x7c   :  { %v148_v27 = vpop.permute.xlu1 %147  ;;  %524 = vmatmul.mubr.msk.f32.vlgmr.msra.gmra.mrb[0].mxu1 %vm197_vm3, %v184_v14  ;;  %v132_v28 = vpop.permute.xlu0 %131 }
  0x7d   :  { %v185_v32 = vmul.f32 %v148_v27, %v105_v11  ;;  %v177_v33 = vmul.f32 %v132_v28, %v97_v7  ;;  %v396_v11 = vld [vmem:[%s897_s2 + $0x8] sm:$0xff] }
  0x7f   :  { %514 = vmatprep.mubr.msk.f32.mxu0 %vm197_vm3, %v177_v33  ;;  %526 = vmatprep.mubr.msk.f32.mxu1 %vm197_vm3, %v185_v32  ;;  %v405_v32 = vld [vmem:[%s897_s2 + $0x50] sm:$0xff] }
  0x80   :  { %v150_v37 = vpop.permute.xlu1 %149  ;;  %v134_v38 = vpop.permute.xlu0 %133 }
  0x81   :  { %v186_v42 = vmul.f32 %v150_v37, %v106_v29  ;;  %v178_v43 = vmul.f32 %v134_v38, %v98_v34  ;;  %v398_v29 = vld [vmem:[%s897_s2 + $0x18] sm:$0xff] }
  0x83   :  { %515 = vmatmul.mubr.msk.f32.gmra.mrb[2].mxu0 %vm197_vm3, %v178_v43  ;;  %527 = vmatmul.mubr.msk.f32.gmra.mrb[2].mxu1 %vm197_vm3, %v186_v42  ;;  %v407_v42 = vld [vmem:[%s897_s2 + $0x60] sm:$0xff] }
  0x84   :  { %v152_v48 = vpop.permute.xlu1 %151  ;;  %v136_v20 = vpop.permute.xlu0 %135 }
  0x85   :  { %v187_v52 = vmul.f32 %v152_v48, %v107_v39  ;;  %v179_v53 = vmul.f32 %v136_v20, %v99_v44  ;;  %v400_v39 = vld [vmem:[%s897_s2 + $0x28] sm:$0xff] }
  0x87   :  { %517 = vmatprep.mubr.msk.f32.mxu0 %vm197_vm3, %v179_v53  ;;  %529 = vmatprep.mubr.msk.f32.mxu1 %vm197_vm3, %v187_v52  ;;  %v409_v52 = vld [vmem:[%s897_s2 + $0x70] sm:$0xff] }
  0x88   :  { %v154_v58 = vpop.permute.xlu1 %153  ;;  %v138_v22 = vpop.permute.xlu0 %137 }
  0x89   :  { %v188_v61 = vmul.f32 %v154_v58, %v108_v49  ;;  %v180_v62 = vmul.f32 %v138_v22, %v100_v54  ;;  %v402_v49 = vld [vmem:[%s897_s2 + $0x38] sm:$0xff] }
  0x8b   :  { %518 = vmatmul.mubr.msk.f32.gmra.mrb[4].mxu0 %vm197_vm3, %v180_v62  ;;  %530 = vmatmul.mubr.msk.f32.gmra.mrb[4].mxu1 %vm197_vm3, %v188_v61 }
  0x8c   :  { %v156_v1 = vpop.permute.xlu1 %155  ;;  %v140_v2 = vpop.permute.xlu0 %139 }
  0x8d   :  { %v189_v3 = vmul.f32 %v156_v1, %v109_v59  ;;  %v181_v4 = vmul.f32 %v140_v2, %v101_v63 }
  0x8f   :  { %520 = vmatprep.mubr.msk.f32.mxu0 %vm197_vm3, %v181_v4  ;;  %532 = vmatprep.mubr.msk.f32.mxu1 %vm197_vm3, %v189_v3 }
  0x90   :  { %v158_v24 = vpop.permute.xlu1 %157  ;;  %v142_v6 = vpop.permute.xlu0 %141 }
  0x91   :  { %v190_v9 = vmul.f32 %v158_v24, %v110_v5  ;;  %v182_v10 = vmul.f32 %v142_v6, %v102_v23 }
  0x93   :  { %521 = vmatmul.mubr.msk.f32.gmra.mrb[6].mxu0 %vm197_vm3, %v182_v10  ;;  %533 = vmatmul.mubr.msk.f32.gmra.mrb[6].mxu1 %vm197_vm3, %v190_v9 }
 0x14b   :  { %v513_v13 = vpop.f32.mrb[0].mxu0 }
 0x14c   :  { %v412_v14 = vadd.f32 %v513_v13, %v396_v11  ;;  %v316_v15 = vpop.f32.mrb[1].mxu0 }
 0x14d   :  { %v411_v7 = vadd.f32 %v395_v12, %v316_v15 }
 0x14e   :  { %429 = vst.msk [vmem:[#allocation2 + $0x8] sm:$0xff] %vm427_vm4, %v412_v14 }
 0x14f   :  { %428 = vst.msk [vmem:[#allocation2] sm:$0xff] %vm427_vm4, %v411_v7  ;;  %v525_v25 = vpop.f32.mrb[0].mxu1 }
 0x150   :  { %v420_v26 = vadd.f32 %v525_v25, %v404_v18  ;;  %v356_v27 = vpop.f32.mrb[1].mxu1 }
 0x151   :  { %v419_v28 = vadd.f32 %v403_v8, %v356_v27 }
 0x152   :  { %437 = vst.msk [vmem:[#allocation2 + $0x48] sm:$0xff] %vm427_vm4, %v420_v26 }
 0x153   :  { %436 = vst.msk [vmem:[#allocation2 + $0x40] sm:$0xff] %vm427_vm4, %v419_v28 }
 0x156   :  { %v516_v33 = vpop.f32.mrb[2].mxu0  ;;  %v528_v34 = vpop.f32.mrb[2].mxu1 }
 0x157   :  { %v414_v35 = vadd.f32 %v516_v33, %v398_v29  ;;  %v422_v36 = vadd.f32 %v528_v34, %v406_v30  ;;  %v326_v16 = vpop.f32.mrb[3].mxu0  ;;  %v366_v17 = vpop.f32.mrb[3].mxu1 }
 0x158   :  { %v413_v37 = vadd.f32 %v397_v31, %v326_v16  ;;  %v421_v38 = vadd.f32 %v405_v32, %v366_v17 }
 0x159   :  { %431 = vst.msk [vmem:[#allocation2 + $0x18] sm:$0xff] %vm427_vm4, %v414_v35  ;;  %439 = vst.msk [vmem:[#allocation2 + $0x58] sm:$0xff] %vm427_vm4, %v422_v36 }
 0x15a   :  { %430 = vst.msk [vmem:[#allocation2 + $0x10] sm:$0xff] %vm427_vm4, %v413_v37  ;;  %438 = vst.msk [vmem:[#allocation2 + $0x50] sm:$0xff] %vm427_vm4, %v421_v38 }
 0x15e   :  { %v519_v43 = vpop.f32.mrb[4].mxu0  ;;  %v531_v44 = vpop.f32.mrb[4].mxu1 }
 0x15f   :  { %v416_v45 = vadd.f32 %v519_v43, %v400_v39  ;;  %v424_v46 = vadd.f32 %v531_v44, %v408_v40  ;;  %v336_v47 = vpop.f32.mrb[5].mxu0  ;;  %v376_v19 = vpop.f32.mrb[5].mxu1 }
 0x160   :  { %v415_v48 = vadd.f32 %v399_v41, %v336_v47  ;;  %v423_v20 = vadd.f32 %v407_v42, %v376_v19 }
 0x161   :  { %433 = vst.msk [vmem:[#allocation2 + $0x28] sm:$0xff] %vm427_vm4, %v416_v45  ;;  %441 = vst.msk [vmem:[#allocation2 + $0x68] sm:$0xff] %vm427_vm4, %v424_v46 }
 0x162   :  { %432 = vst.msk [vmem:[#allocation2 + $0x20] sm:$0xff] %vm427_vm4, %v415_v48  ;;  %440 = vst.msk [vmem:[#allocation2 + $0x60] sm:$0xff] %vm427_vm4, %v423_v20 }
 0x166   :  { %v522_v53 = vpop.f32.mrb[6].mxu0  ;;  %v534_v54 = vpop.f32.mrb[6].mxu1 }
 0x167   :  { %v418_v55 = vadd.f32 %v522_v53, %v402_v49  ;;  %v426_v56 = vadd.f32 %v534_v54, %v410_v50  ;;  %v346_v57 = vpop.f32.mrb[7].mxu0  ;;  %v386_v21 = vpop.f32.mrb[7].mxu1 }
 0x168   :  { %v417_v58 = vadd.f32 %v401_v51, %v346_v57  ;;  %v425_v22 = vadd.f32 %v409_v52, %v386_v21 }
 0x169   :  { %435 = vst.msk [vmem:[#allocation2 + $0x38] sm:$0xff] %vm427_vm4, %v418_v55  ;;  %443 = vst.msk [vmem:[#allocation2 + $0x78] sm:$0xff] %vm427_vm4, %v426_v56 }
 0x16a   :  { %434 = vst.msk [vmem:[#allocation2 + $0x30] sm:$0xff] %vm427_vm4, %v417_v58  ;;  %442 = vst.msk [vmem:[#allocation2 + $0x70] sm:$0xff] %vm427_vm4, %v425_v22 }
 0x16b   :  { %603 = shalt.err (!%p600_p4)
}
 0x16c   :  { %s604_s8 = scalar_lea.hbm %s898_s3, 2048 }
 0x16d   :  { %p605_p5 = scmp.ne.s32.totalorder %s898_s3, %s604_s8  ;;  %p608_p6 = scmp.lt.u32.totalorder %s604_s8, %s898_s3 }
 0x16f   :  { %p610_p7 = pnand %p608_p6, %p605_p5 }
 0x171   :  { %613 = shalt.err (!%p610_p7)
}
 0x172   :  { %s619_s13 = smov 128   ;;  %s620_s14 = smov 8  }
 0x173   :  { %455 = dma.vmem_to_hbm [thread:$0]  %s450_s0, 2048, %s898_s3, [#allocation3], %s619_s13, %s619_s13, %s620_s14  }
 0x174   :  { %614 = dma.done.wait [#allocation3], 2048  }
 0x175   :  { %615 = vsyncadd [#allocation3], 4294965248 }
 0x176   :  { %459 = vsyncpa [#allocation3], 1 }

// kernel: transformer_block_forward.12
= control target key start
LH: loop header
LB: loop body
LE: loop exit
PB: predicated region body
PF: predicated region fallthrough
CT: control target
= control target key end

     0   :  { %s833_s9 = smov 0   ;;  %s1222_s0 = inlined_call_operand.vmem [shape: f32[2,8,8,84], index: 0, kind: input, shape index: {}]   ;;  %s1223_s1 = inlined_call_operand.vmem [shape: f32[3,3,84], index: 1, kind: input, shape index: {}]   ;;  %s1224_s2 = inlined_call_operand.vmem [shape: f32[2,8,8,84], index: 2, kind: output, shape index: {}]  }
   0x1 LB: > { %s787_s10 = sadd.s32 4294967295, %s815_s9   ;;  %p791_p0 = scmp.ge.s32.totalorder %s815_s9, 1  ;;  %s815_s9 = sphi %s833_s9, %s12_s9  }
   0x2   : > { %p112_p1 = scmp.lt.s32.totalorder %s815_s9, 3 }
   0x4   : > { %p113_p2 = pnand %p791_p0, %p112_p1 }
   0x5   : > { %vm144_vm0 = vcmask (!%p113_p2), 687104   ;;  %vm146_vm1 = vcmask (!%p113_p2), 680960   ;;  %p843_p3 = scmp.lt.s32.totalorder (!%p113_p2), %s787_s10, 1  ;;  %v206_v0 = vlaneseq (!%p113_p2)  ;;  %v817_v1 = vmov (!%p113_p2), 0.0   ;;  %v203_v3 = vld [vmem:[%s1223_s1] sm:$0x7] (!%p113_p2) }
   0x6   : > { %116 = sbr.rel (%p113_p2) target bundleno = 114 (0x72), region = 28  ;;  %145 = vst.msk [vmem:[#allocation2] sm:$0xff] (!%p113_p2), %vm144_vm0, %v817_v1  ;;  %148 = vst.msk [vmem:[#allocation2 + $0x10] sm:$0xff] (!%p113_p2), %vm144_vm0, %v817_v1  ;;  %v204_v7 = vld [vmem:[%s1223_s1 + $0x4] sm:$0x7] (!%p113_p2)  ;;  %vm262_vm2 = vcmask (!%p113_p2), 1046528  }
   0x7   : > { %150 = vst.msk [vmem:[#allocation2 + $0x20] sm:$0xff] (!%p113_p2), %vm144_vm0, %v817_v1  ;;  %152 = vst.msk [vmem:[#allocation2 + $0x30] sm:$0xff] (!%p113_p2), %vm144_vm0, %v817_v1  ;;  %v207_v2 = vshrl.u32 (!%p113_p2), %v206_v0, 7  ;;  %v205_v21 = vld [vmem:[%s1223_s1 + $0x8] sm:$0x7] (!%p113_p2)  ;;  %vm339_vm3 = vcmask (!%p113_p2), 1045504  }
   0x8   : > { %154 = vst.msk [vmem:[#allocation2 + $0x40] sm:$0xff] (!%p113_p2), %vm144_vm0, %v817_v1  ;;  %156 = vst.msk [vmem:[#allocation2 + $0x50] sm:$0xff] (!%p113_p2), %vm144_vm0, %v817_v1 }
   0x9   : > { %158 = vst.msk [vmem:[#allocation2 + $0x60] sm:$0xff] (!%p113_p2), %vm144_vm0, %v817_v1  ;;  %160 = vst.msk [vmem:[#allocation2 + $0x70] sm:$0xff] (!%p113_p2), %vm144_vm0, %v817_v1  ;;  %v208_v4 = vsub.s32 (!%p113_p2), 0, %v207_v2  ;;  %v228_v5 = vsub.s32 (!%p113_p2), 1, %v207_v2  ;;  %v305_v6 = vsub.s32 (!%p113_p2), 2, %v207_v2 }
   0xa   : > { %162 = vst.msk [vmem:[#allocation2 + $0x80] sm:$0xff] (!%p113_p2), %vm144_vm0, %v817_v1  ;;  %164 = vst.msk [vmem:[#allocation2 + $0x90] sm:$0xff] (!%p113_p2), %vm144_vm0, %v817_v1 }
   0xb   : > { %147 = vst.msk [vmem:[#allocation2 + $0x8] sm:$0x3] (!%p113_p2), %vm146_vm1, %v817_v1  ;;  %149 = vst.msk [vmem:[#allocation2 + $0x18] sm:$0x3] (!%p113_p2), %vm146_vm1, %v817_v1  ;;  %v885_v11 = vrot.slane (!%p113_p2), %v203_v3, %v228_v5  ;;  %v887_v12 = vrot.slane (!%p113_p2), %v203_v3, %v305_v6  ;;  %v892_v16 = vrot.slane (!%p113_p2), %v203_v3, %v208_v4 }
   0xc   : > { %151 = vst.msk [vmem:[#allocation2 + $0x28] sm:$0x3] (!%p113_p2), %vm146_vm1, %v817_v1  ;;  %153 = vst.msk [vmem:[#allocation2 + $0x38] sm:$0x3] (!%p113_p2), %vm146_vm1, %v817_v1  ;;  %v906_v26 = vrot.slane (!%p113_p2), %v204_v7, %v208_v4  ;;  %v909_v30 = vrot.slane (!%p113_p2), %v204_v7, %v228_v5  ;;  %v911_v33 = vrot.slane (!%p113_p2), %v204_v7, %v305_v6 }
   0xd   : > { %155 = vst.msk [vmem:[#allocation2 + $0x48] sm:$0x3] %vm146_vm1, %v817_v1  ;;  %157 = vst.msk [vmem:[#allocation2 + $0x58] sm:$0x3] %vm146_vm1, %v817_v1  ;;  %s1227_s10 = smov (!%p843_p3, %s787_s10), 1  ;;  %v183_v19 = vld [vmem:[#allocation2] sm:$0xff]  ;;  %v913_v34 = vrot.slane %v205_v21, %v228_v5  ;;  %v919_v40 = vrot.slane %v205_v21, %v305_v6  ;;  %v928_v48 = vrot.slane %v205_v21, %v208_v4 }
   0xe   : > { %159 = vst.msk [vmem:[#allocation2 + $0x68] sm:$0x3] %vm146_vm1, %v817_v1  ;;  %161 = vst.msk [vmem:[#allocation2 + $0x78] sm:$0x3] %vm146_vm1, %v817_v1  ;;  %s798_s14 = sshll.u32 %s1227_s10, 6  ;;  %v230_v22 = vmul.f32 %v885_v11, %v183_v19  ;;  %v307_v23 = vmul.f32 %v887_v12, %v183_v19  ;;  %v210_v27 = vmul.f32 %v892_v16, %v183_v19 }
   0xf   : > { %163 = vst.msk [vmem:[#allocation2 + $0x88] sm:$0x3] %vm146_vm1, %v817_v1  ;;  %165 = vst.msk [vmem:[#allocation2 + $0x98] sm:$0x3] %vm146_vm1, %v817_v1  ;;  %s138_s17 = scalar_lea.vmem %s1222_s0, %s798_s14  ;;  %s971_s24 = scalar_lea.vmem %s1224_s2, %s798_s14 }
  0x10   : > { %v166_v8 = vld [vmem:[%s138_s17] sm:$0xff]  ;;  %v167_v9 = vld [vmem:[%s138_s17 + $0x8] sm:$0xff]  ;;  %v168_v10 = vld [vmem:[%s138_s17 + $0x10] sm:$0xff]  ;;  %v263_v28 = vrot.slane %v230_v22, 1  ;;  %v340_v29 = vrot.slane %v307_v23, 2 }
  0x11   : > { %175 = vst.msk [vmem:[#allocation2 + $0x11] sm:$0xff] %vm144_vm0, %v166_v8  ;;  %176 = vst.msk [vmem:[#allocation2 + $0x21] sm:$0xff] %vm144_vm0, %v167_v9  ;;  %v169_v13 = vld [vmem:[%s138_s17 + $0x18] sm:$0xff]  ;;  %v170_v14 = vld [vmem:[%s138_s17 + $0x20] sm:$0xff] }
  0x12   : > { %177 = vst.msk [vmem:[#allocation2 + $0x31] sm:$0xff] %vm144_vm0, %v168_v10  ;;  %v171_v15 = vld [vmem:[%s138_s17 + $0x28] sm:$0xff]  ;;  %178 = vst.msk [vmem:[#allocation2 + $0x41] sm:$0xff] %vm144_vm0, %v169_v13  ;;  %v172_v17 = vld [vmem:[%s138_s17 + $0x30] sm:$0xff] }
  0x13   : > { %179 = vst.msk [vmem:[#allocation2 + $0x51] sm:$0xff] %vm144_vm0, %v170_v14  ;;  %180 = vst.msk [vmem:[#allocation2 + $0x61] sm:$0xff] %vm144_vm0, %v171_v15  ;;  %v173_v18 = vld [vmem:[%s138_s17 + $0x38] sm:$0xff]  ;;  %v184_v20 = vld [vmem:[#allocation2 + $0x8] sm:$0x3] }
  0x14   : > { %181 = vst.msk [vmem:[#allocation2 + $0x71] sm:$0xff] %vm144_vm0, %v172_v17  ;;  %182 = vst.msk [vmem:[#allocation2 + $0x81] sm:$0xff] %vm144_vm0, %v173_v18  ;;  %v231_v24 = vmul.f32 %v885_v11, %v184_v20  ;;  %v308_v25 = vmul.f32 %v887_v12, %v184_v20 }
  0x16   : > { %v264_v31 = vrot.slane %v231_v24, 1  ;;  %v341_v32 = vrot.slane %v308_v25, 2 }
  0x18   : > { %v185_v35 = vld [vmem:[#allocation2 + $0x10] sm:$0xff]  ;;  %v186_v36 = vld [vmem:[#allocation2 + $0x18] sm:$0x3]  ;;  %v915_v37 = vld [vmem:[#allocation2 + $0x20] sm:$0xff]  ;;  %v265_v38 = vsel %vm262_vm2, %v263_v28, %v264_v31  ;;  %v342_v39 = vsel %vm339_vm3, %v340_v29, %v341_v32 }
  0x19   : > { %v921_v41 = vld [vmem:[#allocation2 + $0x28] sm:$0x3]  ;;  %v295_v42 = vadd.f32 %v265_v38, %v210_v27  ;;  %v384_v43 = vmul.f32 %v906_v26, %v185_v35  ;;  %v404_v44 = vmul.f32 %v909_v30, %v185_v35  ;;  %v405_v45 = vmul.f32 %v909_v30, %v186_v36  ;;  %v950_v15 = vld [vmem:[#allocation2 + $0x30] sm:$0xff]  ;;  %v956_v22 = vld [vmem:[#allocation2 + $0x38] sm:$0x3] }
  0x1a   : > { %v480_v46 = vmul.f32 %v911_v33, %v185_v35  ;;  %v481_v47 = vmul.f32 %v911_v33, %v186_v36  ;;  %v576_v49 = vmul.f32 %v913_v34, %v915_v37  ;;  %v577_v53 = vmul.f32 %v913_v34, %v921_v41 }
  0x1b   : > { %v372_v50 = vadd.f32 %v342_v39, %v295_v42  ;;  %v436_v51 = vrot.slane %v404_v44, 1  ;;  %v437_v52 = vrot.slane %v405_v45, 1  ;;  %v652_v57 = vmul.f32 %v919_v40, %v915_v37 }
  0x1c   : > { %v512_v54 = vrot.slane %v480_v46, 2  ;;  %v513_v55 = vrot.slane %v481_v47, 2  ;;  %v608_v56 = vrot.slane %v576_v49, 1  ;;  %v609_v60 = vrot.slane %v577_v53, 1 }
  0x1d   : > { %v392_v58 = vadd.f32 %v384_v43, %v372_v50  ;;  %v438_v59 = vsel %vm262_vm2, %v436_v51, %v437_v52  ;;  %v653_v61 = vmul.f32 %v919_v40, %v921_v41  ;;  %v556_v63 = vmul.f32 %v928_v48, %v915_v37 }
  0x1e   : > { %v514_v62 = vsel %vm339_vm3, %v512_v54, %v513_v55  ;;  %v232_v0 = vmul.f32 %v885_v11, %v185_v35  ;;  %v684_v2 = vrot.slane %v652_v57, 2  ;;  %v211_v3 = vmul.f32 %v892_v16, %v185_v35 }
  0x1f   : > { %v468_v1 = vadd.f32 %v438_v59, %v392_v58  ;;  %v233_v4 = vmul.f32 %v885_v11, %v186_v36  ;;  %v610_v5 = vsel %vm262_vm2, %v608_v56, %v609_v60  ;;  %v309_v7 = vmul.f32 %v887_v12, %v185_v35 }
  0x20   : > { %v266_v6 = vrot.slane %v232_v0, 1  ;;  %v310_v8 = vmul.f32 %v887_v12, %v186_v36  ;;  %v685_v10 = vrot.slane %v653_v61, 2  ;;  %v406_v14 = vmul.f32 %v909_v30, %v915_v37 }
  0x21   : > { %v544_v9 = vadd.f32 %v514_v62, %v468_v1  ;;  %v267_v13 = vrot.slane %v233_v4, 1  ;;  %v343_v17 = vrot.slane %v309_v7, 2  ;;  %v407_v19 = vmul.f32 %v909_v30, %v921_v41  ;;  %v1003_v7 = vld [vmem:[#allocation2 + $0x48] sm:$0x3] }
  0x22   : > { %v344_v18 = vrot.slane %v310_v8, 2  ;;  %v482_v20 = vmul.f32 %v911_v33, %v915_v37  ;;  %v385_v24 = vmul.f32 %v906_v26, %v915_v37  ;;  %v483_v25 = vmul.f32 %v911_v33, %v921_v41 }
  0x23   : > { %v564_v21 = vadd.f32 %v556_v63, %v544_v9  ;;  %v268_v23 = vsel %vm262_vm2, %v266_v6, %v267_v13  ;;  %v439_v28 = vrot.slane %v406_v14, 1  ;;  %v440_v29 = vrot.slane %v407_v19, 1 }
  0x24   : > { %v296_v27 = vadd.f32 %v268_v23, %v211_v3  ;;  %v515_v31 = vrot.slane %v482_v20, 2  ;;  %v345_v35 = vsel %vm339_vm3, %v343_v17, %v344_v18  ;;  %v516_v36 = vrot.slane %v483_v25, 2  ;;  %v997_v3 = vld [vmem:[#allocation2 + $0x40] sm:$0xff] }
  0x25   : > { %v640_v32 = vadd.f32 %v610_v5, %v564_v21  ;;  %v578_v38 = vmul.f32 %v913_v34, %v950_v15  ;;  %v686_v39 = vsel %vm339_vm3, %v684_v2, %v685_v10  ;;  %v579_v43 = vmul.f32 %v913_v34, %v956_v22 }
  0x26   : > { %v373_v42 = vadd.f32 %v345_v35, %v296_v27  ;;  %v654_v44 = vmul.f32 %v919_v40, %v950_v15  ;;  %v557_v46 = vmul.f32 %v928_v48, %v950_v15  ;;  %v655_v49 = vmul.f32 %v919_v40, %v956_v22 }
  0x27   : > { %v716_v45 = vadd.f32 %v686_v39, %v640_v32  ;;  %v611_v47 = vrot.slane %v578_v38, 1  ;;  %v441_v51 = vsel %vm262_vm2, %v439_v28, %v440_v29  ;;  %v517_v52 = vsel %vm339_vm3, %v515_v31, %v516_v36 }
  0x28   : > { %v393_v50 = vadd.f32 %v385_v24, %v373_v42  ;;  %v612_v53 = vrot.slane %v579_v43, 1  ;;  %v687_v54 = vrot.slane %v654_v44, 2  ;;  %v234_v55 = vmul.f32 %v885_v11, %v915_v37 }
  0x29   : > { %724 = vst.msk [vmem:[%s971_s24] sm:$0xff] %vm144_vm0, %v716_v45  ;;  %v235_v56 = vmul.f32 %v885_v11, %v921_v41  ;;  %v311_v57 = vmul.f32 %v887_v12, %v915_v37  ;;  %v688_v59 = vrot.slane %v655_v49, 2  ;;  %v212_v60 = vmul.f32 %v892_v16, %v915_v37 }
  0x2a   : > { %v469_v58 = vadd.f32 %v441_v51, %v393_v50  ;;  %v312_v61 = vmul.f32 %v887_v12, %v921_v41  ;;  %v613_v62 = vsel %vm262_vm2, %v611_v47, %v612_v53  ;;  %v269_v63 = vrot.slane %v234_v55, 1 }
  0x2b   : > { %v270_v0 = vrot.slane %v235_v56, 1  ;;  %v346_v1 = vrot.slane %v311_v57, 2  ;;  %v408_v5 = vmul.f32 %v909_v30, %v950_v15  ;;  %v409_v6 = vmul.f32 %v909_v30, %v956_v22 }
  0x2c   : > { %v545_v2 = vadd.f32 %v517_v52, %v469_v58  ;;  %v347_v4 = vrot.slane %v312_v61, 2  ;;  %v386_v41 = vmul.f32 %v906_v26, %v950_v15  ;;  %v484_v8 = vmul.f32 %v911_v33, %v950_v15 }
  0x2d   : > { %v271_v37 = vsel %vm262_vm2, %v269_v63, %v270_v0  ;;  %v485_v9 = vmul.f32 %v911_v33, %v956_v22  ;;  %v442_v17 = vrot.slane %v408_v5, 1  ;;  %v443_v18 = vrot.slane %v409_v6, 1 }
  0x2e   : > { %v565_v10 = vadd.f32 %v557_v46, %v545_v2  ;;  %v297_v13 = vadd.f32 %v271_v37, %v212_v60  ;;  %v348_v14 = vsel %vm339_vm3, %v346_v1, %v347_v4  ;;  %v518_v19 = vrot.slane %v484_v8, 2  ;;  %v1043_v60 = vld [vmem:[#allocation2 + $0x58] sm:$0x3] }
  0x2f   : > { %v519_v20 = vrot.slane %v485_v9, 2  ;;  %v580_v21 = vmul.f32 %v913_v34, %v997_v3  ;;  %v581_v25 = vmul.f32 %v913_v34, %v1003_v7  ;;  %v656_v27 = vmul.f32 %v919_v40, %v997_v3 }
  0x30   : > { %v641_v23 = vadd.f32 %v613_v62, %v565_v10  ;;  %v374_v24 = vadd.f32 %v348_v14, %v297_v13  ;;  %v689_v28 = vsel %vm339_vm3, %v687_v54, %v688_v59  ;;  %v558_v29 = vmul.f32 %v928_v48, %v997_v3  ;;  %v1041_v59 = vld [vmem:[#allocation2 + $0x50] sm:$0xff] }
  0x31   : > { %v614_v31 = vrot.slane %v580_v21, 1  ;;  %v657_v32 = vmul.f32 %v919_v40, %v1003_v7  ;;  %v444_v38 = vsel %vm262_vm2, %v442_v17, %v443_v18  ;;  %v615_v39 = vrot.slane %v581_v25, 1 }
  0x32   : > { %v717_v35 = vadd.f32 %v689_v28, %v641_v23  ;;  %v394_v36 = vadd.f32 %v386_v41, %v374_v24  ;;  %v520_v42 = vsel %vm339_vm3, %v518_v19, %v519_v20  ;;  %v690_v43 = vrot.slane %v656_v27, 2 }
  0x33   : > { %v236_v44 = vmul.f32 %v885_v11, %v950_v15  ;;  %v237_v45 = vmul.f32 %v885_v11, %v956_v22  ;;  %v691_v47 = vrot.slane %v657_v32, 2  ;;  %v313_v49 = vmul.f32 %v887_v12, %v950_v15 }
  0x34   : > { %725 = vst.msk [vmem:[%s971_s24 + $0x8] sm:$0xff] %vm144_vm0, %v717_v35  ;;  %v470_v46 = vadd.f32 %v444_v38, %v394_v36  ;;  %v314_v50 = vmul.f32 %v887_v12, %v956_v22  ;;  %v616_v51 = vsel %vm262_vm2, %v614_v31, %v615_v39  ;;  %v213_v52 = vmul.f32 %v892_v16, %v950_v15 }
  0x35   : > { %v272_v53 = vrot.slane %v236_v44, 1  ;;  %v273_v54 = vrot.slane %v237_v45, 1  ;;  %v349_v56 = vrot.slane %v313_v49, 2  ;;  %v410_v58 = vmul.f32 %v909_v30, %v997_v3  ;;  %v1085_v49 = vld [vmem:[#allocation2 + $0x68] sm:$0x3] }
  0x36   : > { %v546_v55 = vadd.f32 %v520_v42, %v470_v46  ;;  %v350_v57 = vrot.slane %v314_v50, 2  ;;  %v411_v22 = vmul.f32 %v909_v30, %v1003_v7  ;;  %v486_v15 = vmul.f32 %v911_v33, %v997_v3 }
  0x37   : > { %v274_v61 = vsel %vm262_vm2, %v272_v53, %v273_v54  ;;  %v487_v62 = vmul.f32 %v911_v33, %v1003_v7  ;;  %v387_v2 = vmul.f32 %v906_v26, %v997_v3  ;;  %v445_v4 = vrot.slane %v410_v58, 1 }
  0x38   : > { %v566_v63 = vadd.f32 %v558_v29, %v546_v55  ;;  %v298_v0 = vadd.f32 %v274_v61, %v213_v52  ;;  %v351_v1 = vsel %vm339_vm3, %v349_v56, %v350_v57  ;;  %v446_v5 = vrot.slane %v411_v22, 1 }
  0x39   : > { %v521_v6 = vrot.slane %v486_v15, 2  ;;  %v522_v37 = vrot.slane %v487_v62, 2  ;;  %v582_v9 = vmul.f32 %v913_v34, %v1041_v59  ;;  %v583_v10 = vmul.f32 %v913_v34, %v1043_v60 }
  0x3a   : > { %v642_v41 = vadd.f32 %v616_v51, %v566_v63  ;;  %v375_v8 = vadd.f32 %v351_v1, %v298_v0  ;;  %v692_v13 = vsel %vm339_vm3, %v690_v43, %v691_v47  ;;  %v559_v14 = vmul.f32 %v928_v48, %v1041_v59  ;;  %v1083_v47 = vld [vmem:[#allocation2 + $0x60] sm:$0xff] }
  0x3b   : > { %v658_v17 = vmul.f32 %v919_v40, %v1041_v59  ;;  %v659_v18 = vmul.f32 %v919_v40, %v1043_v60  ;;  %v617_v21 = vrot.slane %v582_v9, 1  ;;  %v618_v23 = vrot.slane %v583_v10, 1 }
  0x3c   : > { %v718_v19 = vadd.f32 %v692_v13, %v642_v41  ;;  %v395_v20 = vadd.f32 %v387_v2, %v375_v8  ;;  %v447_v24 = vsel %vm262_vm2, %v445_v4, %v446_v5  ;;  %v523_v25 = vsel %vm339_vm3, %v521_v6, %v522_v37 }
  0x3d   : > { %v693_v27 = vrot.slane %v658_v17, 2  ;;  %v238_v28 = vmul.f32 %v885_v11, %v997_v3  ;;  %v694_v31 = vrot.slane %v659_v18, 2  ;;  %v239_v32 = vmul.f32 %v885_v11, %v1003_v7 }
  0x3e   : > { %726 = vst.msk [vmem:[%s971_s24 + $0x10] sm:$0xff] %vm144_vm0, %v718_v19  ;;  %v471_v29 = vadd.f32 %v447_v24, %v395_v20  ;;  %v315_v35 = vmul.f32 %v887_v12, %v997_v3  ;;  %v619_v36 = vsel %vm262_vm2, %v617_v21, %v618_v23  ;;  %v214_v38 = vmul.f32 %v892_v16, %v997_v3 }
  0x3f   : > { %v275_v39 = vrot.slane %v238_v28, 1  ;;  %v316_v42 = vmul.f32 %v887_v12, %v1003_v7  ;;  %v276_v44 = vrot.slane %v239_v32, 1  ;;  %v412_v46 = vmul.f32 %v909_v30, %v1041_v59  ;;  %v1126_v32 = vld [vmem:[#allocation2 + $0x78] sm:$0x3] }
  0x40   : > { %v547_v43 = vadd.f32 %v523_v25, %v471_v29  ;;  %v352_v45 = vrot.slane %v315_v35, 2  ;;  %v413_v51 = vmul.f32 %v909_v30, %v1043_v60  ;;  %v488_v3 = vmul.f32 %v911_v33, %v1041_v59 }
  0x41   : > { %v353_v50 = vrot.slane %v316_v42, 2  ;;  %v489_v7 = vmul.f32 %v911_v33, %v1043_v60  ;;  %v695_v53 = vsel %vm339_vm3, %v693_v27, %v694_v31  ;;  %v277_v54 = vsel %vm262_vm2, %v275_v39, %v276_v44  ;;  %v1124_v31 = vld [vmem:[#allocation2 + $0x70] sm:$0xff] }
  0x42   : > { %v567_v52 = vadd.f32 %v559_v14, %v547_v43  ;;  %v448_v55 = vrot.slane %v412_v46, 1  ;;  %v299_v56 = vadd.f32 %v277_v54, %v214_v38  ;;  %v449_v58 = vrot.slane %v413_v51, 1 }
  0x43   : > { %v354_v57 = vsel %vm339_vm3, %v352_v45, %v353_v50  ;;  %v524_v61 = vrot.slane %v488_v3, 2  ;;  %v525_v15 = vrot.slane %v489_v7, 2  ;;  %v584_v62 = vmul.f32 %v913_v34, %v1083_v47 }
  0x44   : > { %v643_v22 = vadd.f32 %v619_v36, %v567_v52  ;;  %v585_v63 = vmul.f32 %v913_v34, %v1085_v49  ;;  %v376_v0 = vadd.f32 %v354_v57, %v299_v56  ;;  %v388_v1 = vmul.f32 %v906_v26, %v1041_v59 }
  0x45   : > { %v660_v2 = vmul.f32 %v919_v40, %v1083_v47  ;;  %v661_v4 = vmul.f32 %v919_v40, %v1085_v49  ;;  %v450_v6 = vsel %vm262_vm2, %v448_v55, %v449_v58  ;;  %v560_v37 = vmul.f32 %v928_v48, %v1083_v47 }
  0x46   : > { %v719_v5 = vadd.f32 %v695_v53, %v643_v22  ;;  %v396_v41 = vadd.f32 %v388_v1, %v376_v0  ;;  %v526_v8 = vsel %vm339_vm3, %v524_v61, %v525_v15  ;;  %v620_v9 = vrot.slane %v584_v62, 1 }
  0x47   : > { %v621_v10 = vrot.slane %v585_v63, 1  ;;  %v696_v13 = vrot.slane %v660_v2, 2  ;;  %v240_v14 = vmul.f32 %v885_v11, %v1041_v59  ;;  %v241_v17 = vmul.f32 %v885_v11, %v1043_v60 }
  0x48   : > { %727 = vst.msk [vmem:[%s971_s24 + $0x18] sm:$0xff] %vm144_vm0, %v719_v5  ;;  %v317_v18 = vmul.f32 %v887_v12, %v1041_v59  ;;  %v472_v19 = vadd.f32 %v450_v6, %v396_v41  ;;  %v697_v20 = vrot.slane %v661_v4, 2  ;;  %v215_v21 = vmul.f32 %v892_v16, %v1041_v59 }
  0x49   : > { %v318_v23 = vmul.f32 %v887_v12, %v1043_v60  ;;  %v278_v24 = vrot.slane %v240_v14, 1  ;;  %v279_v25 = vrot.slane %v241_v17, 1  ;;  %v414_v28 = vmul.f32 %v909_v30, %v1083_v47  ;;  %v199_v17 = vld [vmem:[#allocation2 + $0x80] sm:$0xff] }
  0x4a   : > { %v355_v27 = vrot.slane %v317_v18, 2  ;;  %v548_v29 = vadd.f32 %v526_v8, %v472_v19  ;;  %v415_v36 = vmul.f32 %v909_v30, %v1085_v49  ;;  %v490_v59 = vmul.f32 %v911_v33, %v1083_v47 }
  0x4b   : > { %v356_v35 = vrot.slane %v318_v23, 2  ;;  %v622_v60 = vsel %vm262_vm2, %v620_v9, %v621_v10  ;;  %v280_v38 = vsel %vm262_vm2, %v278_v24, %v279_v25  ;;  %v451_v39 = vrot.slane %v414_v28, 1  ;;  %v200_v23 = vld [vmem:[#allocation2 + $0x88] sm:$0x3] }
  0x4c   : > { %v491_v42 = vmul.f32 %v911_v33, %v1085_v49  ;;  %v568_v43 = vadd.f32 %v560_v37, %v548_v29  ;;  %v300_v44 = vadd.f32 %v280_v38, %v215_v21  ;;  %v452_v46 = vrot.slane %v415_v36, 1 }
  0x4d   : > { %v357_v45 = vsel %vm339_vm3, %v355_v27, %v356_v35  ;;  %v527_v50 = vrot.slane %v490_v59, 2  ;;  %v586_v3 = vmul.f32 %v913_v34, %v1124_v31  ;;  %v587_v7 = vmul.f32 %v913_v34, %v1126_v32 }
  0x4e   : > { %v528_v51 = vrot.slane %v491_v42, 2  ;;  %v644_v52 = vadd.f32 %v622_v60, %v568_v43  ;;  %v377_v53 = vadd.f32 %v357_v45, %v300_v44  ;;  %v389_v54 = vmul.f32 %v906_v26, %v1083_v47 }
  0x4f   : > { %v662_v55 = vmul.f32 %v919_v40, %v1124_v31  ;;  %v698_v56 = vsel %vm339_vm3, %v696_v13, %v697_v20  ;;  %v561_v57 = vmul.f32 %v928_v48, %v1124_v31  ;;  %v623_v58 = vrot.slane %v586_v3, 1 }
  0x50   : > { %v624_v61 = vrot.slane %v587_v7, 1  ;;  %v720_v22 = vadd.f32 %v698_v56, %v644_v52  ;;  %v397_v15 = vadd.f32 %v389_v54, %v377_v53  ;;  %v453_v62 = vsel %vm262_vm2, %v451_v39, %v452_v46 }
  0x51   : > { %v529_v63 = vsel %vm339_vm3, %v527_v50, %v528_v51  ;;  %v663_v0 = vmul.f32 %v919_v40, %v1126_v32  ;;  %v699_v1 = vrot.slane %v662_v55, 2  ;;  %v242_v2 = vmul.f32 %v885_v11, %v1083_v47 }
  0x52   : > { %v243_v4 = vmul.f32 %v885_v11, %v1085_v49  ;;  %728 = vst.msk [vmem:[%s971_s24 + $0x20] sm:$0xff] %vm144_vm0, %v720_v22  ;;  %v473_v5 = vadd.f32 %v453_v62, %v397_v15  ;;  %v216_v6 = vmul.f32 %v892_v16, %v1083_v47  ;;  %v319_v37 = vmul.f32 %v887_v12, %v1083_v47 }
  0x53   : > { %v320_v41 = vmul.f32 %v887_v12, %v1085_v49  ;;  %v625_v8 = vsel %vm262_vm2, %v623_v58, %v624_v61  ;;  %v281_v9 = vrot.slane %v242_v2, 1  ;;  %v416_v13 = vmul.f32 %v909_v30, %v1124_v31 }
  0x54   : > { %v282_v10 = vrot.slane %v243_v4, 1  ;;  %v549_v14 = vadd.f32 %v529_v63, %v473_v5  ;;  %v358_v18 = vrot.slane %v319_v37, 2  ;;  %v417_v20 = vmul.f32 %v909_v30, %v1126_v32  ;;  %v201_v63 = vld [vmem:[#allocation2 + $0x90] sm:$0xff]  ;;  %v202_v4 = vld [vmem:[#allocation2 + $0x98] sm:$0x3] }
  0x55   : > { %v359_v19 = vrot.slane %v320_v41, 2  ;;  %v700_v21 = vrot.slane %v663_v0, 2  ;;  %v492_v49 = vmul.f32 %v911_v33, %v1124_v31  ;;  %v493_v24 = vmul.f32 %v911_v33, %v1126_v32 }
  0x56   : > { %v283_v47 = vsel %vm262_vm2, %v281_v9, %v282_v10  ;;  %v569_v25 = vadd.f32 %v561_v57, %v549_v14  ;;  %v454_v28 = vrot.slane %v416_v13, 1  ;;  %v455_v29 = vrot.slane %v417_v20, 1 }
  0x57   : > { %v301_v27 = vadd.f32 %v283_v47, %v216_v6  ;;  %v360_v35 = vsel %vm339_vm3, %v358_v18, %v359_v19  ;;  %v530_v36 = vrot.slane %v492_v49, 2  ;;  %v531_v59 = vrot.slane %v493_v24, 2 }
  0x58   : > { %v588_v60 = vmul.f32 %v913_v34, %v199_v17  ;;  %v645_v38 = vadd.f32 %v625_v8, %v569_v25  ;;  %v390_v42 = vmul.f32 %v906_v26, %v1124_v31  ;;  %v589_v43 = vmul.f32 %v913_v34, %v200_v23 }
  0x59   : > { %v378_v39 = vadd.f32 %v360_v35, %v301_v27  ;;  %v701_v44 = vsel %vm339_vm3, %v699_v1, %v700_v21  ;;  %v562_v45 = vmul.f32 %v928_v48, %v199_v17  ;;  %v664_v46 = vmul.f32 %v919_v40, %v199_v17 }
  0x5a   : > { %v665_v50 = vmul.f32 %v919_v40, %v200_v23  ;;  %v721_v51 = vadd.f32 %v701_v44, %v645_v38  ;;  %v456_v7 = vsel %vm262_vm2, %v454_v28, %v455_v29  ;;  %v532_v52 = vsel %vm339_vm3, %v530_v36, %v531_v59 }
  0x5b   : > { %v398_v3 = vadd.f32 %v390_v42, %v378_v39  ;;  %v626_v53 = vrot.slane %v588_v60, 1  ;;  %v627_v54 = vrot.slane %v589_v43, 1  ;;  %v244_v55 = vmul.f32 %v885_v11, %v1124_v31 }
  0x5c   : > { %v245_v56 = vmul.f32 %v885_v11, %v1126_v32  ;;  %729 = vst.msk [vmem:[%s971_s24 + $0x28] sm:$0xff] %vm144_vm0, %v721_v51  ;;  %v217_v58 = vmul.f32 %v892_v16, %v1124_v31  ;;  %v321_v61 = vmul.f32 %v887_v12, %v1124_v31  ;;  %v322_v22 = vmul.f32 %v887_v12, %v1126_v32 }
  0x5d   : > { %v474_v57 = vadd.f32 %v456_v7, %v398_v3  ;;  %v702_v15 = vrot.slane %v664_v46, 2  ;;  %v703_v62 = vrot.slane %v665_v50, 2  ;;  %v284_v0 = vrot.slane %v244_v55, 1 }
  0x5e   : > { %v285_v1 = vrot.slane %v245_v56, 1  ;;  %v361_v11 = vrot.slane %v321_v61, 2  ;;  %v362_v5 = vrot.slane %v322_v22, 2  ;;  %v418_v6 = vmul.f32 %v909_v30, %v199_v17 }
  0x5f   : > { %v550_v2 = vadd.f32 %v532_v52, %v474_v57  ;;  %v419_v16 = vmul.f32 %v909_v30, %v200_v23  ;;  %v494_v31 = vmul.f32 %v911_v33, %v199_v17  ;;  %v495_v41 = vmul.f32 %v911_v33, %v200_v23 }
  0x60   : > { %v286_v37 = vsel %vm262_vm2, %v284_v0, %v285_v1  ;;  %v457_v8 = vrot.slane %v418_v6, 1  ;;  %v590_v9 = vmul.f32 %v913_v34, %v201_v63  ;;  %v628_v10 = vsel %vm262_vm2, %v626_v53, %v627_v54 }
  0x61   : > { %v570_v12 = vadd.f32 %v562_v45, %v550_v2  ;;  %v302_v32 = vadd.f32 %v286_v37, %v217_v58  ;;  %v363_v13 = vsel %vm339_vm3, %v361_v11, %v362_v5  ;;  %v458_v14 = vrot.slane %v419_v16, 1 }
  0x62   : > { %v591_v18 = vmul.f32 %v913_v34, %v202_v4  ;;  %v391_v30 = vmul.f32 %v906_v26, %v199_v17  ;;  %v704_v21 = vsel %vm339_vm3, %v702_v15, %v703_v62  ;;  %v533_v23 = vrot.slane %v494_v31, 2 }
  0x63   : > { %v646_v19 = vadd.f32 %v628_v10, %v570_v12  ;;  %v379_v20 = vadd.f32 %v363_v13, %v302_v32  ;;  %v459_v33 = vsel %vm262_vm2, %v457_v8, %v458_v14  ;;  %v534_v47 = vrot.slane %v495_v41, 2 }
  0x64   : > { %v629_v25 = vrot.slane %v590_v9, 1  ;;  %v630_v27 = vrot.slane %v591_v18, 1  ;;  %v666_v28 = vmul.f32 %v919_v40, %v201_v63  ;;  %v667_v29 = vmul.f32 %v919_v40, %v202_v4 }
  0x65   : > { %v722_v49 = vadd.f32 %v704_v21, %v646_v19  ;;  %v399_v24 = vadd.f32 %v391_v30, %v379_v20  ;;  %v563_v26 = vmul.f32 %v928_v48, %v201_v63  ;;  %v535_v17 = vsel %vm339_vm3, %v533_v23, %v534_v47 }
  0x66   : > { %v631_v36 = vsel %vm262_vm2, %v629_v25, %v630_v27  ;;  %v705_v59 = vrot.slane %v666_v28, 2  ;;  %v706_v60 = vrot.slane %v667_v29, 2 }
  0x67   : > { %730 = vst.msk [vmem:[%s971_s24 + $0x30] sm:$0xff] %vm144_vm0, %v722_v49  ;;  %v475_v34 = vadd.f32 %v459_v33, %v399_v24 }
  0x68   : > { %v707_v42 = vsel %vm339_vm3, %v705_v59, %v706_v60 }
  0x69   : > { %v551_v35 = vadd.f32 %v535_v17, %v475_v34 }
  0x6b   : > { %v571_v38 = vadd.f32 %v563_v26, %v551_v35 }
  0x6d   : > { %v647_v39 = vadd.f32 %v631_v36, %v571_v38 }
  0x6f   : > { %v723_v43 = vadd.f32 %v707_v42, %v647_v39 }
  0x71   : > { %731 = vst.msk [vmem:[%s971_s24 + $0x38] sm:$0xff] %vm144_vm0, %v723_v43 }
  0x72 PF: > { %s12_s9 = sadd.s32 1, %s815_s9  }
  0x73   : > { %p9_p4 = scmp.ge.s32.totalorder %s12_s9, 4  }
  0x75   :  { %11 = sbr.rel (!%p9_p4) target bundleno = 1 (0x1), region = 59 }

</bundles_post_ra>
